<compile_context>
chip_gen: v6e
topology: v6e:2x2x1
jax: 0.10.0
libtpu: 0.0.40
codegen_flags: <defaults>
</compile_context>

<pallas_src>
import functools
import numpy as np
import jax
import jax.numpy as jnp
from jax import lax
from jax.experimental import pallas as pl
from jax.experimental.pallas import tpu as pltpu

# ----------------------------------------------------------------------------
# Module hyper-parameters (the torch module's globals).
# ----------------------------------------------------------------------------
DISC_IN_SIZE = 1
DISC_OUT_SIZE = 1
DISC_CAPACITY = 4
DISC_N_LAYERS = 3
DISC_KERNEL_SIZE = 5
DISC_STRIDE = 2
DISC_NORM_MODE = "identity"
N_DISCRIMINATORS = 3
LRELU_SLOPE = 0.2

# f32-exact MXU path for the data-carrying matmuls.  At Cout<=8 the MXU is ~idle
# (the kernel is launch/DMA bound), so the extra HIGHEST passes are free; flip to
# jax.lax.Precision.DEFAULT in production if bf16-level accuracy is acceptable.
MATMUL_PRECISION = jax.lax.Precision.HIGHEST


def get_padding(kernel_size, stride=1, dilation=1):
    # cached_conv "centered" padding; torch Conv1d uses element [0] symmetrically.
    p = (kernel_size - 1) * dilation + 1 - stride
    return (p // 2 + p % 2, p // 2)


def conv_out_len(lin, k, stride, pad):
    return (lin + 2 * pad - k) // stride + 1


# ----------------------------------------------------------------------------
# In-kernel helpers
# ----------------------------------------------------------------------------
def _conv1d_ncl(h, w_ref, b_ref, *, lin, lout, ksize, stride, pad):
    """Conv1d in NCL layout (channels on sublanes, length on lanes).

    h     : (Cin, lin)  f32 activation value (VMEM/vreg resident)
    w_ref : (K, Cout, Cin) weight ref
    b_ref : (Cout, 1) bias ref
    returns (Cout, lout) f32 pre-activation
    """
    bias = b_ref[...].astype(jnp.float32)
    if ksize == 1 and stride == 1 and pad == 0:          # final 1x1 conv epilogue
        return jnp.dot(w_ref[0].astype(jnp.float32), h,
                       preferred_element_type=jnp.float32,
                       precision=MATMUL_PRECISION) + bias

    row = lax.broadcasted_iota(jnp.int32, (lin, lout), 0)
    col = lax.broadcasted_iota(jnp.int32, (lin, lout), 1)
    cout = w_ref.shape[1]
    y = jnp.zeros((cout, lout), jnp.float32)
    for t in range(ksize):                               # static unroll over taps
        # Tap shift + stride + zero padding as one 0/1 selection matmul:
        #   u_t[ci, l] = h[ci, stride*l + t - pad]   (0 when out of range)
        sel = jnp.where(row == stride * col + (t - pad), 1.0, 0.0).astype(jnp.float32)
        u_t = jnp.dot(h, sel, preferred_element_type=jnp.float32,
                      precision=MATMUL_PRECISION)        # (Cin, lout)
        y = y + jnp.dot(w_ref[t].astype(jnp.float32), u_t,
                        preferred_element_type=jnp.float32,
                        precision=MATMUL_PRECISION)      # (Cout, lout)
    return y + bias


def _convnet_kernel(*refs, n_layers, lens, ksize, stride, pad, alpha):
    """One full ConvNet (n_layers strided convs + LeakyReLUs + final 1x1 conv)
    for one batch element, plus the fused avg_pool1d(x, 2) feeding the next
    discriminator.  Intermediates never touch HBM.

    refs layout: x, (w0, b0, ..., w_n, b_n), (f0, ..., f_n), pooled
    """
    n_conv = n_layers + 1
    x_ref = refs[0]
    w_refs = refs[1:1 + 2 * n_conv:2]
    b_refs = refs[2:2 + 2 * n_conv:2]
    f_refs = refs[1 + 2 * n_conv:1 + 3 * n_conv]
    pool_ref = refs[1 + 3 * n_conv]

    x = x_ref[0].astype(jnp.float32)                     # (Cin, L), length on lanes
    h = x
    for i in range(n_layers):                            # static unroll over layers
        y = _conv1d_ncl(h, w_refs[i], b_refs[i], lin=lens[i], lout=lens[i + 1],
                        ksize=ksize, stride=stride, pad=pad)
        f_refs[i][0] = y.astype(f_refs[i].dtype)         # conv output (pre-activation)
        h = jnp.where(y > 0, y, alpha * y)               # LeakyReLU stays on-chip

    # Final 1x1 conv folded into the same kernel.
    y = _conv1d_ncl(h, w_refs[-1], b_refs[-1], lin=lens[-1], lout=lens[-1],
                    ksize=1, stride=1, pad=0)
    f_refs[-1][0] = y.astype(f_refs[-1].dtype)

    # Fused avg_pool1d(x, 2) producing the next scale's input.
    lhalf = lens[0] // 2
    prow = lax.broadcasted_iota(jnp.int32, (lens[0], lhalf), 0)
    pcol = lax.broadcasted_iota(jnp.int32, (lens[0], lhalf), 1)
    pool_sel = jnp.where((prow == 2 * pcol) | (prow == 2 * pcol + 1),
                         0.5, 0.0).astype(jnp.float32)
    pool_ref[0] = jnp.dot(x, pool_sel, preferred_element_type=jnp.float32,
                          precision=MATMUL_PRECISION).astype(pool_ref.dtype)


# ----------------------------------------------------------------------------
# Wrappers
# ----------------------------------------------------------------------------
def convnet_forward(params_k, x_ncl, *, ksize=DISC_KERNEL_SIZE,
                    stride=DISC_STRIDE, alpha=LRELU_SLOPE):
    """Fused ConvNet.forward for one discriminator (single pallas_call).

    params_k : list of (w (K, Cout, Cin), b (Cout, 1)); last entry is the 1x1 conv.
    x_ncl    : (B, Cin, L) PyTorch NCL layout.
    Returns  : ([conv outputs in NCL], avg_pool1d(x, 2)).
    """
    B, cin, L = x_ncl.shape
    n_conv = len(params_k)
    n_layers = n_conv - 1
    pad = get_padding(ksize, stride)[0]

    lens = [L]
    for _ in range(n_layers):
        lens.append(conv_out_len(lens[-1], ksize, stride, pad))
    lens = tuple(lens)
    couts = [int(w.shape[1]) for (w, _) in params_k]

    kernel = functools.partial(_convnet_kernel, n_layers=n_layers, lens=lens,
                               ksize=ksize, stride=stride, pad=pad, alpha=alpha)

    in_specs = [pl.BlockSpec((1, cin, L), lambda b: (b, 0, 0))]
    flat_params = []
    for (w, b2) in params_k:
        in_specs.append(pl.BlockSpec(w.shape, lambda b: (0, 0, 0)))   # resident weights
        in_specs.append(pl.BlockSpec(b2.shape, lambda b: (0, 0)))
        flat_params += [w, b2]

    feat_dims = [(couts[i], lens[i + 1]) for i in range(n_layers)]
    feat_dims.append((couts[-1], lens[-1]))                            # final 1x1 conv
    pool_dims = (cin, L // 2)

    out_specs = tuple(pl.BlockSpec((1, c, l), lambda b: (b, 0, 0))
                      for (c, l) in feat_dims)
    out_specs += (pl.BlockSpec((1,) + pool_dims, lambda b: (b, 0, 0)),)
    out_shape = tuple(jax.ShapeDtypeStruct((B, c, l), x_ncl.dtype)
                      for (c, l) in feat_dims)
    out_shape += (jax.ShapeDtypeStruct((B,) + pool_dims, x_ncl.dtype),)

    outs = pl.pallas_call(
        kernel,
        grid=(B,),
        in_specs=in_specs,
        out_specs=out_specs,
        out_shape=out_shape,
        compiler_params=pltpu.CompilerParams(
            dimension_semantics=("parallel",)),           # megacore sharding on v7x
    )(x_ncl, *flat_params)
    return list(outs[:-1]), outs[-1]


def multi_scale_discriminator(all_params_k, x_ncl):
    """MultiScaleDiscriminator.forward.  x_ncl: (B, C, L) PyTorch layout."""
    outs = []
    h = x_ncl
    for params_k in all_params_k:
        feats, pooled = convnet_forward(params_k, h)
        outs.append(feats)
        h = pooled                  # fused avg_pool1d(x, 2) feeds the next scale
    return outs


# ----------------------------------------------------------------------------
# Parameter init (torch-style) + kernel-layout prep
# ----------------------------------------------------------------------------
def init_convnet_params(key, in_size, out_size, capacity, n_layers, kernel_size):
    channels = [in_size] + list(capacity * 2 ** np.arange(n_layers))
    channels[-1] = channels[-2]
    params = []
    for i in range(n_layers):
        key, kw, kb = jax.random.split(key, 3)
        cin, cout = int(channels[i]), int(channels[i + 1])
        bound = 1.0 / np.sqrt(cin * kernel_size)
        w = jax.random.uniform(kw, (kernel_size, cin, cout), jnp.float32, -bound, bound)
        b = jax.random.uniform(kb, (cout,), jnp.float32, -bound, bound)
        params.append((w, b))
    key, kw, kb = jax.random.split(key, 3)
    cin = int(channels[-1])
    bound = 1.0 / np.sqrt(cin)
    w = jax.random.uniform(kw, (1, cin, out_size), jnp.float32, -bound, bound)
    b = jax.random.uniform(kb, (out_size,), jnp.float32, -bound, bound)
    params.append((w, b))
    return params


def prep_params_for_kernel(params):
    """(K, Cin, Cout)/(Cout,) -> ((K, Cout, Cin), (Cout, 1)) for the kernel."""
    prepped = []
    for (w, b) in params:
        cout = int(w.shape[2])
        prepped.append((jnp.transpose(w, (0, 2, 1)), b.reshape(cout, 1)))
    return prepped


# ----------------------------------------------------------------------------
# Pure-JAX reference (correctness check only)
# ----------------------------------------------------------------------------
def _ref_conv1d(x_ncl, w_kio, b, stride, padding):
    w_oik = jnp.transpose(w_kio, (2, 1, 0))      # (Cout, Cin, K)
    y = jax.lax.conv_general_dilated(
        x_ncl, w_oik, window_strides=(stride,), padding=[(padding, padding)],
        dimension_numbers=("NCH", "OIH", "NCH"),
        precision=jax.lax.Precision.HIGHEST)
    return y + b[None, :, None]


def _ref_forward(all_params, x_ncl):
    outs = []
    h = x_ncl
    pad = get_padding(DISC_KERNEL_SIZE, DISC_STRIDE)[0]
    for params in all_params:
        feats, z = [], h
        for (w, b) in params[:-1]:
            y = _ref_conv1d(z, w, b, DISC_STRIDE, pad)
            feats.append(y)
            z = jnp.where(y > 0, y, LRELU_SLOPE * y)
        w, b = params[-1]
        feats.append(_ref_conv1d(z, w, b, 1, 0))
        outs.append(feats)
        B, C, L = h.shape
        h = jnp.mean(h[:, :, :(L // 2) * 2].reshape(B, C, L // 2, 2), axis=-1)
    return outs


# ----------------------------------------------------------------------------
if __name__ == "__main__":
    key = jax.random.PRNGKey(0)
    key, kx, kp = jax.random.split(key, 3)

    B, L = 2, 64
    x = jax.random.normal(kx, (B, DISC_IN_SIZE, L), jnp.float32)   # PyTorch NCL

    param_keys = jax.random.split(kp, N_DISCRIMINATORS)
    all_params = [
        init_convnet_params(param_keys[i], DISC_IN_SIZE, DISC_OUT_SIZE,
                            DISC_CAPACITY, DISC_N_LAYERS, DISC_KERNEL_SIZE)
        for i in range(N_DISCRIMINATORS)
    ]
    all_params_k = [prep_params_for_kernel(p) for p in all_params]

    out = multi_scale_discriminator(all_params_k, x)
    out = jax.block_until_ready(out)

    ref = _ref_forward(all_params, x)
    for feats_k, feats_r in zip(out, ref):
        assert len(feats_k) == len(feats_r)
        for fk, fr in zip(feats_k, feats_r):
            assert fk.shape == fr.shape, (fk.shape, fr.shape)
            np.testing.assert_allclose(np.asarray(fk), np.asarray(fr),
                                       rtol=1e-3, atol=1e-3)

    print("KERNEL_OK")
</pallas_src>

<mosaic_0001>
module attributes {stable_mosaic.version = 11 : i64} {
  func.func @_convnet_kernel(%arg0: i32, %arg1: memref<1x1x64xf32, #tpu.memory_space<vmem>>, %arg2: memref<5x4x1xf32, #tpu.memory_space<vmem>>, %arg3: memref<4x1xf32, #tpu.memory_space<vmem>>, %arg4: memref<5x8x4xf32, #tpu.memory_space<vmem>>, %arg5: memref<8x1xf32, #tpu.memory_space<vmem>>, %arg6: memref<5x8x8xf32, #tpu.memory_space<vmem>>, %arg7: memref<8x1xf32, #tpu.memory_space<vmem>>, %arg8: memref<1x1x8xf32, #tpu.memory_space<vmem>>, %arg9: memref<1x1xf32, #tpu.memory_space<vmem>>, %arg10: memref<1x4x32xf32, #tpu.memory_space<vmem>>, %arg11: memref<1x8x16xf32, #tpu.memory_space<vmem>>, %arg12: memref<1x8x8xf32, #tpu.memory_space<vmem>>, %arg13: memref<1x1x8xf32, #tpu.memory_space<vmem>>, %arg14: memref<1x1x32xf32, #tpu.memory_space<vmem>>) attributes {dimension_semantics = [#tpu.dimension_semantics<parallel>], iteration_bounds = array<i64: 2>, scalar_prefetch = 0 : i64, scratch_operands = 0 : i64, tpu.core_type = #tpu.core_type<tc>, window_params = [{transform_indices = @transform_0, window_bounds = array<i64: 1, 1, 64>}, {pipeline_mode = #tpu.pipeline_mode<synchronous>, transform_indices = @transform_1, window_bounds = array<i64: 5, 4, 1>}, {pipeline_mode = #tpu.pipeline_mode<synchronous>, transform_indices = @transform_2, window_bounds = array<i64: 4, 1>}, {pipeline_mode = #tpu.pipeline_mode<synchronous>, transform_indices = @transform_3, window_bounds = array<i64: 5, 8, 4>}, {pipeline_mode = #tpu.pipeline_mode<synchronous>, transform_indices = @transform_4, window_bounds = array<i64: 8, 1>}, {pipeline_mode = #tpu.pipeline_mode<synchronous>, transform_indices = @transform_5, window_bounds = array<i64: 5, 8, 8>}, {pipeline_mode = #tpu.pipeline_mode<synchronous>, transform_indices = @transform_6, window_bounds = array<i64: 8, 1>}, {pipeline_mode = #tpu.pipeline_mode<synchronous>, transform_indices = @transform_7, window_bounds = array<i64: 1, 1, 8>}, {pipeline_mode = #tpu.pipeline_mode<synchronous>, transform_indices = @transform_8, window_bounds = array<i64: 1, 1>}, {transform_indices = @transform_9, window_bounds = array<i64: 1, 4, 32>}, {transform_indices = @transform_10, window_bounds = array<i64: 1, 8, 16>}, {transform_indices = @transform_11, window_bounds = array<i64: 1, 8, 8>}, {transform_indices = @transform_12, window_bounds = array<i64: 1, 1, 8>}, {transform_indices = @transform_13, window_bounds = array<i64: 1, 1, 32>}]} {
    %c0 = arith.constant 0 : index
    %c0_0 = arith.constant 0 : index
    %c0_1 = arith.constant 0 : index
    %0 = vector.load %arg1[%c0, %c0_0, %c0_1] : memref<1x1x64xf32, #tpu.memory_space<vmem>>, vector<1x1x64xf32>
    %1 = vector.shape_cast %0 : vector<1x1x64xf32> to vector<1x64xf32>
    %c0_2 = arith.constant 0 : index
    %c0_3 = arith.constant 0 : index
    %2 = vector.load %arg3[%c0_2, %c0_3] : memref<4x1xf32, #tpu.memory_space<vmem>>, vector<4x1xf32>
    %3 = tpu.iota {dimensions = array<i32: 0>} : vector<64x32xi32>
    %4 = tpu.iota {dimensions = array<i32: 1>} : vector<64x32xi32>
    %cst = arith.constant 0.000000e+00 : f32
    %5 = vector.broadcast %cst : f32 to vector<4x32xf32>
    %c2_i32 = arith.constant 2 : i32
    %6 = vector.broadcast %c2_i32 : i32 to vector<64x32xi32>
    %7 = arith.muli %6, %4 : vector<64x32xi32>
    %c-2_i32 = arith.constant -2 : i32
    %8 = vector.broadcast %c-2_i32 : i32 to vector<64x32xi32>
    %9 = arith.addi %7, %8 : vector<64x32xi32>
    %10 = arith.cmpi eq, %3, %9 : vector<64x32xi32>
    %cst_4 = arith.constant 1.000000e+00 : f32
    %cst_5 = arith.constant 0.000000e+00 : f32
    %11 = vector.broadcast %cst_4 : f32 to vector<64x32xf32>
    %12 = vector.broadcast %cst_5 : f32 to vector<64x32xf32>
    %13 = arith.select %10, %11, %12 : vector<64x32xi1>, vector<64x32xf32>
    %cst_6 = arith.constant dense<0.000000e+00> : vector<1x32xf32>
    %14 = tpu.matmul %1, %13, %cst_6 {dimension_numbers = #tpu.dot_dimension_numbers<[1], [0], [0], [1], [0, 0, 1, 1], [], []>, precision = #tpu.contract_precision<fp32>} : vector<1x64xf32>, vector<64x32xf32>, vector<1x32xf32> -> vector<1x32xf32>
    %c0_7 = arith.constant 0 : index
    %c0_8 = arith.constant 0 : index
    %c0_9 = arith.constant 0 : index
    %15 = vector.load %arg2[%c0_7, %c0_8, %c0_9] : memref<5x4x1xf32, #tpu.memory_space<vmem>>, vector<1x4x1xf32>
    %16 = vector.shape_cast %15 : vector<1x4x1xf32> to vector<4x1xf32>
    %cst_10 = arith.constant dense<0.000000e+00> : vector<4x32xf32>
    %17 = tpu.matmul %16, %14, %cst_10 {dimension_numbers = #tpu.dot_dimension_numbers<[1], [0], [0], [1], [0, 0, 1, 1], [], []>, precision = #tpu.contract_precision<fp32>} : vector<4x1xf32>, vector<1x32xf32>, vector<4x32xf32> -> vector<4x32xf32>
    %18 = arith.addf %5, %17 : vector<4x32xf32>
    %c2_i32_11 = arith.constant 2 : i32
    %19 = vector.broadcast %c2_i32_11 : i32 to vector<64x32xi32>
    %20 = arith.muli %19, %4 : vector<64x32xi32>
    %c-1_i32 = arith.constant -1 : i32
    %21 = vector.broadcast %c-1_i32 : i32 to vector<64x32xi32>
    %22 = arith.addi %20, %21 : vector<64x32xi32>
    %23 = arith.cmpi eq, %3, %22 : vector<64x32xi32>
    %cst_12 = arith.constant 1.000000e+00 : f32
    %cst_13 = arith.constant 0.000000e+00 : f32
    %24 = vector.broadcast %cst_12 : f32 to vector<64x32xf32>
    %25 = vector.broadcast %cst_13 : f32 to vector<64x32xf32>
    %26 = arith.select %23, %24, %25 : vector<64x32xi1>, vector<64x32xf32>
    %cst_14 = arith.constant dense<0.000000e+00> : vector<1x32xf32>
    %27 = tpu.matmul %1, %26, %cst_14 {dimension_numbers = #tpu.dot_dimension_numbers<[1], [0], [0], [1], [0, 0, 1, 1], [], []>, precision = #tpu.contract_precision<fp32>} : vector<1x64xf32>, vector<64x32xf32>, vector<1x32xf32> -> vector<1x32xf32>
    %c1 = arith.constant 1 : index
    %c0_15 = arith.constant 0 : index
    %c0_16 = arith.constant 0 : index
    %28 = vector.load %arg2[%c1, %c0_15, %c0_16] : memref<5x4x1xf32, #tpu.memory_space<vmem>>, vector<1x4x1xf32>
    %29 = vector.shape_cast %28 : vector<1x4x1xf32> to vector<4x1xf32>
    %cst_17 = arith.constant dense<0.000000e+00> : vector<4x32xf32>
    %30 = tpu.matmul %29, %27, %cst_17 {dimension_numbers = #tpu.dot_dimension_numbers<[1], [0], [0], [1], [0, 0, 1, 1], [], []>, precision = #tpu.contract_precision<fp32>} : vector<4x1xf32>, vector<1x32xf32>, vector<4x32xf32> -> vector<4x32xf32>
    %31 = arith.addf %18, %30 : vector<4x32xf32>
    %c2_i32_18 = arith.constant 2 : i32
    %32 = vector.broadcast %c2_i32_18 : i32 to vector<64x32xi32>
    %33 = arith.muli %32, %4 : vector<64x32xi32>
    %c0_i32 = arith.constant 0 : i32
    %34 = vector.broadcast %c0_i32 : i32 to vector<64x32xi32>
    %35 = arith.addi %33, %34 : vector<64x32xi32>
    %36 = arith.cmpi eq, %3, %35 : vector<64x32xi32>
    %cst_19 = arith.constant 1.000000e+00 : f32
    %cst_20 = arith.constant 0.000000e+00 : f32
    %37 = vector.broadcast %cst_19 : f32 to vector<64x32xf32>
    %38 = vector.broadcast %cst_20 : f32 to vector<64x32xf32>
    %39 = arith.select %36, %37, %38 : vector<64x32xi1>, vector<64x32xf32>
    %cst_21 = arith.constant dense<0.000000e+00> : vector<1x32xf32>
    %40 = tpu.matmul %1, %39, %cst_21 {dimension_numbers = #tpu.dot_dimension_numbers<[1], [0], [0], [1], [0, 0, 1, 1], [], []>, precision = #tpu.contract_precision<fp32>} : vector<1x64xf32>, vector<64x32xf32>, vector<1x32xf32> -> vector<1x32xf32>
    %c2 = arith.constant 2 : index
    %c0_22 = arith.constant 0 : index
    %c0_23 = arith.constant 0 : index
    %41 = vector.load %arg2[%c2, %c0_22, %c0_23] : memref<5x4x1xf32, #tpu.memory_space<vmem>>, vector<1x4x1xf32>
    %42 = vector.shape_cast %41 : vector<1x4x1xf32> to vector<4x1xf32>
    %cst_24 = arith.constant dense<0.000000e+00> : vector<4x32xf32>
    %43 = tpu.matmul %42, %40, %cst_24 {dimension_numbers = #tpu.dot_dimension_numbers<[1], [0], [0], [1], [0, 0, 1, 1], [], []>, precision = #tpu.contract_precision<fp32>} : vector<4x1xf32>, vector<1x32xf32>, vector<4x32xf32> -> vector<4x32xf32>
    %44 = arith.addf %31, %43 : vector<4x32xf32>
    %c2_i32_25 = arith.constant 2 : i32
    %45 = vector.broadcast %c2_i32_25 : i32 to vector<64x32xi32>
    %46 = arith.muli %45, %4 : vector<64x32xi32>
    %c1_i32 = arith.constant 1 : i32
    %47 = vector.broadcast %c1_i32 : i32 to vector<64x32xi32>
    %48 = arith.addi %46, %47 : vector<64x32xi32>
    %49 = arith.cmpi eq, %3, %48 : vector<64x32xi32>
    %cst_26 = arith.constant 1.000000e+00 : f32
    %cst_27 = arith.constant 0.000000e+00 : f32
    %50 = vector.broadcast %cst_26 : f32 to vector<64x32xf32>
    %51 = vector.broadcast %cst_27 : f32 to vector<64x32xf32>
    %52 = arith.select %49, %50, %51 : vector<64x32xi1>, vector<64x32xf32>
    %cst_28 = arith.constant dense<0.000000e+00> : vector<1x32xf32>
    %53 = tpu.matmul %1, %52, %cst_28 {dimension_numbers = #tpu.dot_dimension_numbers<[1], [0], [0], [1], [0, 0, 1, 1], [], []>, precision = #tpu.contract_precision<fp32>} : vector<1x64xf32>, vector<64x32xf32>, vector<1x32xf32> -> vector<1x32xf32>
    %c3 = arith.constant 3 : index
    %c0_29 = arith.constant 0 : index
    %c0_30 = arith.constant 0 : index
    %54 = vector.load %arg2[%c3, %c0_29, %c0_30] : memref<5x4x1xf32, #tpu.memory_space<vmem>>, vector<1x4x1xf32>
    %55 = vector.shape_cast %54 : vector<1x4x1xf32> to vector<4x1xf32>
    %cst_31 = arith.constant dense<0.000000e+00> : vector<4x32xf32>
    %56 = tpu.matmul %55, %53, %cst_31 {dimension_numbers = #tpu.dot_dimension_numbers<[1], [0], [0], [1], [0, 0, 1, 1], [], []>, precision = #tpu.contract_precision<fp32>} : vector<4x1xf32>, vector<1x32xf32>, vector<4x32xf32> -> vector<4x32xf32>
    %57 = arith.addf %44, %56 : vector<4x32xf32>
    %c2_i32_32 = arith.constant 2 : i32
    %58 = vector.broadcast %c2_i32_32 : i32 to vector<64x32xi32>
    %59 = arith.muli %58, %4 : vector<64x32xi32>
    %c2_i32_33 = arith.constant 2 : i32
    %60 = vector.broadcast %c2_i32_33 : i32 to vector<64x32xi32>
    %61 = arith.addi %59, %60 : vector<64x32xi32>
    %62 = arith.cmpi eq, %3, %61 : vector<64x32xi32>
    %cst_34 = arith.constant 1.000000e+00 : f32
    %cst_35 = arith.constant 0.000000e+00 : f32
    %63 = vector.broadcast %cst_34 : f32 to vector<64x32xf32>
    %64 = vector.broadcast %cst_35 : f32 to vector<64x32xf32>
    %65 = arith.select %62, %63, %64 : vector<64x32xi1>, vector<64x32xf32>
    %cst_36 = arith.constant dense<0.000000e+00> : vector<1x32xf32>
    %66 = tpu.matmul %1, %65, %cst_36 {dimension_numbers = #tpu.dot_dimension_numbers<[1], [0], [0], [1], [0, 0, 1, 1], [], []>, precision = #tpu.contract_precision<fp32>} : vector<1x64xf32>, vector<64x32xf32>, vector<1x32xf32> -> vector<1x32xf32>
    %c4 = arith.constant 4 : index
    %c0_37 = arith.constant 0 : index
    %c0_38 = arith.constant 0 : index
    %67 = vector.load %arg2[%c4, %c0_37, %c0_38] : memref<5x4x1xf32, #tpu.memory_space<vmem>>, vector<1x4x1xf32>
    %68 = vector.shape_cast %67 : vector<1x4x1xf32> to vector<4x1xf32>
    %cst_39 = arith.constant dense<0.000000e+00> : vector<4x32xf32>
    %69 = tpu.matmul %68, %66, %cst_39 {dimension_numbers = #tpu.dot_dimension_numbers<[1], [0], [0], [1], [0, 0, 1, 1], [], []>, precision = #tpu.contract_precision<fp32>} : vector<4x1xf32>, vector<1x32xf32>, vector<4x32xf32> -> vector<4x32xf32>
    %70 = arith.addf %57, %69 : vector<4x32xf32>
    %71 = vector.broadcast %2 : vector<4x1xf32> to vector<4x32xf32>
    %72 = arith.addf %70, %71 : vector<4x32xf32>
    %c0_40 = arith.constant 0 : index
    %c0_41 = arith.constant 0 : index
    %c0_42 = arith.constant 0 : index
    %73 = vector.load %arg10[%c0_40, %c0_41, %c0_42] : memref<1x4x32xf32, #tpu.memory_space<vmem>>, vector<1x4x32xf32>
    %74 = vector.shape_cast %73 : vector<1x4x32xf32> to vector<4x32xf32>
    %75 = vector.shape_cast %72 : vector<4x32xf32> to vector<1x4x32xf32>
    tpu.vector_store %arg10[%c0_40, %c0_41, %c0_42], %75 {strides = array<i32>} : memref<1x4x32xf32, #tpu.memory_space<vmem>>, vector<1x4x32xf32>,
    %cst_43 = arith.constant 0.000000e+00 : f32
    %76 = vector.broadcast %cst_43 : f32 to vector<4x32xf32>
    %77 = arith.cmpf ogt, %72, %76 : vector<4x32xf32>
    %cst_44 = arith.constant 2.000000e-01 : f32
    %78 = vector.broadcast %cst_44 : f32 to vector<4x32xf32>
    %79 = arith.mulf %78, %72 : vector<4x32xf32>
    %80 = arith.select %77, %72, %79 : vector<4x32xi1>, vector<4x32xf32>
    %c0_45 = arith.constant 0 : index
    %c0_46 = arith.constant 0 : index
    %81 = vector.load %arg5[%c0_45, %c0_46] : memref<8x1xf32, #tpu.memory_space<vmem>>, vector<8x1xf32>
    %82 = tpu.iota {dimensions = array<i32: 0>} : vector<32x16xi32>
    %83 = tpu.iota {dimensions = array<i32: 1>} : vector<32x16xi32>
    %cst_47 = arith.constant 0.000000e+00 : f32
    %84 = vector.broadcast %cst_47 : f32 to vector<8x16xf32>
    %c2_i32_48 = arith.constant 2 : i32
    %85 = vector.broadcast %c2_i32_48 : i32 to vector<32x16xi32>
    %86 = arith.muli %85, %83 : vector<32x16xi32>
    %c-2_i32_49 = arith.constant -2 : i32
    %87 = vector.broadcast %c-2_i32_49 : i32 to vector<32x16xi32>
    %88 = arith.addi %86, %87 : vector<32x16xi32>
    %89 = arith.cmpi eq, %82, %88 : vector<32x16xi32>
    %cst_50 = arith.constant 1.000000e+00 : f32
    %cst_51 = arith.constant 0.000000e+00 : f32
    %90 = vector.broadcast %cst_50 : f32 to vector<32x16xf32>
    %91 = vector.broadcast %cst_51 : f32 to vector<32x16xf32>
    %92 = arith.select %89, %90, %91 : vector<32x16xi1>, vector<32x16xf32>
    %cst_52 = arith.constant dense<0.000000e+00> : vector<4x16xf32>
    %93 = tpu.matmul %80, %92, %cst_52 {dimension_numbers = #tpu.dot_dimension_numbers<[1], [0], [0], [1], [0, 0, 1, 1], [], []>, precision = #tpu.contract_precision<fp32>} : vector<4x32xf32>, vector<32x16xf32>, vector<4x16xf32> -> vector<4x16xf32>
    %c0_53 = arith.constant 0 : index
    %c0_54 = arith.constant 0 : index
    %c0_55 = arith.constant 0 : index
    %94 = vector.load %arg4[%c0_53, %c0_54, %c0_55] : memref<5x8x4xf32, #tpu.memory_space<vmem>>, vector<1x8x4xf32>
    %95 = vector.shape_cast %94 : vector<1x8x4xf32> to vector<8x4xf32>
    %cst_56 = arith.constant dense<0.000000e+00> : vector<8x16xf32>
    %96 = tpu.matmul %95, %93, %cst_56 {dimension_numbers = #tpu.dot_dimension_numbers<[1], [0], [0], [1], [0, 0, 1, 1], [], []>, precision = #tpu.contract_precision<fp32>} : vector<8x4xf32>, vector<4x16xf32>, vector<8x16xf32> -> vector<8x16xf32>
    %97 = arith.addf %84, %96 : vector<8x16xf32>
    %c2_i32_57 = arith.constant 2 : i32
    %98 = vector.broadcast %c2_i32_57 : i32 to vector<32x16xi32>
    %99 = arith.muli %98, %83 : vector<32x16xi32>
    %c-1_i32_58 = arith.constant -1 : i32
    %100 = vector.broadcast %c-1_i32_58 : i32 to vector<32x16xi32>
    %101 = arith.addi %99, %100 : vector<32x16xi32>
    %102 = arith.cmpi eq, %82, %101 : vector<32x16xi32>
    %cst_59 = arith.constant 1.000000e+00 : f32
    %cst_60 = arith.constant 0.000000e+00 : f32
    %103 = vector.broadcast %cst_59 : f32 to vector<32x16xf32>
    %104 = vector.broadcast %cst_60 : f32 to vector<32x16xf32>
    %105 = arith.select %102, %103, %104 : vector<32x16xi1>, vector<32x16xf32>
    %cst_61 = arith.constant dense<0.000000e+00> : vector<4x16xf32>
    %106 = tpu.matmul %80, %105, %cst_61 {dimension_numbers = #tpu.dot_dimension_numbers<[1], [0], [0], [1], [0, 0, 1, 1], [], []>, precision = #tpu.contract_precision<fp32>} : vector<4x32xf32>, vector<32x16xf32>, vector<4x16xf32> -> vector<4x16xf32>
    %c1_62 = arith.constant 1 : index
    %c0_63 = arith.constant 0 : index
    %c0_64 = arith.constant 0 : index
    %107 = vector.load %arg4[%c1_62, %c0_63, %c0_64] : memref<5x8x4xf32, #tpu.memory_space<vmem>>, vector<1x8x4xf32>
    %108 = vector.shape_cast %107 : vector<1x8x4xf32> to vector<8x4xf32>
    %cst_65 = arith.constant dense<0.000000e+00> : vector<8x16xf32>
    %109 = tpu.matmul %108, %106, %cst_65 {dimension_numbers = #tpu.dot_dimension_numbers<[1], [0], [0], [1], [0, 0, 1, 1], [], []>, precision = #tpu.contract_precision<fp32>} : vector<8x4xf32>, vector<4x16xf32>, vector<8x16xf32> -> vector<8x16xf32>
    %110 = arith.addf %97, %109 : vector<8x16xf32>
    %c2_i32_66 = arith.constant 2 : i32
    %111 = vector.broadcast %c2_i32_66 : i32 to vector<32x16xi32>
    %112 = arith.muli %111, %83 : vector<32x16xi32>
    %c0_i32_67 = arith.constant 0 : i32
    %113 = vector.broadcast %c0_i32_67 : i32 to vector<32x16xi32>
    %114 = arith.addi %112, %113 : vector<32x16xi32>
    %115 = arith.cmpi eq, %82, %114 : vector<32x16xi32>
    %cst_68 = arith.constant 1.000000e+00 : f32
    %cst_69 = arith.constant 0.000000e+00 : f32
    %116 = vector.broadcast %cst_68 : f32 to vector<32x16xf32>
    %117 = vector.broadcast %cst_69 : f32 to vector<32x16xf32>
    %118 = arith.select %115, %116, %117 : vector<32x16xi1>, vector<32x16xf32>
    %cst_70 = arith.constant dense<0.000000e+00> : vector<4x16xf32>
    %119 = tpu.matmul %80, %118, %cst_70 {dimension_numbers = #tpu.dot_dimension_numbers<[1], [0], [0], [1], [0, 0, 1, 1], [], []>, precision = #tpu.contract_precision<fp32>} : vector<4x32xf32>, vector<32x16xf32>, vector<4x16xf32> -> vector<4x16xf32>
    %c2_71 = arith.constant 2 : index
    %c0_72 = arith.constant 0 : index
    %c0_73 = arith.constant 0 : index
    %120 = vector.load %arg4[%c2_71, %c0_72, %c0_73] : memref<5x8x4xf32, #tpu.memory_space<vmem>>, vector<1x8x4xf32>
    %121 = vector.shape_cast %120 : vector<1x8x4xf32> to vector<8x4xf32>
    %cst_74 = arith.constant dense<0.000000e+00> : vector<8x16xf32>
    %122 = tpu.matmul %121, %119, %cst_74 {dimension_numbers = #tpu.dot_dimension_numbers<[1], [0], [0], [1], [0, 0, 1, 1], [], []>, precision = #tpu.contract_precision<fp32>} : vector<8x4xf32>, vector<4x16xf32>, vector<8x16xf32> -> vector<8x16xf32>
    %123 = arith.addf %110, %122 : vector<8x16xf32>
    %c2_i32_75 = arith.constant 2 : i32
    %124 = vector.broadcast %c2_i32_75 : i32 to vector<32x16xi32>
    %125 = arith.muli %124, %83 : vector<32x16xi32>
    %c1_i32_76 = arith.constant 1 : i32
    %126 = vector.broadcast %c1_i32_76 : i32 to vector<32x16xi32>
    %127 = arith.addi %125, %126 : vector<32x16xi32>
    %128 = arith.cmpi eq, %82, %127 : vector<32x16xi32>
    %cst_77 = arith.constant 1.000000e+00 : f32
    %cst_78 = arith.constant 0.000000e+00 : f32
    %129 = vector.broadcast %cst_77 : f32 to vector<32x16xf32>
    %130 = vector.broadcast %cst_78 : f32 to vector<32x16xf32>
    %131 = arith.select %128, %129, %130 : vector<32x16xi1>, vector<32x16xf32>
    %cst_79 = arith.constant dense<0.000000e+00> : vector<4x16xf32>
    %132 = tpu.matmul %80, %131, %cst_79 {dimension_numbers = #tpu.dot_dimension_numbers<[1], [0], [0], [1], [0, 0, 1, 1], [], []>, precision = #tpu.contract_precision<fp32>} : vector<4x32xf32>, vector<32x16xf32>, vector<4x16xf32> -> vector<4x16xf32>
    %c3_80 = arith.constant 3 : index
    %c0_81 = arith.constant 0 : index
    %c0_82 = arith.constant 0 : index
    %133 = vector.load %arg4[%c3_80, %c0_81, %c0_82] : memref<5x8x4xf32, #tpu.memory_space<vmem>>, vector<1x8x4xf32>
    %134 = vector.shape_cast %133 : vector<1x8x4xf32> to vector<8x4xf32>
    %cst_83 = arith.constant dense<0.000000e+00> : vector<8x16xf32>
    %135 = tpu.matmul %134, %132, %cst_83 {dimension_numbers = #tpu.dot_dimension_numbers<[1], [0], [0], [1], [0, 0, 1, 1], [], []>, precision = #tpu.contract_precision<fp32>} : vector<8x4xf32>, vector<4x16xf32>, vector<8x16xf32> -> vector<8x16xf32>
    %136 = arith.addf %123, %135 : vector<8x16xf32>
    %c2_i32_84 = arith.constant 2 : i32
    %137 = vector.broadcast %c2_i32_84 : i32 to vector<32x16xi32>
    %138 = arith.muli %137, %83 : vector<32x16xi32>
    %c2_i32_85 = arith.constant 2 : i32
    %139 = vector.broadcast %c2_i32_85 : i32 to vector<32x16xi32>
    %140 = arith.addi %138, %139 : vector<32x16xi32>
    %141 = arith.cmpi eq, %82, %140 : vector<32x16xi32>
    %cst_86 = arith.constant 1.000000e+00 : f32
    %cst_87 = arith.constant 0.000000e+00 : f32
    %142 = vector.broadcast %cst_86 : f32 to vector<32x16xf32>
    %143 = vector.broadcast %cst_87 : f32 to vector<32x16xf32>
    %144 = arith.select %141, %142, %143 : vector<32x16xi1>, vector<32x16xf32>
    %cst_88 = arith.constant dense<0.000000e+00> : vector<4x16xf32>
    %145 = tpu.matmul %80, %144, %cst_88 {dimension_numbers = #tpu.dot_dimension_numbers<[1], [0], [0], [1], [0, 0, 1, 1], [], []>, precision = #tpu.contract_precision<fp32>} : vector<4x32xf32>, vector<32x16xf32>, vector<4x16xf32> -> vector<4x16xf32>
    %c4_89 = arith.constant 4 : index
    %c0_90 = arith.constant 0 : index
    %c0_91 = arith.constant 0 : index
    %146 = vector.load %arg4[%c4_89, %c0_90, %c0_91] : memref<5x8x4xf32, #tpu.memory_space<vmem>>, vector<1x8x4xf32>
    %147 = vector.shape_cast %146 : vector<1x8x4xf32> to vector<8x4xf32>
    %cst_92 = arith.constant dense<0.000000e+00> : vector<8x16xf32>
    %148 = tpu.matmul %147, %145, %cst_92 {dimension_numbers = #tpu.dot_dimension_numbers<[1], [0], [0], [1], [0, 0, 1, 1], [], []>, precision = #tpu.contract_precision<fp32>} : vector<8x4xf32>, vector<4x16xf32>, vector<8x16xf32> -> vector<8x16xf32>
    %149 = arith.addf %136, %148 : vector<8x16xf32>
    %150 = vector.broadcast %81 : vector<8x1xf32> to vector<8x16xf32>
    %151 = arith.addf %149, %150 : vector<8x16xf32>
    %c0_93 = arith.constant 0 : index
    %c0_94 = arith.constant 0 : index
    %c0_95 = arith.constant 0 : index
    %152 = vector.load %arg11[%c0_93, %c0_94, %c0_95] : memref<1x8x16xf32, #tpu.memory_space<vmem>>, vector<1x8x16xf32>
    %153 = vector.shape_cast %152 : vector<1x8x16xf32> to vector<8x16xf32>
    %154 = vector.shape_cast %151 : vector<8x16xf32> to vector<1x8x16xf32>
    tpu.vector_store %arg11[%c0_93, %c0_94, %c0_95], %154 {strides = array<i32>} : memref<1x8x16xf32, #tpu.memory_space<vmem>>, vector<1x8x16xf32>,
    %cst_96 = arith.constant 0.000000e+00 : f32
    %155 = vector.broadcast %cst_96 : f32 to vector<8x16xf32>
    %156 = arith.cmpf ogt, %151, %155 : vector<8x16xf32>
    %cst_97 = arith.constant 2.000000e-01 : f32
    %157 = vector.broadcast %cst_97 : f32 to vector<8x16xf32>
    %158 = arith.mulf %157, %151 : vector<8x16xf32>
    %159 = arith.select %156, %151, %158 : vector<8x16xi1>, vector<8x16xf32>
    %c0_98 = arith.constant 0 : index
    %c0_99 = arith.constant 0 : index
    %160 = vector.load %arg7[%c0_98, %c0_99] : memref<8x1xf32, #tpu.memory_space<vmem>>, vector<8x1xf32>
    %161 = tpu.iota {dimensions = array<i32: 0>} : vector<16x8xi32>
    %162 = tpu.iota {dimensions = array<i32: 1>} : vector<16x8xi32>
    %cst_100 = arith.constant 0.000000e+00 : f32
    %163 = vector.broadcast %cst_100 : f32 to vector<8x8xf32>
    %c2_i32_101 = arith.constant 2 : i32
    %164 = vector.broadcast %c2_i32_101 : i32 to vector<16x8xi32>
    %165 = arith.muli %164, %162 : vector<16x8xi32>
    %c-2_i32_102 = arith.constant -2 : i32
    %166 = vector.broadcast %c-2_i32_102 : i32 to vector<16x8xi32>
    %167 = arith.addi %165, %166 : vector<16x8xi32>
    %168 = arith.cmpi eq, %161, %167 : vector<16x8xi32>
    %cst_103 = arith.constant 1.000000e+00 : f32
    %cst_104 = arith.constant 0.000000e+00 : f32
    %169 = vector.broadcast %cst_103 : f32 to vector<16x8xf32>
    %170 = vector.broadcast %cst_104 : f32 to vector<16x8xf32>
    %171 = arith.select %168, %169, %170 : vector<16x8xi1>, vector<16x8xf32>
    %cst_105 = arith.constant dense<0.000000e+00> : vector<8x8xf32>
    %172 = tpu.matmul %159, %171, %cst_105 {dimension_numbers = #tpu.dot_dimension_numbers<[1], [0], [0], [1], [0, 0, 1, 1], [], []>, precision = #tpu.contract_precision<fp32>} : vector<8x16xf32>, vector<16x8xf32>, vector<8x8xf32> -> vector<8x8xf32>
    %c0_106 = arith.constant 0 : index
    %c0_107 = arith.constant 0 : index
    %c0_108 = arith.constant 0 : index
    %173 = vector.load %arg6[%c0_106, %c0_107, %c0_108] : memref<5x8x8xf32, #tpu.memory_space<vmem>>, vector<1x8x8xf32>
    %174 = vector.shape_cast %173 : vector<1x8x8xf32> to vector<8x8xf32>
    %cst_109 = arith.constant dense<0.000000e+00> : vector<8x8xf32>
    %175 = tpu.matmul %174, %172, %cst_109 {dimension_numbers = #tpu.dot_dimension_numbers<[1], [0], [0], [1], [0, 0, 1, 1], [], []>, precision = #tpu.contract_precision<fp32>} : vector<8x8xf32>, vector<8x8xf32>, vector<8x8xf32> -> vector<8x8xf32>
    %176 = arith.addf %163, %175 : vector<8x8xf32>
    %c2_i32_110 = arith.constant 2 : i32
    %177 = vector.broadcast %c2_i32_110 : i32 to vector<16x8xi32>
    %178 = arith.muli %177, %162 : vector<16x8xi32>
    %c-1_i32_111 = arith.constant -1 : i32
    %179 = vector.broadcast %c-1_i32_111 : i32 to vector<16x8xi32>
    %180 = arith.addi %178, %179 : vector<16x8xi32>
    %181 = arith.cmpi eq, %161, %180 : vector<16x8xi32>
    %cst_112 = arith.constant 1.000000e+00 : f32
    %cst_113 = arith.constant 0.000000e+00 : f32
    %182 = vector.broadcast %cst_112 : f32 to vector<16x8xf32>
    %183 = vector.broadcast %cst_113 : f32 to vector<16x8xf32>
    %184 = arith.select %181, %182, %183 : vector<16x8xi1>, vector<16x8xf32>
    %cst_114 = arith.constant dense<0.000000e+00> : vector<8x8xf32>
    %185 = tpu.matmul %159, %184, %cst_114 {dimension_numbers = #tpu.dot_dimension_numbers<[1], [0], [0], [1], [0, 0, 1, 1], [], []>, precision = #tpu.contract_precision<fp32>} : vector<8x16xf32>, vector<16x8xf32>, vector<8x8xf32> -> vector<8x8xf32>
    %c1_115 = arith.constant 1 : index
    %c0_116 = arith.constant 0 : index
    %c0_117 = arith.constant 0 : index
    %186 = vector.load %arg6[%c1_115, %c0_116, %c0_117] : memref<5x8x8xf32, #tpu.memory_space<vmem>>, vector<1x8x8xf32>
    %187 = vector.shape_cast %186 : vector<1x8x8xf32> to vector<8x8xf32>
    %cst_118 = arith.constant dense<0.000000e+00> : vector<8x8xf32>
    %188 = tpu.matmul %187, %185, %cst_118 {dimension_numbers = #tpu.dot_dimension_numbers<[1], [0], [0], [1], [0, 0, 1, 1], [], []>, precision = #tpu.contract_precision<fp32>} : vector<8x8xf32>, vector<8x8xf32>, vector<8x8xf32> -> vector<8x8xf32>
    %189 = arith.addf %176, %188 : vector<8x8xf32>
    %c2_i32_119 = arith.constant 2 : i32
    %190 = vector.broadcast %c2_i32_119 : i32 to vector<16x8xi32>
    %191 = arith.muli %190, %162 : vector<16x8xi32>
    %c0_i32_120 = arith.constant 0 : i32
    %192 = vector.broadcast %c0_i32_120 : i32 to vector<16x8xi32>
    %193 = arith.addi %191, %192 : vector<16x8xi32>
    %194 = arith.cmpi eq, %161, %193 : vector<16x8xi32>
    %cst_121 = arith.constant 1.000000e+00 : f32
    %cst_122 = arith.constant 0.000000e+00 : f32
    %195 = vector.broadcast %cst_121 : f32 to vector<16x8xf32>
    %196 = vector.broadcast %cst_122 : f32 to vector<16x8xf32>
    %197 = arith.select %194, %195, %196 : vector<16x8xi1>, vector<16x8xf32>
    %cst_123 = arith.constant dense<0.000000e+00> : vector<8x8xf32>
    %198 = tpu.matmul %159, %197, %cst_123 {dimension_numbers = #tpu.dot_dimension_numbers<[1], [0], [0], [1], [0, 0, 1, 1], [], []>, precision = #tpu.contract_precision<fp32>} : vector<8x16xf32>, vector<16x8xf32>, vector<8x8xf32> -> vector<8x8xf32>
    %c2_124 = arith.constant 2 : index
    %c0_125 = arith.constant 0 : index
    %c0_126 = arith.constant 0 : index
    %199 = vector.load %arg6[%c2_124, %c0_125, %c0_126] : memref<5x8x8xf32, #tpu.memory_space<vmem>>, vector<1x8x8xf32>
    %200 = vector.shape_cast %199 : vector<1x8x8xf32> to vector<8x8xf32>
    %cst_127 = arith.constant dense<0.000000e+00> : vector<8x8xf32>
    %201 = tpu.matmul %200, %198, %cst_127 {dimension_numbers = #tpu.dot_dimension_numbers<[1], [0], [0], [1], [0, 0, 1, 1], [], []>, precision = #tpu.contract_precision<fp32>} : vector<8x8xf32>, vector<8x8xf32>, vector<8x8xf32> -> vector<8x8xf32>
    %202 = arith.addf %189, %201 : vector<8x8xf32>
    %c2_i32_128 = arith.constant 2 : i32
    %203 = vector.broadcast %c2_i32_128 : i32 to vector<16x8xi32>
    %204 = arith.muli %203, %162 : vector<16x8xi32>
    %c1_i32_129 = arith.constant 1 : i32
    %205 = vector.broadcast %c1_i32_129 : i32 to vector<16x8xi32>
    %206 = arith.addi %204, %205 : vector<16x8xi32>
    %207 = arith.cmpi eq, %161, %206 : vector<16x8xi32>
    %cst_130 = arith.constant 1.000000e+00 : f32
    %cst_131 = arith.constant 0.000000e+00 : f32
    %208 = vector.broadcast %cst_130 : f32 to vector<16x8xf32>
    %209 = vector.broadcast %cst_131 : f32 to vector<16x8xf32>
    %210 = arith.select %207, %208, %209 : vector<16x8xi1>, vector<16x8xf32>
    %cst_132 = arith.constant dense<0.000000e+00> : vector<8x8xf32>
    %211 = tpu.matmul %159, %210, %cst_132 {dimension_numbers = #tpu.dot_dimension_numbers<[1], [0], [0], [1], [0, 0, 1, 1], [], []>, precision = #tpu.contract_precision<fp32>} : vector<8x16xf32>, vector<16x8xf32>, vector<8x8xf32> -> vector<8x8xf32>
    %c3_133 = arith.constant 3 : index
    %c0_134 = arith.constant 0 : index
    %c0_135 = arith.constant 0 : index
    %212 = vector.load %arg6[%c3_133, %c0_134, %c0_135] : memref<5x8x8xf32, #tpu.memory_space<vmem>>, vector<1x8x8xf32>
    %213 = vector.shape_cast %212 : vector<1x8x8xf32> to vector<8x8xf32>
    %cst_136 = arith.constant dense<0.000000e+00> : vector<8x8xf32>
    %214 = tpu.matmul %213, %211, %cst_136 {dimension_numbers = #tpu.dot_dimension_numbers<[1], [0], [0], [1], [0, 0, 1, 1], [], []>, precision = #tpu.contract_precision<fp32>} : vector<8x8xf32>, vector<8x8xf32>, vector<8x8xf32> -> vector<8x8xf32>
    %215 = arith.addf %202, %214 : vector<8x8xf32>
    %c2_i32_137 = arith.constant 2 : i32
    %216 = vector.broadcast %c2_i32_137 : i32 to vector<16x8xi32>
    %217 = arith.muli %216, %162 : vector<16x8xi32>
    %c2_i32_138 = arith.constant 2 : i32
    %218 = vector.broadcast %c2_i32_138 : i32 to vector<16x8xi32>
    %219 = arith.addi %217, %218 : vector<16x8xi32>
    %220 = arith.cmpi eq, %161, %219 : vector<16x8xi32>
    %cst_139 = arith.constant 1.000000e+00 : f32
    %cst_140 = arith.constant 0.000000e+00 : f32
    %221 = vector.broadcast %cst_139 : f32 to vector<16x8xf32>
    %222 = vector.broadcast %cst_140 : f32 to vector<16x8xf32>
    %223 = arith.select %220, %221, %222 : vector<16x8xi1>, vector<16x8xf32>
    %cst_141 = arith.constant dense<0.000000e+00> : vector<8x8xf32>
    %224 = tpu.matmul %159, %223, %cst_141 {dimension_numbers = #tpu.dot_dimension_numbers<[1], [0], [0], [1], [0, 0, 1, 1], [], []>, precision = #tpu.contract_precision<fp32>} : vector<8x16xf32>, vector<16x8xf32>, vector<8x8xf32> -> vector<8x8xf32>
    %c4_142 = arith.constant 4 : index
    %c0_143 = arith.constant 0 : index
    %c0_144 = arith.constant 0 : index
    %225 = vector.load %arg6[%c4_142, %c0_143, %c0_144] : memref<5x8x8xf32, #tpu.memory_space<vmem>>, vector<1x8x8xf32>
    %226 = vector.shape_cast %225 : vector<1x8x8xf32> to vector<8x8xf32>
    %cst_145 = arith.constant dense<0.000000e+00> : vector<8x8xf32>
    %227 = tpu.matmul %226, %224, %cst_145 {dimension_numbers = #tpu.dot_dimension_numbers<[1], [0], [0], [1], [0, 0, 1, 1], [], []>, precision = #tpu.contract_precision<fp32>} : vector<8x8xf32>, vector<8x8xf32>, vector<8x8xf32> -> vector<8x8xf32>
    %228 = arith.addf %215, %227 : vector<8x8xf32>
    %229 = vector.broadcast %160 : vector<8x1xf32> to vector<8x8xf32>
    %230 = arith.addf %228, %229 : vector<8x8xf32>
    %c0_146 = arith.constant 0 : index
    %c0_147 = arith.constant 0 : index
    %c0_148 = arith.constant 0 : index
    %231 = vector.load %arg12[%c0_146, %c0_147, %c0_148] : memref<1x8x8xf32, #tpu.memory_space<vmem>>, vector<1x8x8xf32>
    %232 = vector.shape_cast %231 : vector<1x8x8xf32> to vector<8x8xf32>
    %233 = vector.shape_cast %230 : vector<8x8xf32> to vector<1x8x8xf32>
    tpu.vector_store %arg12[%c0_146, %c0_147, %c0_148], %233 {strides = array<i32>} : memref<1x8x8xf32, #tpu.memory_space<vmem>>, vector<1x8x8xf32>,
    %cst_149 = arith.constant 0.000000e+00 : f32
    %234 = vector.broadcast %cst_149 : f32 to vector<8x8xf32>
    %235 = arith.cmpf ogt, %230, %234 : vector<8x8xf32>
    %cst_150 = arith.constant 2.000000e-01 : f32
    %236 = vector.broadcast %cst_150 : f32 to vector<8x8xf32>
    %237 = arith.mulf %236, %230 : vector<8x8xf32>
    %238 = arith.select %235, %230, %237 : vector<8x8xi1>, vector<8x8xf32>
    %c0_151 = arith.constant 0 : index
    %c0_152 = arith.constant 0 : index
    %239 = vector.load %arg9[%c0_151, %c0_152] : memref<1x1xf32, #tpu.memory_space<vmem>>, vector<1x1xf32>
    %c0_153 = arith.constant 0 : index
    %c0_154 = arith.constant 0 : index
    %c0_155 = arith.constant 0 : index
    %240 = vector.load %arg8[%c0_153, %c0_154, %c0_155] : memref<1x1x8xf32, #tpu.memory_space<vmem>>, vector<1x1x8xf32>
    %241 = vector.shape_cast %240 : vector<1x1x8xf32> to vector<1x8xf32>
    %cst_156 = arith.constant dense<0.000000e+00> : vector<1x8xf32>
    %242 = tpu.matmul %241, %238, %cst_156 {dimension_numbers = #tpu.dot_dimension_numbers<[1], [0], [0], [1], [0, 0, 1, 1], [], []>, precision = #tpu.contract_precision<fp32>} : vector<1x8xf32>, vector<8x8xf32>, vector<1x8xf32> -> vector<1x8xf32>
    %243 = vector.broadcast %239 : vector<1x1xf32> to vector<1x8xf32>
    %244 = arith.addf %242, %243 : vector<1x8xf32>
    %c0_157 = arith.constant 0 : index
    %c0_158 = arith.constant 0 : index
    %c0_159 = arith.constant 0 : index
    %245 = vector.load %arg13[%c0_157, %c0_158, %c0_159] : memref<1x1x8xf32, #tpu.memory_space<vmem>>, vector<1x1x8xf32>
    %246 = vector.shape_cast %245 : vector<1x1x8xf32> to vector<1x8xf32>
    %247 = vector.shape_cast %244 : vector<1x8xf32> to vector<1x1x8xf32>
    tpu.vector_store %arg13[%c0_157, %c0_158, %c0_159], %247 {strides = array<i32>} : memref<1x1x8xf32, #tpu.memory_space<vmem>>, vector<1x1x8xf32>,
    %248 = tpu.iota {dimensions = array<i32: 0>} : vector<64x32xi32>
    %249 = tpu.iota {dimensions = array<i32: 1>} : vector<64x32xi32>
    %c2_i32_160 = arith.constant 2 : i32
    %250 = vector.broadcast %c2_i32_160 : i32 to vector<64x32xi32>
    %251 = arith.muli %250, %249 : vector<64x32xi32>
    %252 = arith.cmpi eq, %248, %251 : vector<64x32xi32>
    %c2_i32_161 = arith.constant 2 : i32
    %253 = vector.broadcast %c2_i32_161 : i32 to vector<64x32xi32>
    %254 = arith.muli %253, %249 : vector<64x32xi32>
    %c1_i32_162 = arith.constant 1 : i32
    %255 = vector.broadcast %c1_i32_162 : i32 to vector<64x32xi32>
    %256 = arith.addi %254, %255 : vector<64x32xi32>
    %257 = arith.cmpi eq, %248, %256 : vector<64x32xi32>
    %258 = arith.ori %252, %257 : vector<64x32xi1>
    %cst_163 = arith.constant 5.000000e-01 : f32
    %cst_164 = arith.constant 0.000000e+00 : f32
    %259 = vector.broadcast %cst_163 : f32 to vector<64x32xf32>
    %260 = vector.broadcast %cst_164 : f32 to vector<64x32xf32>
    %261 = arith.select %258, %259, %260 : vector<64x32xi1>, vector<64x32xf32>
    %cst_165 = arith.constant dense<0.000000e+00> : vector<1x32xf32>
    %262 = tpu.matmul %1, %261, %cst_165 {dimension_numbers = #tpu.dot_dimension_numbers<[1], [0], [0], [1], [0, 0, 1, 1], [], []>, precision = #tpu.contract_precision<fp32>} : vector<1x64xf32>, vector<64x32xf32>, vector<1x32xf32> -> vector<1x32xf32>
    %c0_166 = arith.constant 0 : index
    %c0_167 = arith.constant 0 : index
    %c0_168 = arith.constant 0 : index
    %263 = vector.load %arg14[%c0_166, %c0_167, %c0_168] : memref<1x1x32xf32, #tpu.memory_space<vmem>>, vector<1x1x32xf32>
    %264 = vector.shape_cast %263 : vector<1x1x32xf32> to vector<1x32xf32>
    %265 = vector.shape_cast %262 : vector<1x32xf32> to vector<1x1x32xf32>
    tpu.vector_store %arg14[%c0_166, %c0_167, %c0_168], %265 {strides = array<i32>} : memref<1x1x32xf32, #tpu.memory_space<vmem>>, vector<1x1x32xf32>,
    return
  }
  func.func @transform_0(%arg0: i32) -> (i32, i32, i32) {
    %c0_i32 = arith.constant 0 : i32
    %c0_i32_0 = arith.constant 0 : i32
    %c0_i32_1 = arith.constant 0 : i32
    return %arg0, %c0_i32, %c0_i32_0 : i32, i32, i32
  }
  func.func @transform_1(%arg0: i32) -> (i32, i32, i32) {
    %c0_i32 = arith.constant 0 : i32
    %c0_i32_0 = arith.constant 0 : i32
    %c0_i32_1 = arith.constant 0 : i32
    %c0_i32_2 = arith.constant 0 : i32
    return %c0_i32, %c0_i32_0, %c0_i32_1 : i32, i32, i32
  }
  func.func @transform_2(%arg0: i32) -> (i32, i32) {
    %c0_i32 = arith.constant 0 : i32
    %c0_i32_0 = arith.constant 0 : i32
    %c0_i32_1 = arith.constant 0 : i32
    return %c0_i32, %c0_i32_0 : i32, i32
  }
  func.func @transform_3(%arg0: i32) -> (i32, i32, i32) {
    %c0_i32 = arith.constant 0 : i32
    %c0_i32_0 = arith.constant 0 : i32
    %c0_i32_1 = arith.constant 0 : i32
    %c0_i32_2 = arith.constant 0 : i32
    return %c0_i32, %c0_i32_0, %c0_i32_1 : i32, i32, i32
  }
  func.func @transform_4(%arg0: i32) -> (i32, i32) {
    %c0_i32 = arith.constant 0 : i32
    %c0_i32_0 = arith.constant 0 : i32
    %c0_i32_1 = arith.constant 0 : i32
    return %c0_i32, %c0_i32_0 : i32, i32
  }
  func.func @transform_5(%arg0: i32) -> (i32, i32, i32) {
    %c0_i32 = arith.constant 0 : i32
    %c0_i32_0 = arith.constant 0 : i32
    %c0_i32_1 = arith.constant 0 : i32
    %c0_i32_2 = arith.constant 0 : i32
    return %c0_i32, %c0_i32_0, %c0_i32_1 : i32, i32, i32
  }
  func.func @transform_6(%arg0: i32) -> (i32, i32) {
    %c0_i32 = arith.constant 0 : i32
    %c0_i32_0 = arith.constant 0 : i32
    %c0_i32_1 = arith.constant 0 : i32
    return %c0_i32, %c0_i32_0 : i32, i32
  }
  func.func @transform_7(%arg0: i32) -> (i32, i32, i32) {
    %c0_i32 = arith.constant 0 : i32
    %c0_i32_0 = arith.constant 0 : i32
    %c0_i32_1 = arith.constant 0 : i32
    %c0_i32_2 = arith.constant 0 : i32
    return %c0_i32, %c0_i32_0, %c0_i32_1 : i32, i32, i32
  }
  func.func @transform_8(%arg0: i32) -> (i32, i32) {
    %c0_i32 = arith.constant 0 : i32
    %c0_i32_0 = arith.constant 0 : i32
    %c0_i32_1 = arith.constant 0 : i32
    return %c0_i32, %c0_i32_0 : i32, i32
  }
  func.func @transform_9(%arg0: i32) -> (i32, i32, i32) {
    %c0_i32 = arith.constant 0 : i32
    %c0_i32_0 = arith.constant 0 : i32
    %c0_i32_1 = arith.constant 0 : i32
    return %arg0, %c0_i32, %c0_i32_0 : i32, i32, i32
  }
  func.func @transform_10(%arg0: i32) -> (i32, i32, i32) {
    %c0_i32 = arith.constant 0 : i32
    %c0_i32_0 = arith.constant 0 : i32
    %c0_i32_1 = arith.constant 0 : i32
    return %arg0, %c0_i32, %c0_i32_0 : i32, i32, i32
  }
  func.func @transform_11(%arg0: i32) -> (i32, i32, i32) {
    %c0_i32 = arith.constant 0 : i32
    %c0_i32_0 = arith.constant 0 : i32
    %c0_i32_1 = arith.constant 0 : i32
    return %arg0, %c0_i32, %c0_i32_0 : i32, i32, i32
  }
  func.func @transform_12(%arg0: i32) -> (i32, i32, i32) {
    %c0_i32 = arith.constant 0 : i32
    %c0_i32_0 = arith.constant 0 : i32
    %c0_i32_1 = arith.constant 0 : i32
    return %arg0, %c0_i32, %c0_i32_0 : i32, i32, i32
  }
  func.func @transform_13(%arg0: i32) -> (i32, i32, i32) {
    %c0_i32 = arith.constant 0 : i32
    %c0_i32_0 = arith.constant 0 : i32
    %c0_i32_1 = arith.constant 0 : i32
    return %arg0, %c0_i32, %c0_i32_0 : i32, i32, i32
  }
}

</mosaic_0001>

<bundles_post_ra>
// kernel: tpu_custom_call.1
= control target key start
LH: loop header
LB: loop body
LE: loop exit
PB: predicated region body
PF: predicated region fallthrough
CT: control target
= control target key end

     0   :  { %s21919_s0 = inlined_call_operand.vmem [shape: f32[2,1,64], index: 0, kind: input, shape index: {}]   ;;  %s21920_s1 = inlined_call_operand.vmem [shape: f32[5,4,1], index: 1, kind: input, shape index: {}]   ;;  %s21921_s2 = inlined_call_operand.vmem [shape: f32[4,1], index: 2, kind: input, shape index: {}]   ;;  %s21922_s3 = inlined_call_operand.vmem [shape: f32[5,8,4], index: 3, kind: input, shape index: {}]   ;;  %s21923_s4 = inlined_call_operand.vmem [shape: f32[8,1], index: 4, kind: input, shape index: {}]   ;;  %s21924_s5 = inlined_call_operand.vmem [shape: f32[5,8,8], index: 5, kind: input, shape index: {}]   ;;  %s21925_s6 = inlined_call_operand.vmem [shape: f32[8,1], index: 6, kind: input, shape index: {}]   ;;  %s21926_s7 = inlined_call_operand.vmem [shape: f32[1,1,8], index: 7, kind: input, shape index: {}]   ;;  %s21927_s8 = inlined_call_operand.<no memory space> [shape: f32[1,1], index: 8, kind: input, shape index: {}]   ;;  %s21928_s9 = inlined_call_operand.hbm [shape: f32[2,4,32], index: 9, kind: output, shape index: {0}]   ;;  %s21929_s10 = inlined_call_operand.hbm [shape: f32[2,8,16], index: 10, kind: output, shape index: {1}]   ;;  %s21930_s11 = inlined_call_operand.hbm [shape: f32[2,8,8], index: 11, kind: output, shape index: {2}]   ;;  %s21931_s12 = inlined_call_operand.hbm [shape: f32[2,1,8], index: 12, kind: output, shape index: {3}]   ;;  %s21932_s13 = inlined_call_operand.hbm [shape: f32[2,1,32], index: 13, kind: output, shape index: {4}]  }
   0x1   :  { %22071 = sst [smem:[#allocation72_spill]] %s21919_s0  ;;  %v19_v0 = vstv %s21927_s8 }
   0x2   :  { %22072 = sst [smem:[#allocation73_spill]] %s21920_s1  ;;  %20 = vst [vmem:[#allocation2] sm:$0x1] %v19_v0 }
   0x3   :  { %22073 = sst [smem:[#allocation74_spill]] %s21921_s2 }
   0x4   :  { %22074 = sst [smem:[#allocation75_spill]] %s21922_s3 }
   0x5   :  { %22075 = sst [smem:[#allocation76_spill]] %s21923_s4 }
   0x6   :  { %22076 = sst [smem:[#allocation77_spill]] %s21924_s5 }
   0x7   :  { %22077 = sst [smem:[#allocation78_spill]] %s21925_s6 }
   0x8   :  { %22078 = sst [smem:[#allocation79_spill]] %s21926_s7 }
   0x9   :  { %22079 = sst [smem:[#allocation80_spill]] %s21929_s10 }
   0xa   :  { %21 = vsyncpa [#allocation4], 0 }
   0xb   :  { %23 = vsyncpa [#allocation4 + $0x1], 0 }
   0xc   :  { %24 = vsyncpa [#allocation6], 0 }
   0xd   :  { %26 = vsyncpa [#allocation6 + $0x1], 0 }
   0xe   :  { %27 = vsyncpa [#allocation9], 0 }
   0xf   :  { %29 = vsyncpa [#allocation9 + $0x1], 0  ;;  %s18671_s27 = smov 0   ;;  %s18673_s28 = smov 0  }
  0x10   :  { %s18675_s29 = smov 0   ;;  %s18677_s30 = smov 0  }
  0x11 LB: > { %s18692_s8 = sadd.s32 4294967295, %s18586_s30   ;;  %s22068_s14 = sadd.s32 4294967294, %s18586_s30   ;;  %s18586_s30 = sphi %s18677_s30, %s22354_s30   ;;  %s18582_s29 = sphi %s18675_s29, %s22353_s29   ;;  %s18578_s28 = sphi %s18673_s28, %s22352_s28   ;;  %s18574_s27 = sphi %s18671_s27, %s22351_s27  }
  0x12   : > { %s18696_s15 = sadd.s32 1, %s18586_s30   ;;  %s236_s16 = sadd.s32 1, %s18582_s29 }
  0x13   : > { %s233_s17 = ssub.s32 %s18586_s30, %s18696_s15  ;;  %p246_p0 = scmp.ne.s32.totalorder %s18582_s29, %s18578_s28 }
  0x14   : > { %p234_p1 = scmp.eq.s32.totalorder %s233_s17, 0  ;;  %p247_p2 = scmp.eq.s32.totalorder %s18692_s8, 1 }
  0x15   : > { %p252_p3 = scmp.ne.s32.totalorder %s18578_s28, %s18574_s27  ;;  %p253_p4 = scmp.eq.s32.totalorder %s22068_s14, 1 }
  0x16   : > { %s18709_s18 = scalar_select %p234_p1, %s18582_s29, %s236_s16  }
  0x17   : > { %p18711_p5 = por %p247_p2, %p246_p0  ;;  %p18715_p6 = por %p253_p4, %p252_p3 }
  0x18   : > { %p15628_p7 = scmp.ge.s32.totalorder %s18586_s30, 1  ;;  %p405_p8 = scmp.lt.s32.totalorder %s18586_s30, 3 }
  0x1a   : > { %p406_p9 = pnand %p15628_p7, %p405_p8 }
  0x1c   : > { %409 = sbr.rel (%p406_p9) target bundleno = 4049 (0xfd1), region = 56 }
  0x21   : > { %v470_v1 = vlaneseq  ;;  %p465_p10 = scmp.lt.s32.totalorder %s18692_s8, 1  ;;  %v21937_v2 = vmov 0.0   ;;  %vm21982_vm0 = vmmov 0   ;;  %vm499_vm1 = vcmask 523264   ;;  %s22083_s0 = sld [smem:[#allocation72_spill]] }
  0x22   : > { %16644 = vmatprep.subr.mxu0 %v21937_v2  ;;  %16663 = vmatprep.subr.mxu1 %v21937_v2  ;;  %v21933_v17 = vmov 1.0   ;;  %s22115_s1 = sld [smem:[#allocation73_spill]]  ;;  %s20444_s23 = sand.u32 1, %s18578_s28  }
  0x23   : > { %v18724_v3 = vshrl.u32 %v470_v1, 7  ;;  %v480_v4 = vand.u32 127, %v470_v1  ;;  %16660 = vmatprep.mubr.msk.f32.mxu0 %vm21982_vm0, %v21937_v2  ;;  %s466_s21 = scalar_select %p465_p10, %s18692_s8, 1  ;;  %16679 = vmatprep.mubr.msk.f32.mxu1 %vm21982_vm0, %v21937_v2 }
  0x24   : > { %s22233_s2 = sld [smem:[#allocation74_spill]]  ;;  %s15630_s22 = sshll.u32 %s20444_s23, 3 }
  0x25   : > { %22082 = vst [vmem:[#allocation14_spill] sm:$0xff] %v18724_v3  ;;  %v18732_v5 = vadd.s32 56, %v18724_v3  ;;  %v18734_v6 = vmul.u32 2, %v480_v4  ;;  %v18737_v7 = vadd.s32 48, %v18724_v3  ;;  %v18740_v8 = vadd.s32 40, %v18724_v3  ;;  %s22234_s4 = sld [smem:[#allocation76_spill]] }
  0x26   : > { %v18746_v9 = vadd.s32 32, %v18724_v3  ;;  %v18749_v10 = vadd.s32 24, %v18724_v3  ;;  %v18755_v14 = vadd.s32 16, %v18724_v3  ;;  %v18758_v15 = vadd.s32 8, %v18724_v3  ;;  %s22249_s3 = sld [smem:[#allocation75_spill]]  ;;  %s21462_s17 = scalar_lea.vmem [#allocation7], %s15630_s22 }
  0x27   : > { %s467_s24 = scalar_lea.vmem %s22083_s0, %s466_s21  ;;  %v18752_v12 = vadd.s32 4294967294, %v18734_v6  ;;  %v18994_v4 = vadd.s32 4294967295, %v18734_v6  ;;  %s22293_s5 = sld [smem:[#allocation77_spill]] }
  0x28   : > { %v468_v11 = vld [vmem:[%s467_s24] sm:$0x1]  ;;  %s15629_s24 = sshll.u32 %s20444_s23, 2  ;;  %s22302_s6 = sld [smem:[#allocation78_spill]] }
  0x29   : > { %v501_v13 = vsel %vm499_vm1, %v468_v11, 0  ;;  %vm490_vm2 = vcmp.eq.s32.totalorder %v18732_v5, %v18752_v12  ;;  %vm489_vm3 = vcmp.eq.s32.totalorder %v18737_v7, %v18752_v12  ;;  %vm488_vm4 = vcmp.eq.s32.totalorder %v18740_v8, %v18752_v12  ;;  %s20448_s25 = scalar_lea.vmem [#allocation3], %s15629_s24  ;;  %s21040_s24 = scalar_lea.vmem [#allocation5], %s15630_s22 }
  0x2a   : > { %v18760_v16 = vand.u32 4294901760, %v501_v13  ;;  %vm487_vm5 = vcmp.eq.s32.totalorder %v18746_v9, %v18752_v12  ;;  %16645 = vmatpush3.msk.msra.mxu0 %vm490_vm2, %v21933_v17  ;;  %v497_v18 = vsel %vm489_vm3, 1.0, %v21937_v2  ;;  %v496_v19 = vsel %vm488_vm4, 1.0, %v21937_v2  ;;  %s22303_s7 = sld [smem:[#allocation79_spill]]  ;;  %s22069_s22 = sand.u32 1, %s18692_s8  }
  0x2b   : > { %v495_v20 = vsel %vm487_vm5, 1.0, %v21937_v2  ;;  %vm18788_vm6 = vcmp.eq.s32.totalorder %v18749_v10, %v18752_v12  ;;  %16646 = vmatprep.subr.mxu0 %v21937_v2  ;;  %v18793_v22 = vsub.f32 %v497_v18, %v497_v18  ;;  %v18795_v23 = vsub.f32 %v496_v19, %v496_v19  ;;  %s22070_s21 = sshll.u32 %s18692_s8, 7  ;;  %s22346_s10 = sld [smem:[#allocation80_spill]] }
  0x2c   : > { %22084 = vst [vmem:[#allocation15_spill] sm:$0xff] %v18760_v16  ;;  %v18797_v24 = vsub.f32 %v495_v20, %v495_v20  ;;  %v498_v25 = vsel %vm490_vm2, 1.0, %v21937_v2  ;;  %16647 = vmatpush3.msk.msra.mxu0 %vm489_vm3, %v21933_v17  ;;  %vm18811_vm7 = vcmp.eq.s32.totalorder %v18755_v14, %v18752_v12  ;;  %vm18817_vm8 = vcmp.eq.s32.totalorder %v18758_v15, %v18752_v12  ;;  %s15416_s0 = sshll.u32 %s21040_s24, 4  ;;  %s15417_s0 = int_to_ptr.vmem [resolvable:$true] %s15416_s0 }
  0x2d   : > { %v18807_v26 = vsub.f32 %v498_v25, %v498_v25  ;;  %16648 = vmatprep.subr.mxu0 %v21937_v2  ;;  %v602_v29 = vand.u32 4294901760, %v18793_v22  ;;  %v608_v30 = vand.u32 4294901760, %v18795_v23  ;;  %v18826_v32 = vsub.f32 %v501_v13, %v18760_v16 }
  0x2e   : > { %v614_v31 = vand.u32 4294901760, %v18797_v24  ;;  %16649 = vmatpush3.msk.msra.mxu0 %vm488_vm4, %v21933_v17  ;;  %v494_v34 = vsel %vm18788_vm6, 1.0, %v21937_v2  ;;  %v493_v35 = vsel %vm18811_vm7, 1.0, %v21937_v2  ;;  %v492_v36 = vsel %vm18817_vm8, 1.0, %v21937_v2 }
  0x2f   : > { %22091 = vst [vmem:[#allocation16_spill] sm:$0xff] %v18826_v32  ;;  %v596_v33 = vand.u32 4294901760, %v18807_v26  ;;  %16650 = vmatprep.subr.mxu0 %v21937_v2  ;;  %v603_v37 = vsub.f32 %v18793_v22, %v602_v29  ;;  %v609_v38 = vsub.f32 %v18795_v23, %v608_v30  ;;  %vm18851_vm9 = vcmp.eq.s32.totalorder %v18724_v3, %v18752_v12 }
  0x30   : > { %v18856_v40 = vand.u32 4294901760, %v18826_v32  ;;  %16651 = vmatpush3.msk.msra.mxu0 %vm487_vm5, %v21933_v17  ;;  %v18865_v42 = vsub.f32 %v494_v34, %v494_v34  ;;  %v18867_v43 = vsub.f32 %v493_v35, %v493_v35  ;;  %v18869_v44 = vsub.f32 %v492_v36, %v492_v36 }
  0x31   : > { %v597_v41 = vsub.f32 %v18807_v26, %v596_v33  ;;  %16652 = vmatprep.subr.mxu0 %v21937_v2  ;;  %v604_v45 = vand.u32 4294901760, %v603_v37  ;;  %v615_v46 = vsub.f32 %v18797_v24, %v614_v31  ;;  %v491_v51 = vsel %vm18851_vm9, 1.0, %v21937_v2  ;;  %s15414_s14 = scalar_lea.hbm %s22346_s10, %s22070_s21 }
  0x32   : > { %22094 = vst [vmem:[#allocation17_spill] sm:$0xff] %v18856_v40  ;;  %16653 = vmatpush3.msk.msra.mxu0 %vm18788_vm6, %v21933_v17  ;;  %v571_v48 = vsub.f32 %v18826_v32, %v18856_v40  ;;  %v18881_v49 = vand.u32 4294901760, %v18865_v42  ;;  %v18884_v50 = vand.u32 4294901760, %v18867_v43  ;;  %v610_v52 = vand.u32 4294901760, %v609_v38 }
  0x33   : > { %v598_v47 = vand.u32 4294901760, %v597_v41  ;;  %16654 = vmatprep.subr.mxu0 %v21937_v2  ;;  %v18896_v54 = vand.u32 4294901760, %v18869_v44  ;;  %v18900_v55 = vsub.f32 %v491_v51, %v491_v51  ;;  %v616_v56 = vand.u32 4294901760, %v615_v46 }
  0x34   : > { %16655 = vmatpush3.msk.msra.mxu0 %vm18811_vm7, %v21933_v17  ;;  %v621_v53 = vsub.f32 %v18865_v42, %v18881_v49  ;;  %v18905_v57 = vand.u32 4294901760, %v571_v48  ;;  %v627_v58 = vsub.f32 %v18867_v43, %v18884_v50  ;;  %vm1001_vm10 = vcmp.eq.s32.totalorder %v18732_v5, %v18994_v4 }
  0x35   : > { %16664 = vmatpush3.msra.mxu1 %v598_v47  ;;  %16656 = vmatprep.subr.mxu0 %v21937_v2  ;;  %v18912_v59 = vand.u32 4294901760, %v18900_v55  ;;  %v633_v61 = vsub.f32 %v18869_v44, %v18896_v54  ;;  %vm1000_vm11 = vcmp.eq.s32.totalorder %v18737_v7, %v18994_v4  ;;  %v1009_v11 = vsel %vm1001_vm10, 1.0, %v21937_v2 }
  0x36   : > { %16665 = vmatprep.subr.mxu1 %v21937_v2  ;;  %16657 = vmatpush3.msk.msra.mxu0 %vm18817_vm8, %v21933_v17  ;;  %22095 = vst [vmem:[#allocation18_spill] sm:$0xff] %v18905_v57  ;;  %v18917_v60 = vand.u32 4294901760, %v621_v53  ;;  %v18924_v62 = vand.u32 4294901760, %v627_v58  ;;  %vm999_vm12 = vcmp.eq.s32.totalorder %v18740_v8, %v18994_v4  ;;  %v1008_v13 = vsel %vm1000_vm11, 1.0, %v21937_v2 }
  0x37   : > { %16666 = vmatpush3.msra.mxu1 %v604_v45  ;;  %16658 = vmatprep.subr.mxu0 %v21937_v2  ;;  %v639_v63 = vsub.f32 %v18900_v55, %v18912_v59  ;;  %v18932_v0 = vand.u32 4294901760, %v633_v61  ;;  %v19043_v18 = vsub.f32 %v1009_v11, %v1009_v11  ;;  %vm998_vm13 = vcmp.eq.s32.totalorder %v18746_v9, %v18994_v4 }
  0x38   : > { %16667 = vmatprep.subr.mxu1 %v21937_v2  ;;  %16659 = vmatpush3.msk.msra.mxu0 %vm18851_vm9, %v21933_v17  ;;  %v1007_v19 = vsel %vm999_vm12, 1.0, %v21937_v2  ;;  %v19058_v20 = vsub.f32 %v1008_v13, %v1008_v13  ;;  %vm19062_vm14 = vcmp.eq.s32.totalorder %v18749_v10, %v18994_v4  ;;  %vm19083_vm15 = vcmp.eq.s32.totalorder %v18755_v14, %v18994_v4 }
  0x39   : > { %16668 = vmatpush3.msra.mxu1 %v610_v52  ;;  %16682 = vmatprep.subr.mxu0 %v21937_v2  ;;  %v18938_v1 = vand.u32 4294901760, %v639_v63  ;;  %v1103_v25 = vand.u32 4294901760, %v19043_v18  ;;  %vm19104_vm1 = vcmp.eq.s32.totalorder %v18758_v15, %v18994_v4  ;;  %v22104_v36 = vmov 0 }
  0x3a   : > { %16669 = vmatprep.subr.mxu1 %v21937_v2  ;;  %16661 = vmatmul.mubr.f32.vlgmr.msra.gmra.mxu0 %v18905_v57  ;;  %v1003_v38 = vsel %vm19104_vm1, 1.0, %v21937_v2 }
  0x3b   : > { %16670 = vmatpush3.msra.mxu1 %v616_v56  ;;  %16683 = vmatpush3.msra.mxu0 %v18807_v26  ;;  %v22098_v26 = vmov 0  ;;  %v1104_v34 = vsub.f32 %v19043_v18, %v1103_v25  ;;  %v19168_v53 = vsub.f32 %v1003_v38, %v1003_v38 }
  0x3c   : > { %16671 = vmatprep.subr.mxu1 %v21937_v2  ;;  %16684 = vmatprep.subr.mxu0 %v21937_v2  ;;  %v22099_v26 = vsel %vm19083_vm15, 4294967295, %v22098_v26 }
  0x3d   : > { %16672 = vmatpush3.msra.mxu1 %v18917_v60  ;;  %16685 = vmatpush3.msra.mxu0 %v18793_v22  ;;  %22100 = vst [vmem:[#allocation19_spill] sm:$0xff] %v22099_v26  ;;  %v1105_v48 = vand.u32 4294901760, %v1104_v34  ;;  %22110 = vst [vmem:[#allocation25_spill] sm:$0xff] %v19168_v53 }
  0x3e   : > { %16673 = vmatprep.subr.mxu1 %v21937_v2  ;;  %16686 = vmatprep.subr.mxu0 %v21937_v2 }
  0x3f   : > { %16674 = vmatpush3.msra.mxu1 %v18924_v62  ;;  %16687 = vmatpush3.msra.mxu0 %v18795_v23  ;;  %v1006_v23 = vsel %vm998_vm13, 1.0, %v21937_v2 }
  0x40   : > { %16675 = vmatprep.subr.mxu1 %v21937_v2  ;;  %16688 = vmatprep.subr.mxu0 %v21937_v2  ;;  %v19099_v12 = vsub.f32 %v1006_v23, %v1006_v23 }
  0x41   : > { %16676 = vmatpush3.msra.mxu1 %v18932_v0  ;;  %16689 = vmatpush3.msra.mxu0 %v18797_v24  ;;  %v19078_v24 = vsub.f32 %v1007_v19, %v1007_v19  ;;  %v19193_v19 = vand.u32 4294901760, %v19168_v53 }
  0x42   : > { %16677 = vmatprep.subr.mxu1 %v21937_v2  ;;  %16690 = vmatprep.subr.mxu0 %v21937_v2  ;;  %v1121_v45 = vand.u32 4294901760, %v19099_v12 }
  0x43   : > { %16678 = vmatpush3.msra.mxu1 %v18938_v1  ;;  %16691 = vmatpush3.msra.mxu0 %v18865_v42  ;;  %v1115_v35 = vand.u32 4294901760, %v19078_v24  ;;  %22113 = vst [vmem:[#allocation28_spill] sm:$0xff] %v19193_v19  ;;  %v1140_v38 = vsub.f32 %v19168_v53, %v19193_v19 }
  0x44   : > { %16680 = vmatmul.mubr.f32.vlgmr.msra.gmra.mxu1 %v18760_v16  ;;  %16701 = vmatprep.subr.mxu1 %v21937_v2  ;;  %v1122_v58 = vsub.f32 %v19099_v12, %v1121_v45 }
  0x45   : > { %16692 = vmatprep.subr.mxu0 %v21937_v2  ;;  %16702 = vmatpush3.msk.msra.mxu1 %vm490_vm2, %v21933_v17  ;;  %v1116_v51 = vsub.f32 %v19078_v24, %v1115_v35 }
  0x46   : > { %16693 = vmatpush3.msra.mxu0 %v18867_v43  ;;  %16703 = vmatprep.subr.mxu1 %v21937_v2  ;;  %v1123_v23 = vand.u32 4294901760, %v1122_v58 }
  0x47   : > { %16694 = vmatprep.subr.mxu0 %v21937_v2  ;;  %16704 = vmatpush3.msk.msra.mxu1 %vm489_vm3, %v21933_v17  ;;  %v1117_v11 = vand.u32 4294901760, %v1116_v51 }
  0x48   : > { %16695 = vmatpush3.msra.mxu0 %v18869_v44  ;;  %16705 = vmatprep.subr.mxu1 %v21937_v2 }
  0x49   : > { %16696 = vmatprep.subr.mxu0 %v21937_v2  ;;  %16706 = vmatpush3.msk.msra.mxu1 %vm488_vm4, %v21933_v17 }
  0x4a   : > { %16697 = vmatpush3.msra.mxu0 %v18900_v55  ;;  %16698 = vmatprep.mubr.msk.f32.mxu0 %vm21982_vm0, %v21937_v2 }
  0x4b   : > { %16707 = vmatprep.subr.mxu1 %v21937_v2  ;;  %16699 = vmatmul.mubr.f32.vlgmr.msra.gmra.mxu0 %v18826_v32 }
  0x4c   : > { %16708 = vmatpush3.msk.msra.mxu1 %vm487_vm5, %v21933_v17  ;;  %16720 = vmatprep.subr.mxu0 %v21937_v2 }
  0x4d   : > { %16709 = vmatprep.subr.mxu1 %v21937_v2  ;;  %16721 = vmatpush3.msra.mxu0 %v596_v33  ;;  %v1004_v33 = vsel %vm19083_vm15, 1.0, %v21937_v2 }
  0x4e   : > { %16710 = vmatpush3.msk.msra.mxu1 %vm18788_vm6, %v21933_v17  ;;  %16722 = vmatprep.subr.mxu0 %v21937_v2  ;;  %v19148_v46 = vsub.f32 %v1004_v33, %v1004_v33 }
  0x4f   : > { %16711 = vmatprep.subr.mxu1 %v21937_v2  ;;  %16723 = vmatpush3.msra.mxu0 %v602_v29  ;;  %v1005_v29 = vsel %vm19062_vm14, 1.0, %v21937_v2 }
  0x50   : > { %16712 = vmatpush3.msk.msra.mxu1 %vm18811_vm7, %v21933_v17  ;;  %16724 = vmatprep.subr.mxu0 %v21937_v2  ;;  %v19130_v37 = vsub.f32 %v1005_v29, %v1005_v29  ;;  %22108 = vst [vmem:[#allocation23_spill] sm:$0xff] %v19148_v46  ;;  %v19181_v61 = vand.u32 4294901760, %v19148_v46 }
  0x51   : > { %16713 = vmatprep.subr.mxu1 %v21937_v2  ;;  %16725 = vmatpush3.msra.mxu0 %v608_v30  ;;  %v1109_v30 = vand.u32 4294901760, %v19058_v20 }
  0x52   : > { %16714 = vmatpush3.msk.msra.mxu1 %vm18817_vm8, %v21933_v17  ;;  %16726 = vmatprep.subr.mxu0 %v21937_v2  ;;  %22107 = vst [vmem:[#allocation22_spill] sm:$0xff] %v19130_v37  ;;  %v19166_v52 = vand.u32 4294901760, %v19130_v37  ;;  %22111 = vst [vmem:[#allocation26_spill] sm:$0xff] %v19181_v61  ;;  %v1134_v29 = vsub.f32 %v19148_v46, %v19181_v61 }
  0x53   : > { %16715 = vmatprep.subr.mxu1 %v21937_v2  ;;  %16727 = vmatpush3.msra.mxu0 %v614_v31  ;;  %v22101_v31 = vmov 0  ;;  %v1110_v41 = vsub.f32 %v19058_v20, %v1109_v30 }
  0x54   : > { %16716 = vmatpush3.msk.msra.mxu1 %vm18851_vm9, %v21933_v17  ;;  %16717 = vmatprep.mubr.msk.f32.mxu1 %vm21982_vm0, %v21937_v2  ;;  %v22102_v31 = vsel %vm19104_vm1, 4294967295, %v22101_v31  ;;  %22109 = vst [vmem:[#allocation24_spill] sm:$0xff] %v19166_v52  ;;  %v1128_v13 = vsub.f32 %v19130_v37, %v19166_v52 }
  0x55   : > { %16728 = vmatprep.subr.mxu0 %v21937_v2  ;;  %16718 = vmatmul.mubr.f32.vlgmr.msra.gmra.mxu1 %v18856_v40  ;;  %22103 = vst [vmem:[#allocation20_spill] sm:$0xff] %v22102_v31  ;;  %v1111_v56 = vand.u32 4294901760, %v1110_v41  ;;  %v19218_v41 = vand.u32 4294901760, %v1134_v29 }
  0x56   : > { %16729 = vmatpush3.msra.mxu0 %v18881_v49  ;;  %16739 = vmatprep.subr.mxu1 %v21937_v2  ;;  %v19210_v34 = vand.u32 4294901760, %v1128_v13 }
  0x57   : > { %16730 = vmatprep.subr.mxu0 %v21937_v2  ;;  %16740 = vmatpush3.msk.msra.mxu1 %vm490_vm2, %v21933_v17  ;;  %vm19126_vm2 = vcmp.eq.s32.totalorder %v18724_v3, %v18994_v4 }
  0x58   : > { %16731 = vmatpush3.msra.mxu0 %v18884_v50  ;;  %16741 = vmatprep.subr.mxu1 %v21937_v2  ;;  %v22105_v36 = vsel %vm19126_vm2, 4294967295, %v22104_v36  ;;  %v1002_v47 = vsel %vm19126_vm2, 1.0, %v21937_v2 }
  0x59   : > { %16732 = vmatprep.subr.mxu0 %v21937_v2  ;;  %16742 = vmatpush3.msk.msra.mxu1 %vm489_vm3, %v21933_v17  ;;  %22106 = vst [vmem:[#allocation21_spill] sm:$0xff] %v22105_v36  ;;  %v19183_v63 = vsub.f32 %v1002_v47, %v1002_v47  ;;  %vm21946_vm3 = vcmask 7168  }
  0x5a   : > { %16733 = vmatpush3.msra.mxu0 %v18896_v54  ;;  %16743 = vmatprep.subr.mxu1 %v21937_v2 }
  0x5b   : > { %16734 = vmatprep.subr.mxu0 %v21937_v2  ;;  %16744 = vmatpush3.msk.msra.mxu1 %vm488_vm4, %v21933_v17  ;;  %22112 = vst [vmem:[#allocation27_spill] sm:$0xff] %v19183_v63  ;;  %v19203_v33 = vand.u32 4294901760, %v19183_v63  ;;  %vm21945_vm4 = vcmask 1040384  }
  0x5c   : > { %16735 = vmatpush3.msra.mxu0 %v18912_v59  ;;  %16736 = vmatprep.mubr.msk.f32.mxu0 %vm21982_vm0, %v21937_v2 }
  0x5d   : > { %16745 = vmatprep.subr.mxu1 %v21937_v2  ;;  %16737 = vmatmul.mubr.f32.vlgmr.msra.gmra.mxu0 %v18760_v16  ;;  %22114 = vst [vmem:[#allocation29_spill] sm:$0xff] %v19203_v33  ;;  %v1146_v47 = vsub.f32 %v19183_v63, %v19203_v33 }
  0x5e   : > { %16746 = vmatpush3.msk.msra.mxu1 %vm487_vm5, %v21933_v17  ;;  %16758 = vmatprep.subr.mxu0 %v21937_v2  ;;  %vm19397_vm5 = vcmp.eq.s32.totalorder %v18732_v5, %v18734_v6 }
  0x5f   : > { %16747 = vmatprep.subr.mxu1 %v21937_v2  ;;  %16759 = vmatpush3.msk.msra.mxu0 %vm1001_vm10, %v21933_v17  ;;  %v19232_v51 = vand.u32 4294901760, %v1146_v47 }
  0x60   : > { %16748 = vmatpush3.msk.msra.mxu1 %vm18788_vm6, %v21933_v17  ;;  %16760 = vmatprep.subr.mxu0 %v21937_v2 }
  0x61   : > { %16749 = vmatprep.subr.mxu1 %v21937_v2  ;;  %16761 = vmatpush3.msk.msra.mxu0 %vm1000_vm11, %v21933_v17 }
  0x62   : > { %16750 = vmatpush3.msk.msra.mxu1 %vm18811_vm7, %v21933_v17  ;;  %16762 = vmatprep.subr.mxu0 %v21937_v2  ;;  %v22244_v22 = vld [vmem:[#allocation27_spill] sm:$0xff] }
  0x63   : > { %16751 = vmatprep.subr.mxu1 %v21937_v2  ;;  %16763 = vmatpush3.msk.msra.mxu0 %vm999_vm12, %v21933_v17 }
  0x64   : > { %16752 = vmatpush3.msk.msra.mxu1 %vm18817_vm8, %v21933_v17  ;;  %16764 = vmatprep.subr.mxu0 %v21937_v2 }
  0x65   : > { %16753 = vmatprep.subr.mxu1 %v21937_v2  ;;  %16765 = vmatpush3.msk.msra.mxu0 %vm998_vm13, %v21933_v17 }
  0x66   : > { %16754 = vmatpush3.msk.msra.mxu1 %vm18851_vm9, %v21933_v17  ;;  %16755 = vmatprep.mubr.msk.f32.mxu1 %vm21982_vm0, %v21937_v2 }
  0x67   : > { %16766 = vmatprep.subr.mxu0 %v21937_v2  ;;  %16756 = vmatmul.mubr.f32.vlgmr.msra.gmra.mxu1 %v18760_v16 }
  0x68   : > { %16767 = vmatpush3.msk.msra.mxu0 %vm19062_vm14, %v21933_v17  ;;  %16777 = vmatprep.subr.mxu1 %v21937_v2 }
  0x69   : > { %16768 = vmatprep.subr.mxu0 %v21937_v2  ;;  %16778 = vmatpush3.msra.mxu1 %v1105_v48  ;;  %v19226_v48 = vand.u32 4294901760, %v1140_v38 }
  0x6a   : > { %16769 = vmatpush3.msk.msra.mxu0 %vm19083_vm15, %v21933_v17  ;;  %16779 = vmatprep.subr.mxu1 %v21937_v2 }
  0x6b   : > { %16770 = vmatprep.subr.mxu0 %v21937_v2  ;;  %16780 = vmatpush3.msra.mxu1 %v1111_v56 }
  0x6c   : > { %16771 = vmatpush3.msk.msra.mxu0 %vm19104_vm1, %v21933_v17  ;;  %16781 = vmatprep.subr.mxu1 %v21937_v2 }
  0x6d   : > { %16772 = vmatprep.subr.mxu0 %v21937_v2  ;;  %16782 = vmatpush3.msra.mxu1 %v1117_v11 }
  0x6e   : > { %16773 = vmatpush3.msk.msra.mxu0 %vm19126_vm2, %v21933_v17  ;;  %16783 = vmatprep.subr.mxu1 %v21937_v2 }
  0x6f   : > { %16774 = vmatprep.mubr.msk.f32.mxu0 %vm21982_vm0, %v21937_v2  ;;  %16784 = vmatpush3.msra.mxu1 %v1123_v23 }
  0x70   : > { %16796 = vmatprep.subr.mxu0 %v21937_v2  ;;  %16775 = vmatmul.mubr.f32.vlgmr.msra.gmra.mxu0 %v18905_v57 }
  0x71   : > { %16785 = vmatprep.subr.mxu1 %v21937_v2  ;;  %16797 = vmatpush3.msra.mxu0 %v19043_v18 }
  0x72   : > { %16786 = vmatpush3.msra.mxu1 %v19210_v34  ;;  %16798 = vmatprep.subr.mxu0 %v21937_v2 }
  0x73   : > { %16787 = vmatprep.subr.mxu1 %v21937_v2  ;;  %16799 = vmatpush3.msra.mxu0 %v19058_v20 }
  0x74   : > { %16788 = vmatpush3.msra.mxu1 %v19218_v41  ;;  %16800 = vmatprep.subr.mxu0 %v21937_v2 }
  0x75   : > { %16789 = vmatprep.subr.mxu1 %v21937_v2  ;;  %16801 = vmatpush3.msra.mxu0 %v19078_v24 }
  0x76   : > { %16790 = vmatpush3.msra.mxu1 %v19226_v48  ;;  %16802 = vmatprep.subr.mxu0 %v21937_v2 }
  0x77   : > { %16791 = vmatprep.subr.mxu1 %v21937_v2  ;;  %16803 = vmatpush3.msra.mxu0 %v19099_v12 }
  0x78   : > { %16792 = vmatpush3.msra.mxu1 %v19232_v51  ;;  %16793 = vmatprep.mubr.msk.f32.mxu1 %vm21982_vm0, %v21937_v2 }
  0x79   : > { %16804 = vmatprep.subr.mxu0 %v21937_v2  ;;  %16794 = vmatmul.mubr.f32.vlgmr.msra.gmra.mxu1 %v18760_v16 }
  0x7a   : > { %16805 = vmatpush3.msra.mxu0 %v19130_v37  ;;  %16815 = vmatprep.subr.mxu1 %v21937_v2 }
  0x7b   : > { %16806 = vmatprep.subr.mxu0 %v21937_v2  ;;  %16816 = vmatpush3.msk.msra.mxu1 %vm1001_vm10, %v21933_v17 }
  0x7c   : > { %16807 = vmatpush3.msra.mxu0 %v19148_v46  ;;  %16817 = vmatprep.subr.mxu1 %v21937_v2 }
  0x7d   : > { %16808 = vmatprep.subr.mxu0 %v21937_v2  ;;  %16818 = vmatpush3.msk.msra.mxu1 %vm1000_vm11, %v21933_v17 }
  0x7e   : > { %16809 = vmatpush3.msra.mxu0 %v19168_v53  ;;  %16819 = vmatprep.subr.mxu1 %v21937_v2 }
  0x7f   : > { %16810 = vmatprep.subr.mxu0 %v21937_v2  ;;  %16820 = vmatpush3.msk.msra.mxu1 %vm999_vm12, %v21933_v17 }
  0x80   : > { %16811 = vmatpush3.msra.mxu0 %v19183_v63  ;;  %16812 = vmatprep.mubr.msk.f32.mxu0 %vm21982_vm0, %v21937_v2 }
  0x81   : > { %16821 = vmatprep.subr.mxu1 %v21937_v2  ;;  %16813 = vmatmul.mubr.f32.vlgmr.msra.gmra.mxu0 %v18826_v32 }
  0x82   : > { %16822 = vmatpush3.msk.msra.mxu1 %vm998_vm13, %v21933_v17  ;;  %16834 = vmatprep.subr.mxu0 %v21937_v2 }
  0x83   : > { %16823 = vmatprep.subr.mxu1 %v21937_v2  ;;  %16835 = vmatpush3.msra.mxu0 %v1103_v25 }
  0x84   : > { %16824 = vmatpush3.msk.msra.mxu1 %vm19062_vm14, %v21933_v17  ;;  %16836 = vmatprep.subr.mxu0 %v21937_v2 }
  0x85   : > { %16825 = vmatprep.subr.mxu1 %v21937_v2  ;;  %16837 = vmatpush3.msra.mxu0 %v1109_v30 }
  0x86   : > { %16826 = vmatpush3.msk.msra.mxu1 %vm19083_vm15, %v21933_v17  ;;  %16838 = vmatprep.subr.mxu0 %v21937_v2 }
  0x87   : > { %16827 = vmatprep.subr.mxu1 %v21937_v2  ;;  %16839 = vmatpush3.msra.mxu0 %v1115_v35 }
  0x88   : > { %16828 = vmatpush3.msk.msra.mxu1 %vm19104_vm1, %v21933_v17  ;;  %16840 = vmatprep.subr.mxu0 %v21937_v2 }
  0x89   : > { %16829 = vmatprep.subr.mxu1 %v21937_v2  ;;  %16841 = vmatpush3.msra.mxu0 %v1121_v45 }
  0x8a   : > { %16830 = vmatpush3.msk.msra.mxu1 %vm19126_vm2, %v21933_v17  ;;  %16831 = vmatprep.mubr.msk.f32.mxu1 %vm21982_vm0, %v21937_v2 }
  0x8b   : > { %16842 = vmatprep.subr.mxu0 %v21937_v2  ;;  %16832 = vmatmul.mubr.f32.vlgmr.msra.gmra.mxu1 %v18856_v40 }
  0x8c   : > { %16843 = vmatpush3.msra.mxu0 %v19166_v52  ;;  %16853 = vmatprep.subr.mxu1 %v21937_v2 }
  0x8d   : > { %16844 = vmatprep.subr.mxu0 %v21937_v2  ;;  %16854 = vmatpush3.msk.msra.mxu1 %vm1001_vm10, %v21933_v17  ;;  %vm19406_vm10 = vcmp.eq.s32.totalorder %v18737_v7, %v18734_v6 }
  0x8e   : > { %16845 = vmatpush3.msra.mxu0 %v19181_v61  ;;  %16855 = vmatprep.subr.mxu1 %v21937_v2 }
  0x8f   : > { %16846 = vmatprep.subr.mxu0 %v21937_v2  ;;  %16856 = vmatpush3.msk.msra.mxu1 %vm1000_vm11, %v21933_v17  ;;  %vm19421_vm11 = vcmp.eq.s32.totalorder %v18740_v8, %v18734_v6 }
  0x90   : > { %16847 = vmatpush3.msra.mxu0 %v19193_v19  ;;  %16857 = vmatprep.subr.mxu1 %v21937_v2 }
  0x91   : > { %16848 = vmatprep.subr.mxu0 %v21937_v2  ;;  %16858 = vmatpush3.msk.msra.mxu1 %vm999_vm12, %v21933_v17  ;;  %vm19433_vm12 = vcmp.eq.s32.totalorder %v18746_v9, %v18734_v6 }
  0x92   : > { %16849 = vmatpush3.msra.mxu0 %v19203_v33  ;;  %16850 = vmatprep.mubr.msk.f32.mxu0 %vm21982_vm0, %v21937_v2 }
  0x93   : > { %16859 = vmatprep.subr.mxu1 %v21937_v2  ;;  %16851 = vmatmul.mubr.f32.vlgmr.msra.gmra.mxu0 %v18760_v16 }
  0x94   : > { %16860 = vmatpush3.msk.msra.mxu1 %vm998_vm13, %v21933_v17  ;;  %16869 = vmatprep.mubr.msk.f32.mxu1 %vm21982_vm0, %v21937_v2  ;;  %vm19454_vm13 = vcmp.eq.s32.totalorder %v18749_v10, %v18734_v6 }
  0x95   : > { %16861 = vmatprep.subr.mxu1 %v21937_v2  ;;  %16872 = vmatprep.subr.mxu0 %v21937_v2 }
  0x96   : > { %16862 = vmatpush3.msk.msra.mxu1 %vm19062_vm14, %v21933_v17  ;;  %16874 = vmatprep.mubr.msk.f32.mxu0 %vm21982_vm0, %v21937_v2 }
  0x97   : > { %16863 = vmatprep.subr.mxu1 %v21937_v2 }
  0x98   : > { %16864 = vmatpush3.msk.msra.mxu1 %vm19083_vm15, %v21933_v17 }
  0x99   : > { %16865 = vmatprep.subr.mxu1 %v21937_v2 }
  0x9a   : > { %16866 = vmatpush3.msk.msra.mxu1 %vm19104_vm1, %v21933_v17 }
  0x9b   : > { %16867 = vmatprep.subr.mxu1 %v21937_v2 }
  0x9c   : > { %16868 = vmatpush3.msk.msra.mxu1 %vm19126_vm2, %v21933_v17  ;;  %vm19503_vm2 = vcmp.eq.s32.totalorder %v18724_v3, %v18734_v6 }
  0x9d   : > { %16870 = vmatmul.mubr.f32.vlgmr.msra.gmra.mxu1 %v18760_v16  ;;  %16877 = vmatprep.subr.mxu1 %v21937_v2 }
  0x9e   : > { %16879 = vmatprep.mubr.msk.f32.mxu1 %vm21982_vm0, %v21937_v2 }
  0xfa   : > { %v574_v4 = vpop.f32.mrf.mxu0 }
  0xfc   : > { %v16662_v18 = vpop.f32.mrf.mxu0 }
 0x104   : > { %v677_v20 = vpop.f32.mrf.mxu1 }
 0x105   : > { %v678_v24 = vadd.f32 %v677_v20, %v574_v4  ;;  %v15680_v4 = vld [vmem:[%s22115_s1 + $0x4] sm:$0xf] }
 0x106   : > { %v16681_v25 = vpop.f32.mrf.mxu1 }
 0x10b   : > { %v757_v12 = vpop.f32.mrf.mxu0 }
 0x10c   : > { %v758_v30 = vadd.f32 %v757_v12, %v678_v24  ;;  %v1503_v24 = vsel %vm21946_vm3, %v15680_v4, 0 }
 0x10d   : > { %v16700_v35 = vpop.f32.mrf.mxu0  ;;  %v19367_v12 = vand.u32 4294901760, %v1503_v24 }
 0x10f   : > { %v1576_v35 = vsub.f32 %v1503_v24, %v19367_v12 }
 0x115   : > { %v830_v45 = vpop.f32.mrf.mxu1 }
 0x116   : > { %v831_v56 = vadd.f32 %v830_v45, %v758_v30 }
 0x117   : > { %v16719_v58 = vpop.f32.mrf.mxu1 }
 0x118   : > { %v1577_v58 = vand.u32 4294901760, %v1576_v35 }
 0x11a   : > { %v1578_v4 = vsub.f32 %v1576_v35, %v1577_v58 }
 0x11d   : > { %v917_v11 = vpop.f32.mrf.mxu0 }
 0x11e   : > { %v918_v13 = vadd.f32 %v917_v11, %v831_v56 }
 0x11f   : > { %v16738_v23 = vpop.f32.mrf.mxu0 }
 0x127   : > { %v988_v29 = vpop.f32.mrf.mxu1 }
 0x129   : > { %v16757_v38 = vpop.f32.mrf.mxu1 }
 0x12a   : > { %v989_v38 = vadd.f32 %v988_v29, %v918_v13  ;;  %v22116_v29 = vmov 0.0  }
 0x12b   : > { %v2415_v36 = vsel %vm19503_vm2, 1.0, %v22116_v29 }
 0x130   : > { %v1081_v47 = vpop.f32.mrf.mxu0 }
 0x132   : > { %v16776_v17 = vpop.f32.mrf.mxu0 }
 0x139   : > { %v1184_v33 = vpop.f32.mrf.mxu1 }
 0x13a   : > { %v1185_v45 = vadd.f32 %v1184_v33, %v1081_v47  ;;  %v1959_v33 = vsel %vm21945_vm4, %v989_v38, 0  ;;  %v22117_v38 = vmov 0 }
 0x13b   : > { %v16795_v2 = vpop.f32.mrf.mxu1  ;;  %v22118_v38 = vsel %vm19397_vm5, 4294967295, %v22117_v38 }
 0x13c   : > { %v992_v2 = vld [vmem:[%s22115_s1] sm:$0xf]  ;;  %22119 = vst [vmem:[#allocation30_spill] sm:$0xff] %v22118_v38 }
 0x13d   : > { %v1956_v23 = vsel %vm21946_vm3, %v992_v2, 0  ;;  %vm19483_vm3 = vcmp.eq.s32.totalorder %v18758_v15, %v18734_v6 }
 0x13e   : > { %v19374_v61 = vand.u32 4294901760, %v1956_v23  ;;  %v2416_v53 = vsel %vm19483_vm3, 1.0, %v22116_v29 }
 0x141   : > { %v1264_v19 = vpop.f32.mrf.mxu0 }
 0x142   : > { %v1265_v56 = vadd.f32 %v1264_v19, %v1185_v45  ;;  %v19379_v19 = vsub.f32 %v1956_v23, %v19374_v61 }
 0x143   : > { %v16814_v18 = vpop.f32.mrf.mxu0 }
 0x144   : > { %v21950_v45 = vand.u32 4294901760, %v19379_v19 }
 0x14b   : > { %v1337_v20 = vpop.f32.mrf.mxu1 }
 0x14c   : > { %v1338_v11 = vadd.f32 %v1337_v20, %v1265_v56  ;;  %v19381_v20 = vand.u32 4294901760, %v1959_v33 }
 0x14d   : > { %v16833_v25 = vpop.f32.mrf.mxu1 }
 0x153   : > { %v1424_v30 = vpop.f32.mrf.mxu0 }
 0x154   : > { %v1425_v18 = vadd.f32 %v1424_v30, %v1338_v11  ;;  %v2030_v11 = vsub.f32 %v19379_v19, %v21950_v45 }
 0x155   : > { %v16852_v17 = vpop.f32.mrf.mxu0 }
 0x156   : > { %v1579_v17 = vand.u32 4294901760, %v1578_v4  ;;  %v2422_v4 = vsel %vm19397_vm5, 1.0, %v22116_v29 }
 0x15d   : > { %v1495_v25 = vpop.f32.mrf.mxu1 }
 0x15e   : > { %v1496_v52 = vadd.f32 %v1495_v25, %v1425_v18  ;;  %v22120_v18 = vmov 0 }
 0x15f   : > { %v16871_v24 = vpop.f32.mrf.mxu1  ;;  %v22121_v18 = vsel %vm19406_vm10, 4294967295, %v22120_v18 }
 0x160   : > { %v1507_v47 = vsel %vm21945_vm4, %v1496_v52, 0  ;;  %v2069_v52 = vsub.f32 %v1959_v33, %v19381_v20  ;;  %22122 = vst [vmem:[#allocation31_spill] sm:$0xff] %v22121_v18  ;;  %v22123_v24 = vmov 0  ;;  %v2421_v33 = vsel %vm19406_vm10, 1.0, %v22116_v29 }
 0x161   : > { %v1540_v63 = vand.u32 4294901760, %v1507_v47  ;;  %v22124_v24 = vsel %vm19421_vm11, 4294967295, %v22123_v24  ;;  %vm19466_vm4 = vcmp.eq.s32.totalorder %v18755_v14, %v18734_v6 }
 0x162   : > { %v2070_v23 = vand.u32 4294901760, %v2069_v52  ;;  %22125 = vst [vmem:[#allocation32_spill] sm:$0xff] %v22124_v24 }
 0x163   : > { %v1617_v13 = vsub.f32 %v1507_v47, %v1540_v63  ;;  %16873 = vmatpush3.msra.mxu0 %v1540_v63  ;;  %v19429_v47 = vsub.f32 %v2422_v4, %v2422_v4  ;;  %v22135_v4 = vmov 0 }
 0x164   : > { %16875 = vmatmul.mubr.f32.vlgmr.msra.gmra.mxu0 %v1579_v17  ;;  %16882 = vmatprep.subr.mxu0 %v22116_v29  ;;  %v2071_v25 = vsub.f32 %v2069_v52, %v2070_v23  ;;  %v22126_v17 = vmov 0  ;;  %v22136_v4 = vsel %vm19483_vm3, 4294967295, %v22135_v4 }
 0x165   : > { %16883 = vmatpush3.msra.mxu0 %v1617_v13  ;;  %16884 = vmatprep.mubr.msk.f32.mxu0 %vm21982_vm0, %v22116_v29  ;;  %v1618_v30 = vand.u32 4294901760, %v1617_v13  ;;  %v22127_v17 = vsel %vm19433_vm12, 4294967295, %v22126_v17  ;;  %22137 = vst [vmem:[#allocation36_spill] sm:$0xff] %v22136_v4 }
 0x166   : > { %16892 = vmatprep.subr.mxu0 %v22116_v29  ;;  %22128 = vst [vmem:[#allocation33_spill] sm:$0xff] %v22127_v17 }
 0x167   : > { %v1619_v2 = vsub.f32 %v1617_v13, %v1618_v30  ;;  %v19445_v13 = vsub.f32 %v2421_v33, %v2421_v33 }
 0x168   : > { %16885 = vmatmul.mubr.f32.vlgmr.msra.gmra.mxu0 %v1576_v35  ;;  %v2031_v35 = vand.u32 4294901760, %v2030_v11 }
 0x169   : > { %16893 = vmatpush3.msra.mxu0 %v1618_v30  ;;  %v1620_v56 = vand.u32 4294901760, %v1619_v2  ;;  %16894 = vmatprep.mubr.msk.f32.mxu0 %vm21982_vm0, %v22116_v29  ;;  %v2419_v30 = vsel %vm19433_vm12, 1.0, %v22116_v29 }
 0x16a   : > { %16902 = vmatprep.subr.mxu0 %v22116_v29  ;;  %v19473_v11 = vsub.f32 %v2419_v30, %v2419_v30  ;;  %v22139_v30 = vmov 0 }
 0x16b   : > { %16878 = vmatpush3.msra.mxu1 %v1620_v56  ;;  %v21949_v56 = vand.u32 4294901760, %v19429_v47  ;;  %v22140_v30 = vsel %vm19503_vm2, 4294967295, %v22139_v30 }
 0x16c   : > { %16880 = vmatmul.mubr.f32.vlgmr.msra.gmra.mxu1 %v19367_v12  ;;  %16887 = vmatprep.subr.mxu1 %v22116_v29  ;;  %22141 = vst [vmem:[#allocation37_spill] sm:$0xff] %v22140_v30 }
 0x16d   : > { %16895 = vmatmul.mubr.f32.vlgmr.msra.gmra.mxu0 %v19367_v12  ;;  %16888 = vmatpush3.msra.mxu1 %v1540_v63 }
 0x16e   : > { %16903 = vmatpush3.msra.mxu0 %v19381_v20  ;;  %16889 = vmatprep.mubr.msk.f32.mxu1 %vm21982_vm0, %v22116_v29 }
 0x16f   : > { %16897 = vmatprep.subr.mxu1 %v22116_v29  ;;  %16904 = vmatprep.mubr.msk.f32.mxu0 %vm21982_vm0, %v22116_v29 }
 0x170   : > { %16912 = vmatprep.subr.mxu0 %v22116_v29  ;;  %16890 = vmatmul.mubr.f32.vlgmr.msra.gmra.mxu1 %v1577_v58  ;;  %v2420_v58 = vsel %vm19421_vm11, 1.0, %v22116_v29 }
 0x171   : > { %16898 = vmatpush3.msra.mxu1 %v1540_v63  ;;  %16905 = vmatmul.mubr.f32.vlgmr.msra.gmra.mxu0 %v2031_v35  ;;  %v2072_v63 = vand.u32 4294901760, %v2071_v25  ;;  %v19459_v2 = vsub.f32 %v2420_v58, %v2420_v58  ;;  %v21954_v35 = vand.u32 4294901760, %v19445_v13  ;;  %v2517_v25 = vsub.f32 %v19429_v47, %v21949_v56 }
 0x172   : > { %16913 = vmatpush3.msra.mxu0 %v2069_v52  ;;  %16899 = vmatprep.mubr.msk.f32.mxu1 %vm21982_vm0, %v22116_v29  ;;  %v22129_v52 = vmov 0  ;;  %v2417_v58 = vsel %vm19466_vm4, 1.0, %v22116_v29 }
 0x173   : > { %16907 = vmatprep.subr.mxu1 %v22116_v29  ;;  %16914 = vmatprep.mubr.msk.f32.mxu0 %vm21982_vm0, %v22116_v29  ;;  %v22130_v52 = vsel %vm19454_vm13, 4294967295, %v22129_v52  ;;  %v2523_v33 = vsub.f32 %v19445_v13, %v21954_v35  ;;  %v19523_v46 = vsub.f32 %v2417_v58, %v2417_v58  ;;  %v2518_v35 = vand.u32 4294901760, %v2517_v25 }
 0x174   : > { %16922 = vmatprep.subr.mxu0 %v22116_v29  ;;  %16900 = vmatmul.mubr.f32.vlgmr.msra.gmra.mxu1 %v19367_v12  ;;  %22131 = vst [vmem:[#allocation34_spill] sm:$0xff] %v22130_v52  ;;  %v22132_v12 = vmov 0  ;;  %v22145_v45 = vand.u32 4294901760, %v19459_v2  ;;  %v22148_v25 = vand.u32 4294901760, %v19473_v11 }
 0x175   : > { %16908 = vmatpush3.msra.mxu1 %v2072_v63  ;;  %16915 = vmatmul.mubr.f32.vlgmr.msra.gmra.mxu0 %v19379_v19  ;;  %v22133_v12 = vsel %vm19466_vm4, 4294967295, %v22132_v12  ;;  %v22138_v63 = vmov 1.0   ;;  %22144 = vst [vmem:[#allocation39_spill] sm:$0xff] %v19523_v46 }
 0x176   : > { %16923 = vmatpush3.msra.mxu0 %v2070_v23  ;;  %16909 = vmatprep.mubr.msk.f32.mxu1 %vm21982_vm0, %v22116_v29  ;;  %22134 = vst [vmem:[#allocation35_spill] sm:$0xff] %v22133_v12  ;;  %v2418_v23 = vsel %vm19454_vm13, 1.0, %v22116_v29  ;;  %v2529_v37 = vsub.f32 %v19459_v2, %v22145_v45  ;;  %v2524_v45 = vand.u32 4294901760, %v2523_v33  ;;  %v2535_v58 = vsub.f32 %v19473_v11, %v22148_v25 }
 0x177   : > { %16917 = vmatprep.subr.mxu1 %v22116_v29  ;;  %16924 = vmatprep.mubr.msk.f32.mxu0 %vm21982_vm0, %v22116_v29  ;;  %v19507_v56 = vsub.f32 %v2418_v23, %v2418_v23  ;;  %v22143_v23 = vand.u32 4294901760, %v19379_v19 }
 0x178   : > { %16932 = vmatprep.subr.mxu0 %v22116_v29  ;;  %16910 = vmatmul.mubr.f32.vlgmr.msra.gmra.mxu1 %v19374_v61  ;;  %v2530_v31 = vand.u32 4294901760, %v2529_v37 }
 0x179   : > { %16918 = vmatpush3.msra.mxu1 %v19381_v20  ;;  %16925 = vmatmul.mubr.f32.vlgmr.msra.gmra.mxu0 %v19374_v61  ;;  %22142 = vst [vmem:[#allocation38_spill] sm:$0xff] %v19507_v56  ;;  %v19539_v19 = vand.u32 4294901760, %v19507_v56 }
 0x17a   : > { %16933 = vmatpush3.msk.msra.mxu0 %vm19397_vm5, %v22138_v63  ;;  %16919 = vmatprep.mubr.msk.f32.mxu1 %vm21982_vm0, %v22116_v29 }
 0x17b   : > { %16934 = vmatprep.subr.mxu0 %v22116_v29  ;;  %16927 = vmatprep.subr.mxu1 %v22116_v29  ;;  %22146 = vst [vmem:[#allocation40_spill] sm:$0xff] %v19539_v19  ;;  %v2541_v33 = vsub.f32 %v19507_v56, %v19539_v19 }
 0x17c   : > { %16935 = vmatpush3.msk.msra.mxu0 %vm19406_vm10, %v22138_v63  ;;  %16920 = vmatmul.mubr.f32.vlgmr.msra.gmra.mxu1 %v22143_v23  ;;  %v19553_v23 = vand.u32 4294901760, %v19523_v46 }
 0x17d   : > { %16936 = vmatprep.subr.mxu0 %v22116_v29  ;;  %16928 = vmatpush3.msra.mxu1 %v19381_v20  ;;  %v19541_v20 = vsub.f32 %v2416_v53, %v2416_v53  ;;  %v19555_v53 = vsub.f32 %v2415_v36, %v2415_v36  ;;  %v2536_v36 = vand.u32 4294901760, %v2535_v58 }
 0x17e   : > { %16937 = vmatpush3.msk.msra.mxu0 %vm19421_vm11, %v22138_v63  ;;  %16929 = vmatprep.mubr.msk.f32.mxu1 %vm21982_vm0, %v22116_v29  ;;  %22149 = vst [vmem:[#allocation42_spill] sm:$0xff] %v19553_v23  ;;  %v2547_v37 = vsub.f32 %v19523_v46, %v19553_v23 }
 0x17f   : > { %22147 = vst [vmem:[#allocation41_spill] sm:$0xff] %v19541_v20  ;;  %16938 = vmatprep.subr.mxu0 %v22116_v29  ;;  %16951 = vmatprep.subr.mxu1 %v22116_v29  ;;  %22150 = vst [vmem:[#allocation43_spill] sm:$0xff] %v19555_v53 }
 0x180   : > { %16939 = vmatpush3.msk.msra.mxu0 %vm19433_vm12, %v22138_v63  ;;  %16930 = vmatmul.mubr.f32.vlgmr.msra.gmra.mxu1 %v19374_v61  ;;  %v19565_v61 = vand.u32 4294901760, %v19541_v20 }
 0x181   : > { %16940 = vmatprep.subr.mxu0 %v22116_v29  ;;  %16952 = vmatpush3.msra.mxu1 %v2518_v35  ;;  %v19575_v35 = vand.u32 4294901760, %v19555_v53 }
 0x182   : > { %16941 = vmatpush3.msk.msra.mxu0 %vm19454_vm13, %v22138_v63  ;;  %16953 = vmatprep.subr.mxu1 %v22116_v29  ;;  %22151 = vst [vmem:[#allocation44_spill] sm:$0xff] %v19565_v61  ;;  %v2553_v25 = vsub.f32 %v19541_v20, %v19565_v61 }
 0x183   : > { %16942 = vmatprep.subr.mxu0 %v22116_v29  ;;  %16954 = vmatpush3.msra.mxu1 %v2524_v45  ;;  %22152 = vst [vmem:[#allocation45_spill] sm:$0xff] %v19575_v35  ;;  %v19582_v45 = vand.u32 4294901760, %v2541_v33  ;;  %v2559_v58 = vsub.f32 %v19555_v53, %v19575_v35 }
 0x184   : > { %16943 = vmatpush3.msk.msra.mxu0 %vm19466_vm4, %v22138_v63  ;;  %16955 = vmatprep.subr.mxu1 %v22116_v29  ;;  %v19600_v33 = vand.u32 4294901760, %v2553_v25  ;;  %v22158_v25 = vand.u32 4294901760, %v19445_v13 }
 0x185   : > { %16944 = vmatprep.subr.mxu0 %v22116_v29  ;;  %16956 = vmatpush3.msra.mxu1 %v2530_v31  ;;  %22153 = vst [vmem:[#allocation46_spill] sm:$0xff] %v19582_v45  ;;  %v19592_v31 = vand.u32 4294901760, %v2547_v37  ;;  %v22157_v37 = vand.u32 4294901760, %v19429_v47 }
 0x186   : > { %16945 = vmatpush3.msk.msra.mxu0 %vm19483_vm3, %v22138_v63  ;;  %16957 = vmatprep.subr.mxu1 %v22116_v29  ;;  %22155 = vst [vmem:[#allocation48_spill] sm:$0xff] %v19600_v33 }
 0x187   : > { %16946 = vmatprep.subr.mxu0 %v22116_v29  ;;  %16958 = vmatpush3.msra.mxu1 %v2536_v36  ;;  %22154 = vst [vmem:[#allocation47_spill] sm:$0xff] %v19592_v31  ;;  %v19606_v36 = vand.u32 4294901760, %v2559_v58 }
 0x188   : > { %16947 = vmatpush3.msk.msra.mxu0 %vm19503_vm2, %v22138_v63  ;;  %16948 = vmatprep.mubr.msk.f32.mxu0 %vm21982_vm0, %v22116_v29 }
 0x189   : > { %16959 = vmatprep.subr.mxu1 %v22116_v29  ;;  %16970 = vmatprep.subr.mxu0 %v22116_v29  ;;  %22156 = vst [vmem:[#allocation49_spill] sm:$0xff] %v19606_v36 }
 0x18a   : > { %16949 = vmatmul.mubr.f32.vlgmr.msra.gmra.mxu0 %v18905_v57  ;;  %16960 = vmatpush3.msra.mxu1 %v19582_v45 }
 0x18b   : > { %16971 = vmatpush3.msra.mxu0 %v19429_v47  ;;  %16961 = vmatprep.subr.mxu1 %v22116_v29  ;;  %v22159_v47 = vand.u32 4294901760, %v19459_v2 }
 0x18c   : > { %16972 = vmatprep.subr.mxu0 %v22116_v29  ;;  %16962 = vmatpush3.msra.mxu1 %v19592_v31 }
 0x18d   : > { %16973 = vmatpush3.msra.mxu0 %v19445_v13  ;;  %16963 = vmatprep.subr.mxu1 %v22116_v29  ;;  %v22160_v13 = vand.u32 4294901760, %v19473_v11 }
 0x18e   : > { %16974 = vmatprep.subr.mxu0 %v22116_v29  ;;  %16964 = vmatpush3.msra.mxu1 %v19600_v33 }
 0x18f   : > { %16975 = vmatpush3.msra.mxu0 %v19459_v2  ;;  %16965 = vmatprep.subr.mxu1 %v22116_v29 }
 0x190   : > { %16976 = vmatprep.subr.mxu0 %v22116_v29  ;;  %16966 = vmatpush3.msra.mxu1 %v19606_v36 }
 0x191   : > { %16967 = vmatprep.mubr.msk.f32.mxu1 %vm21982_vm0, %v22116_v29  ;;  %16977 = vmatpush3.msra.mxu0 %v19473_v11 }
 0x192   : > { %16968 = vmatmul.mubr.f32.vlgmr.msra.gmra.mxu1 %v18760_v16  ;;  %16978 = vmatprep.subr.mxu0 %v22116_v29 }
 0x193   : > { %16989 = vmatprep.subr.mxu1 %v22116_v29  ;;  %16979 = vmatpush3.msra.mxu0 %v19507_v56 }
 0x194   : > { %16990 = vmatpush3.msk.msra.mxu1 %vm19397_vm5, %v22138_v63  ;;  %16980 = vmatprep.subr.mxu0 %v22116_v29 }
 0x195   : > { %16991 = vmatprep.subr.mxu1 %v22116_v29  ;;  %16981 = vmatpush3.msra.mxu0 %v19523_v46 }
 0x196   : > { %16992 = vmatpush3.msk.msra.mxu1 %vm19406_vm10, %v22138_v63  ;;  %16982 = vmatprep.subr.mxu0 %v22116_v29 }
 0x197   : > { %16993 = vmatprep.subr.mxu1 %v22116_v29  ;;  %16983 = vmatpush3.msra.mxu0 %v19541_v20 }
 0x198   : > { %16994 = vmatpush3.msk.msra.mxu1 %vm19421_vm11, %v22138_v63  ;;  %16984 = vmatprep.subr.mxu0 %v22116_v29 }
 0x199   : > { %16995 = vmatprep.subr.mxu1 %v22116_v29  ;;  %16985 = vmatpush3.msra.mxu0 %v19555_v53 }
 0x19a   : > { %16986 = vmatprep.mubr.msk.f32.mxu0 %vm21982_vm0, %v22116_v29  ;;  %16996 = vmatpush3.msk.msra.mxu1 %vm19433_vm12, %v22138_v63 }
 0x19b   : > { %16987 = vmatmul.mubr.f32.vlgmr.msra.gmra.mxu0 %v18826_v32  ;;  %16997 = vmatprep.subr.mxu1 %v22116_v29 }
 0x19c   : > { %17008 = vmatprep.subr.mxu0 %v22116_v29  ;;  %16998 = vmatpush3.msk.msra.mxu1 %vm19454_vm13, %v22138_v63 }
 0x19d   : > { %17009 = vmatpush3.msra.mxu0 %v22157_v37  ;;  %16999 = vmatprep.subr.mxu1 %v22116_v29 }
 0x19e   : > { %17010 = vmatprep.subr.mxu0 %v22116_v29  ;;  %17000 = vmatpush3.msk.msra.mxu1 %vm19466_vm4, %v22138_v63 }
 0x19f   : > { %17011 = vmatpush3.msra.mxu0 %v22158_v25  ;;  %17001 = vmatprep.subr.mxu1 %v22116_v29 }
 0x1a0   : > { %17012 = vmatprep.subr.mxu0 %v22116_v29  ;;  %17002 = vmatpush3.msk.msra.mxu1 %vm19483_vm3, %v22138_v63 }
 0x1a1   : > { %17013 = vmatpush3.msra.mxu0 %v22159_v47  ;;  %17003 = vmatprep.subr.mxu1 %v22116_v29 }
 0x1a2   : > { %17014 = vmatprep.subr.mxu0 %v22116_v29  ;;  %17004 = vmatpush3.msk.msra.mxu1 %vm19503_vm2, %v22138_v63 }
 0x1a3   : > { %17005 = vmatprep.mubr.msk.f32.mxu1 %vm21982_vm0, %v22116_v29  ;;  %17015 = vmatpush3.msra.mxu0 %v22160_v13 }
 0x1a4   : > { %17006 = vmatmul.mubr.f32.vlgmr.msra.gmra.mxu1 %v18856_v40  ;;  %17016 = vmatprep.subr.mxu0 %v22116_v29 }
 0x1a5   : > { %17027 = vmatprep.subr.mxu1 %v22116_v29  ;;  %17017 = vmatpush3.msra.mxu0 %v19539_v19 }
 0x1a6   : > { %17028 = vmatpush3.msk.msra.mxu1 %vm19397_vm5, %v22138_v63  ;;  %17018 = vmatprep.subr.mxu0 %v22116_v29 }
 0x1a7   : > { %17029 = vmatprep.subr.mxu1 %v22116_v29  ;;  %17019 = vmatpush3.msra.mxu0 %v19553_v23 }
 0x1a8   : > { %17030 = vmatpush3.msk.msra.mxu1 %vm19406_vm10, %v22138_v63  ;;  %17020 = vmatprep.subr.mxu0 %v22116_v29 }
 0x1a9   : > { %17031 = vmatprep.subr.mxu1 %v22116_v29  ;;  %17021 = vmatpush3.msra.mxu0 %v19565_v61 }
 0x1aa   : > { %17032 = vmatpush3.msk.msra.mxu1 %vm19421_vm11, %v22138_v63  ;;  %17022 = vmatprep.subr.mxu0 %v22116_v29 }
 0x1ab   : > { %17033 = vmatprep.subr.mxu1 %v22116_v29  ;;  %17023 = vmatpush3.msra.mxu0 %v19575_v35 }
 0x1ac   : > { %17024 = vmatprep.mubr.msk.f32.mxu0 %vm21982_vm0, %v22116_v29  ;;  %17034 = vmatpush3.msk.msra.mxu1 %vm19433_vm12, %v22138_v63  ;;  %vm22165_vm12 = vcmask 1040384  }
 0x1ad   : > { %17025 = vmatmul.mubr.f32.vlgmr.msra.gmra.mxu0 %v18760_v16  ;;  %17035 = vmatprep.subr.mxu1 %v22116_v29 }
 0x1ae   : > { %17036 = vmatpush3.msk.msra.mxu1 %vm19454_vm13, %v22138_v63  ;;  %17043 = vmatprep.mubr.msk.f32.mxu1 %vm21982_vm0, %v22116_v29 }
 0x1af   : > { %17037 = vmatprep.subr.mxu1 %v22116_v29  ;;  %17046 = vmatprep.subr.mxu0 %v22116_v29 }
 0x1b0   : > { %17038 = vmatpush3.msk.msra.mxu1 %vm19466_vm4, %v22138_v63  ;;  %17048 = vmatprep.mubr.msk.f32.mxu0 %vm21982_vm0, %v22116_v29 }
 0x1b1   : > { %17039 = vmatprep.subr.mxu1 %v22116_v29 }
 0x1b2   : > { %17040 = vmatpush3.msk.msra.mxu1 %vm19483_vm3, %v22138_v63 }
 0x1b3   : > { %17041 = vmatprep.subr.mxu1 %v22116_v29 }
 0x1b4   : > { %17042 = vmatpush3.msk.msra.mxu1 %vm19503_vm2, %v22138_v63 }
 0x1b5   : > { %17044 = vmatmul.mubr.f32.vlgmr.msra.gmra.mxu1 %v18760_v16  ;;  %17051 = vmatprep.subr.mxu1 %v22116_v29 }
 0x1b6   : > { %17053 = vmatprep.mubr.msk.f32.mxu1 %vm21982_vm0, %v22116_v29  ;;  %vm22161_vm0 = vcmask 7168  }
 0x224   : > { %v1581_v2 = vpop.f32.mrf.mxu0 }
 0x226   : > { %v16876_v11 = vpop.f32.mrf.mxu0 }
 0x228   : > { %v1731_v58 = vpop.f32.mrf.mxu0 }
 0x22a   : > { %v16886_v37 = vpop.f32.mrf.mxu0 }
 0x22c   : > { %v1657_v25 = vpop.f32.mrf.mxu1 }
 0x22d   : > { %v1658_v47 = vadd.f32 %v1657_v25, %v1581_v2  ;;  %v1879_v13 = vpop.f32.mrf.mxu0 }
 0x22e   : > { %v16881_v17 = vpop.f32.mrf.mxu1 }
 0x22f   : > { %v1732_v24 = vadd.f32 %v1731_v58, %v1658_v47  ;;  %v16896_v18 = vpop.f32.mrf.mxu0 }
 0x230   : > { %v1805_v38 = vpop.f32.mrf.mxu1 }
 0x231   : > { %v1806_v35 = vadd.f32 %v1805_v38, %v1732_v24  ;;  %v2033_v61 = vpop.f32.mrf.mxu0 }
 0x232   : > { %v16891_v23 = vpop.f32.mrf.mxu1 }
 0x233   : > { %v1880_v19 = vadd.f32 %v1879_v13, %v1806_v35  ;;  %v16906_v53 = vpop.f32.mrf.mxu0 }
 0x234   : > { %v1951_v36 = vpop.f32.mrf.mxu1 }
 0x235   : > { %v1952_v33 = vadd.f32 %v1951_v36, %v1880_v19  ;;  %v2183_v20 = vpop.f32.mrf.mxu0 }
 0x236   : > { %v16901_v31 = vpop.f32.mrf.mxu1 }
 0x237   : > { %v2034_v46 = vadd.f32 %v2033_v61, %v1952_v33  ;;  %v16916_v11 = vpop.f32.mrf.mxu0 }
 0x238   : > { %v2109_v45 = vpop.f32.mrf.mxu1 }
 0x239   : > { %v2110_v37 = vadd.f32 %v2109_v45, %v2034_v46  ;;  %v2331_v56 = vpop.f32.mrf.mxu0  ;;  %v15705_v46 = vld [vmem:[%s22115_s1 + $0x8] sm:$0xf] }
 0x23a   : > { %v16911_v2 = vpop.f32.mrf.mxu1  ;;  %v2915_v45 = vsel %vm22161_vm0, %v15705_v46, 0  ;;  %v22166_v46 = vmov 0 }
 0x23b   : > { %v2184_v25 = vadd.f32 %v2183_v20, %v2110_v37  ;;  %v16926_v17 = vpop.f32.mrf.mxu0  ;;  %v19736_v11 = vand.u32 4294901760, %v2915_v45 }
 0x23c   : > { %v2257_v58 = vpop.f32.mrf.mxu1 }
 0x23d   : > { %v2258_v18 = vadd.f32 %v2257_v58, %v2184_v25 }
 0x23e   : > { %v16921_v47 = vpop.f32.mrf.mxu1 }
 0x23f   : > { %v2332_v38 = vadd.f32 %v2331_v56, %v2258_v18  ;;  %v19739_v56 = vsub.f32 %v2915_v45, %v19736_v11  ;;  %v3367_v47 = vadd.s32 1, %v18734_v6 }
 0x240   : > { %v2403_v24 = vpop.f32.mrf.mxu1 }
 0x241   : > { %v19730_v23 = vadd.f32 %v2403_v24, %v2332_v38  ;;  %v2988_v58 = vand.u32 4294901760, %v19739_v56  ;;  %vm19745_vm0 = vcmp.eq.s32.totalorder %v18732_v5, %v3367_v47  ;;  %vm19751_vm11 = vcmp.eq.s32.totalorder %v18737_v7, %v3367_v47 }
 0x242   : > { %v16931_v53 = vpop.f32.mrf.mxu1  ;;  %v22167_v46 = vsel %vm19751_vm11, 4294967295, %v22166_v46  ;;  %vm19759_vm10 = vcmp.eq.s32.totalorder %v18740_v8, %v3367_v47  ;;  %vm19772_vm5 = vcmp.eq.s32.totalorder %v18746_v9, %v3367_v47  ;;  %vm19787_vm2 = vcmp.eq.s32.totalorder %v18749_v10, %v3367_v47 }
 0x243   : > { %v2989_v24 = vsub.f32 %v19739_v56, %v2988_v58  ;;  %22168 = vst [vmem:[#allocation51_spill] sm:$0xff] %v22167_v46  ;;  %vm19798_vm3 = vcmp.eq.s32.totalorder %v18755_v14, %v3367_v47  ;;  %vm19811_vm4 = vcmp.eq.s32.totalorder %v18758_v15, %v3367_v47  ;;  %vm19829_vm13 = vcmp.eq.s32.totalorder %v18724_v3, %v3367_v47 }
 0x244   : > { %v3377_v4 = vsel %vm19811_vm4, 1.0, %v22116_v29  ;;  %v3376_v30 = vsel %vm19829_vm13, 1.0, %v22116_v29 }
 0x24a   : > { %v2494_v35 = vpop.f32.mrf.mxu0 }
 0x24c   : > { %v16950_v19 = vpop.f32.mrf.mxu0 }
 0x252   : > { %v2597_v36 = vpop.f32.mrf.mxu1 }
 0x253   : > { %v2598_v2 = vadd.f32 %v2597_v36, %v2494_v35  ;;  %v2990_v36 = vand.u32 4294901760, %v2989_v24 }
 0x254   : > { %v16969_v31 = vpop.f32.mrf.mxu1 }
 0x25b   : > { %v2677_v61 = vpop.f32.mrf.mxu0 }
 0x25c   : > { %v2678_v17 = vadd.f32 %v2677_v61, %v2598_v2 }
 0x25d   : > { %v16988_v33 = vpop.f32.mrf.mxu0 }
 0x25e   : > { %v22162_v33 = vmov 0 }
 0x25f   : > { %v22163_v33 = vsel %vm19745_vm0, 4294967295, %v22162_v33 }
 0x260   : > { %22164 = vst [vmem:[#allocation50_spill] sm:$0xff] %v22163_v33 }
 0x264   : > { %v2750_v20 = vpop.f32.mrf.mxu1 }
 0x265   : > { %v2751_v18 = vadd.f32 %v2750_v20, %v2678_v17  ;;  %v3383_v20 = vsel %vm19745_vm0, 1.0, %v22116_v29  ;;  %v22173_v17 = vmov 0 }
 0x266   : > { %v17007_v13 = vpop.f32.mrf.mxu1  ;;  %v22174_v17 = vsel %vm19772_vm5, 4294967295, %v22173_v17 }
 0x267   : > { %v22169_v13 = vmov 0  ;;  %22175 = vst [vmem:[#allocation53_spill] sm:$0xff] %v22174_v17 }
 0x268   : > { %v22170_v13 = vsel %vm19759_vm10, 4294967295, %v22169_v13 }
 0x269   : > { %22171 = vst [vmem:[#allocation52_spill] sm:$0xff] %v22170_v13 }
 0x26d   : > { %v2837_v37 = vpop.f32.mrf.mxu0 }
 0x26e   : > { %v2838_v38 = vadd.f32 %v2837_v37, %v2751_v18  ;;  %v3382_v37 = vsel %vm19751_vm11, 1.0, %v22116_v29  ;;  %v3381_v18 = vsel %vm19759_vm10, 1.0, %v22116_v29 }
 0x26f   : > { %v17026_v25 = vpop.f32.mrf.mxu0  ;;  %v19780_v24 = vsub.f32 %v3382_v37, %v3382_v37  ;;  %v3379_v37 = vsel %vm19787_vm2, 1.0, %v22116_v29 }
 0x270   : > { %v19769_v25 = vsub.f32 %v3383_v20, %v3383_v20 }
 0x275   : > { %v2908_v53 = vpop.f32.mrf.mxu1 }
 0x276   : > { %v2909_v19 = vadd.f32 %v2908_v53, %v2838_v38  ;;  %v3380_v53 = vsel %vm19772_vm5, 1.0, %v22116_v29 }
 0x277   : > { %v17045_v31 = vpop.f32.mrf.mxu1  ;;  %v19802_v20 = vsub.f32 %v3380_v53, %v3380_v53  ;;  %v3378_v53 = vsel %vm19798_vm3, 1.0, %v22116_v29 }
 0x278   : > { %v2918_v35 = vsel %vm22165_vm12, %v2909_v19, 0  ;;  %vm22172_vm12 = vmmov 0   ;;  %v22176_v19 = vmov 0  ;;  %v19847_v47 = vsub.f32 %v3378_v53, %v3378_v53 }
 0x279   : > { %v2951_v61 = vand.u32 4294901760, %v2918_v35  ;;  %v22177_v19 = vsel %vm19787_vm2, 4294967295, %v22176_v19 }
 0x27a   : > { %22178 = vst [vmem:[#allocation54_spill] sm:$0xff] %v22177_v19  ;;  %22187 = vst [vmem:[#allocation56_spill] sm:$0xff] %v19847_v47  ;;  %v19876_v52 = vand.u32 4294901760, %v19847_v47 }
 0x27b   : > { %v3028_v45 = vsub.f32 %v2918_v35, %v2951_v61  ;;  %17047 = vmatpush3.msra.mxu0 %v2951_v61  ;;  %v19793_v35 = vsub.f32 %v3381_v18, %v3381_v18 }
 0x27c   : > { %17049 = vmatmul.mubr.f32.vlgmr.msra.gmra.mxu0 %v2990_v36  ;;  %17056 = vmatprep.subr.mxu0 %v22116_v29  ;;  %v21996_v36 = vand.u32 4294901760, %v19769_v25  ;;  %22192 = vst [vmem:[#allocation59_spill] sm:$0xff] %v19876_v52 }
 0x27d   : > { %17057 = vmatpush3.msra.mxu0 %v3028_v45  ;;  %17058 = vmatprep.mubr.msk.f32.mxu0 %vm22172_vm12, %v22116_v29  ;;  %v3029_v2 = vand.u32 4294901760, %v3028_v45  ;;  %v22188_v12 = vand.u32 4294901760, %v19793_v35 }
 0x27e   : > { %17066 = vmatprep.subr.mxu0 %v22116_v29  ;;  %v3478_v18 = vsub.f32 %v19769_v25, %v21996_v36  ;;  %v22186_v36 = vand.u32 4294901760, %v19780_v24 }
 0x27f   : > { %v3030_v38 = vsub.f32 %v3028_v45, %v3029_v2  ;;  %v19833_v45 = vsub.f32 %v3379_v37, %v3379_v37 }
 0x280   : > { %17059 = vmatmul.mubr.f32.vlgmr.msra.gmra.mxu0 %v19739_v56  ;;  %v22179_v56 = vmov 0  ;;  %v3479_v37 = vand.u32 4294901760, %v3478_v18  ;;  %v22191_v18 = vand.u32 4294901760, %v19802_v20 }
 0x281   : > { %17067 = vmatpush3.msra.mxu0 %v3029_v2  ;;  %v3031_v31 = vand.u32 4294901760, %v3030_v38  ;;  %17068 = vmatprep.mubr.msk.f32.mxu0 %vm22172_vm12, %v22116_v29  ;;  %v22180_v56 = vsel %vm19798_vm3, 4294967295, %v22179_v56  ;;  %v22182_v2 = vmov 0  ;;  %v3484_v38 = vsub.f32 %v19780_v24, %v22186_v36 }
 0x282   : > { %17076 = vmatprep.subr.mxu0 %v22116_v29  ;;  %22181 = vst [vmem:[#allocation55_spill] sm:$0xff] %v22180_v56  ;;  %v22183_v2 = vsel %vm19811_vm4, 4294967295, %v22182_v2  ;;  %v3490_v36 = vsub.f32 %v19793_v35, %v22188_v12  ;;  %v3496_v53 = vsub.f32 %v19802_v20, %v22191_v18 }
 0x283   : > { %17052 = vmatpush3.msra.mxu1 %v3031_v31  ;;  %v22184_v31 = vmov 0  ;;  %v3485_v12 = vand.u32 4294901760, %v3484_v38 }
 0x284   : > { %17054 = vmatmul.mubr.f32.vlgmr.msra.gmra.mxu1 %v19736_v11  ;;  %17061 = vmatprep.subr.mxu1 %v22116_v29  ;;  %v22185_v31 = vsel %vm19829_vm13, 4294967295, %v22184_v31  ;;  %v3491_v26 = vand.u32 4294901760, %v3490_v36 }
 0x285   : > { %17069 = vmatmul.mubr.f32.vlgmr.msra.gmra.mxu0 %v19736_v11  ;;  %17062 = vmatpush3.msra.mxu1 %v2951_v61 }
 0x286   : > { %17077 = vmatpush3.msk.msra.mxu0 %vm19745_vm0, %v22138_v63  ;;  %17063 = vmatprep.mubr.msk.f32.mxu1 %vm22172_vm12, %v22116_v29 }
 0x287   : > { %17078 = vmatprep.subr.mxu0 %v22116_v29  ;;  %17071 = vmatprep.subr.mxu1 %v22116_v29 }
 0x288   : > { %17079 = vmatpush3.msk.msra.mxu0 %vm19751_vm11, %v22138_v63  ;;  %17064 = vmatmul.mubr.f32.vlgmr.msra.gmra.mxu1 %v2988_v58  ;;  %v19862_v58 = vand.u32 4294901760, %v19833_v45 }
 0x289   : > { %17080 = vmatprep.subr.mxu0 %v22116_v29  ;;  %17072 = vmatpush3.msra.mxu1 %v2951_v61  ;;  %v19864_v61 = vsub.f32 %v3377_v4, %v3377_v4  ;;  %v19878_v4 = vsub.f32 %v3376_v30, %v3376_v30  ;;  %v3497_v30 = vand.u32 4294901760, %v3496_v53 }
 0x28a   : > { %17081 = vmatpush3.msk.msra.mxu0 %vm19759_vm10, %v22138_v63  ;;  %17073 = vmatprep.mubr.msk.f32.mxu1 %vm22172_vm12, %v22116_v29  ;;  %22189 = vst [vmem:[#allocation57_spill] sm:$0xff] %v19862_v58  ;;  %v3502_v38 = vsub.f32 %v19833_v45, %v19862_v58 }
 0x28b   : > { %22190 = vst [vmem:[#allocation58_spill] sm:$0xff] %v19864_v61  ;;  %17082 = vmatprep.subr.mxu0 %v22116_v29  ;;  %17095 = vmatprep.subr.mxu1 %v22116_v29  ;;  %22193 = vst [vmem:[#allocation60_spill] sm:$0xff] %v19878_v4  ;;  %v19898_v36 = vand.u32 4294901760, %v19878_v4 }
 0x28c   : > { %17083 = vmatpush3.msk.msra.mxu0 %vm19772_vm5, %v22138_v63  ;;  %17074 = vmatmul.mubr.f32.vlgmr.msra.gmra.mxu1 %v19736_v11  ;;  %v19888_v11 = vand.u32 4294901760, %v19864_v61 }
 0x28d   : > { %17084 = vmatprep.subr.mxu0 %v22116_v29  ;;  %17096 = vmatpush3.msra.mxu1 %v3479_v37  ;;  %v3508_v37 = vsub.f32 %v19847_v47, %v19876_v52  ;;  %22195 = vst [vmem:[#allocation62_spill] sm:$0xff] %v19898_v36  ;;  %v3520_v53 = vsub.f32 %v19878_v4, %v19898_v36 }
 0x28e   : > { %17085 = vmatpush3.msk.msra.mxu0 %vm19787_vm2, %v22138_v63  ;;  %17097 = vmatprep.subr.mxu1 %v22116_v29  ;;  %22194 = vst [vmem:[#allocation61_spill] sm:$0xff] %v19888_v11  ;;  %v3514_v18 = vsub.f32 %v19864_v61, %v19888_v11 }
 0x28f   : > { %17086 = vmatprep.subr.mxu0 %v22116_v29  ;;  %17098 = vmatpush3.msra.mxu1 %v3485_v12  ;;  %v19905_v12 = vand.u32 4294901760, %v3502_v38 }
 0x290   : > { %17087 = vmatpush3.msk.msra.mxu0 %vm19798_vm3, %v22138_v63  ;;  %17099 = vmatprep.subr.mxu1 %v22116_v29  ;;  %v19923_v38 = vand.u32 4294901760, %v3514_v18  ;;  %v22200_v18 = vand.u32 4294901760, %v19780_v24 }
 0x291   : > { %17088 = vmatprep.subr.mxu0 %v22116_v29  ;;  %17100 = vmatpush3.msra.mxu1 %v3491_v26  ;;  %v19915_v26 = vand.u32 4294901760, %v3508_v37  ;;  %v22199_v37 = vand.u32 4294901760, %v19769_v25 }
 0x292   : > { %17089 = vmatpush3.msk.msra.mxu0 %vm19811_vm4, %v22138_v63  ;;  %17101 = vmatprep.subr.mxu1 %v22116_v29  ;;  %22197 = vst [vmem:[#allocation64_spill] sm:$0xff] %v19923_v38 }
 0x293   : > { %17090 = vmatprep.subr.mxu0 %v22116_v29  ;;  %17102 = vmatpush3.msra.mxu1 %v3497_v30  ;;  %22196 = vst [vmem:[#allocation63_spill] sm:$0xff] %v19915_v26  ;;  %v19929_v30 = vand.u32 4294901760, %v3520_v53 }
 0x294   : > { %17091 = vmatpush3.msk.msra.mxu0 %vm19829_vm13, %v22138_v63  ;;  %17092 = vmatprep.mubr.msk.f32.mxu0 %vm22172_vm12, %v22116_v29 }
 0x295   : > { %17103 = vmatprep.subr.mxu1 %v22116_v29  ;;  %17114 = vmatprep.subr.mxu0 %v22116_v29  ;;  %22198 = vst [vmem:[#allocation65_spill] sm:$0xff] %v19929_v30 }
 0x296   : > { %17093 = vmatmul.mubr.f32.vlgmr.msra.gmra.mxu0 %v18905_v57  ;;  %17104 = vmatpush3.msra.mxu1 %v19905_v12 }
 0x297   : > { %17115 = vmatpush3.msra.mxu0 %v19769_v25  ;;  %17105 = vmatprep.subr.mxu1 %v22116_v29  ;;  %v22201_v25 = vand.u32 4294901760, %v19793_v35 }
 0x298   : > { %17116 = vmatprep.subr.mxu0 %v22116_v29  ;;  %17106 = vmatpush3.msra.mxu1 %v19915_v26 }
 0x299   : > { %17117 = vmatpush3.msra.mxu0 %v19780_v24  ;;  %17107 = vmatprep.subr.mxu1 %v22116_v29  ;;  %v22202_v24 = vand.u32 4294901760, %v19802_v20 }
 0x29a   : > { %17118 = vmatprep.subr.mxu0 %v22116_v29  ;;  %17108 = vmatpush3.msra.mxu1 %v19923_v38 }
 0x29b   : > { %17119 = vmatpush3.msra.mxu0 %v19793_v35  ;;  %17109 = vmatprep.subr.mxu1 %v22116_v29 }
 0x29c   : > { %17120 = vmatprep.subr.mxu0 %v22116_v29  ;;  %17110 = vmatpush3.msra.mxu1 %v19929_v30 }
 0x29d   : > { %17111 = vmatprep.mubr.msk.f32.mxu1 %vm22172_vm12, %v22116_v29  ;;  %17121 = vmatpush3.msra.mxu0 %v19802_v20 }
 0x29e   : > { %17112 = vmatmul.mubr.f32.vlgmr.msra.gmra.mxu1 %v18760_v16  ;;  %17122 = vmatprep.subr.mxu0 %v22116_v29 }
 0x29f   : > { %17133 = vmatprep.subr.mxu1 %v22116_v29  ;;  %17123 = vmatpush3.msra.mxu0 %v19833_v45 }
 0x2a0   : > { %17134 = vmatpush3.msk.msra.mxu1 %vm19745_vm0, %v22138_v63  ;;  %17124 = vmatprep.subr.mxu0 %v22116_v29 }
 0x2a1   : > { %17135 = vmatprep.subr.mxu1 %v22116_v29  ;;  %17125 = vmatpush3.msra.mxu0 %v19847_v47 }
 0x2a2   : > { %17136 = vmatpush3.msk.msra.mxu1 %vm19751_vm11, %v22138_v63  ;;  %17126 = vmatprep.subr.mxu0 %v22116_v29 }
 0x2a3   : > { %17137 = vmatprep.subr.mxu1 %v22116_v29  ;;  %17127 = vmatpush3.msra.mxu0 %v19864_v61 }
 0x2a4   : > { %17138 = vmatpush3.msk.msra.mxu1 %vm19759_vm10, %v22138_v63  ;;  %17128 = vmatprep.subr.mxu0 %v22116_v29 }
 0x2a5   : > { %17139 = vmatprep.subr.mxu1 %v22116_v29  ;;  %17129 = vmatpush3.msra.mxu0 %v19878_v4 }
 0x2a6   : > { %17130 = vmatprep.mubr.msk.f32.mxu0 %vm22172_vm12, %v22116_v29  ;;  %17140 = vmatpush3.msk.msra.mxu1 %vm19772_vm5, %v22138_v63 }
 0x2a7   : > { %17131 = vmatmul.mubr.f32.vlgmr.msra.gmra.mxu0 %v18826_v32  ;;  %17141 = vmatprep.subr.mxu1 %v22116_v29 }
 0x2a8   : > { %17152 = vmatprep.subr.mxu0 %v22116_v29  ;;  %17142 = vmatpush3.msk.msra.mxu1 %vm19787_vm2, %v22138_v63 }
 0x2a9   : > { %17153 = vmatpush3.msra.mxu0 %v22199_v37  ;;  %17143 = vmatprep.subr.mxu1 %v22116_v29 }
 0x2aa   : > { %17154 = vmatprep.subr.mxu0 %v22116_v29  ;;  %17144 = vmatpush3.msk.msra.mxu1 %vm19798_vm3, %v22138_v63 }
 0x2ab   : > { %17155 = vmatpush3.msra.mxu0 %v22200_v18  ;;  %17145 = vmatprep.subr.mxu1 %v22116_v29 }
 0x2ac   : > { %17156 = vmatprep.subr.mxu0 %v22116_v29  ;;  %17146 = vmatpush3.msk.msra.mxu1 %vm19811_vm4, %v22138_v63 }
 0x2ad   : > { %17157 = vmatpush3.msra.mxu0 %v22201_v25  ;;  %17147 = vmatprep.subr.mxu1 %v22116_v29 }
 0x2ae   : > { %17158 = vmatprep.subr.mxu0 %v22116_v29  ;;  %17148 = vmatpush3.msk.msra.mxu1 %vm19829_vm13, %v22138_v63 }
 0x2af   : > { %17149 = vmatprep.mubr.msk.f32.mxu1 %vm22172_vm12, %v22116_v29  ;;  %17159 = vmatpush3.msra.mxu0 %v22202_v24 }
 0x2b0   : > { %17150 = vmatmul.mubr.f32.vlgmr.msra.gmra.mxu1 %v18856_v40  ;;  %17160 = vmatprep.subr.mxu0 %v22116_v29 }
 0x2b1   : > { %17171 = vmatprep.subr.mxu1 %v22116_v29  ;;  %17161 = vmatpush3.msra.mxu0 %v19862_v58 }
 0x2b2   : > { %17172 = vmatpush3.msk.msra.mxu1 %vm19745_vm0, %v22138_v63  ;;  %17162 = vmatprep.subr.mxu0 %v22116_v29 }
 0x2b3   : > { %17173 = vmatprep.subr.mxu1 %v22116_v29  ;;  %17163 = vmatpush3.msra.mxu0 %v19876_v52 }
 0x2b4   : > { %17174 = vmatpush3.msk.msra.mxu1 %vm19751_vm11, %v22138_v63  ;;  %17164 = vmatprep.subr.mxu0 %v22116_v29 }
 0x2b5   : > { %17175 = vmatprep.subr.mxu1 %v22116_v29  ;;  %17165 = vmatpush3.msra.mxu0 %v19888_v11 }
 0x2b6   : > { %17176 = vmatpush3.msk.msra.mxu1 %vm19759_vm10, %v22138_v63  ;;  %17166 = vmatprep.subr.mxu0 %v22116_v29  ;;  %vm22204_vm10 = vcmask 1040384  }
 0x2b7   : > { %17177 = vmatprep.subr.mxu1 %v22116_v29  ;;  %17167 = vmatpush3.msra.mxu0 %v19898_v36 }
 0x2b8   : > { %17168 = vmatprep.mubr.msk.f32.mxu0 %vm22172_vm12, %v22116_v29  ;;  %17178 = vmatpush3.msk.msra.mxu1 %vm19772_vm5, %v22138_v63  ;;  %vm22203_vm5 = vcmask 7168  }
 0x2b9   : > { %17169 = vmatmul.mubr.f32.vlgmr.msra.gmra.mxu0 %v18760_v16  ;;  %17179 = vmatprep.subr.mxu1 %v22116_v29 }
 0x2ba   : > { %17180 = vmatpush3.msk.msra.mxu1 %vm19787_vm2, %v22138_v63  ;;  %17187 = vmatprep.mubr.msk.f32.mxu1 %vm22172_vm12, %v22116_v29 }
 0x2bb   : > { %17181 = vmatprep.subr.mxu1 %v22116_v29  ;;  %17190 = vmatprep.subr.mxu0 %v22116_v29 }
 0x2bc   : > { %17182 = vmatpush3.msk.msra.mxu1 %vm19798_vm3, %v22138_v63  ;;  %17192 = vmatprep.mubr.msk.f32.mxu0 %vm22172_vm12, %v22116_v29 }
 0x2bd   : > { %17183 = vmatprep.subr.mxu1 %v22116_v29 }
 0x2be   : > { %17184 = vmatpush3.msk.msra.mxu1 %vm19811_vm4, %v22138_v63 }
 0x2bf   : > { %17185 = vmatprep.subr.mxu1 %v22116_v29 }
 0x2c0   : > { %17186 = vmatpush3.msk.msra.mxu1 %vm19829_vm13, %v22138_v63 }
 0x2c1   : > { %17188 = vmatmul.mubr.f32.vlgmr.msra.gmra.mxu1 %v18760_v16  ;;  %17195 = vmatprep.subr.mxu1 %v22116_v29 }
 0x2c2   : > { %17197 = vmatprep.mubr.msk.f32.mxu1 %vm22172_vm12, %v22116_v29 }
 0x33c   : > { %v2992_v35 = vpop.f32.mrf.mxu0 }
 0x33e   : > { %v17050_v20 = vpop.f32.mrf.mxu0 }
 0x340   : > { %v3142_v53 = vpop.f32.mrf.mxu0 }
 0x342   : > { %v17060_v37 = vpop.f32.mrf.mxu0 }
 0x344   : > { %v3068_v18 = vpop.f32.mrf.mxu1 }
 0x345   : > { %v3069_v25 = vadd.f32 %v3068_v18, %v2992_v35  ;;  %v3290_v24 = vpop.f32.mrf.mxu0  ;;  %v20067_v18 = vadd.s32 2, %v18734_v6 }
 0x346   : > { %v17055_v17 = vpop.f32.mrf.mxu1 }
 0x347   : > { %v3143_v13 = vadd.f32 %v3142_v53, %v3069_v25  ;;  %v17070_v46 = vpop.f32.mrf.mxu0  ;;  %vm22031_vm11 = vcmp.eq.s32.totalorder %v18737_v7, %v20067_v18  ;;  %vm22033_vm0 = vcmp.eq.s32.totalorder %v18740_v8, %v20067_v18  ;;  %vm20152_vm13 = vcmp.eq.s32.totalorder %v18724_v3, %v20067_v18 }
 0x348   : > { %v3216_v33 = vpop.f32.mrf.mxu1  ;;  %v15730_v46 = vld [vmem:[%s22115_s1 + $0xc] sm:$0xf]  ;;  %vm22214_vm4 = vcmp.eq.s32.totalorder %v18740_v8, %v20067_v18 }
 0x349   : > { %v3217_v36 = vadd.f32 %v3216_v33, %v3143_v13  ;;  %v3876_v33 = vsel %vm22203_vm5, %v15730_v46, 0  ;;  %vm22036_vm5 = vcmp.eq.s32.totalorder %v18732_v5, %v20067_v18 }
 0x34a   : > { %v17065_v11 = vpop.f32.mrf.mxu1  ;;  %v4344_v6 = vsel %vm22036_vm5, 1.0, %v22116_v29 }
 0x34b   : > { %v3291_v52 = vadd.f32 %v3290_v24, %v3217_v36  ;;  %v20060_v11 = vand.u32 4294901760, %v3876_v33 }
 0x34c   : > { %v3362_v58 = vpop.f32.mrf.mxu1 }
 0x34d   : > { %v3363_v4 = vadd.f32 %v3362_v58, %v3291_v52  ;;  %v20063_v52 = vsub.f32 %v3876_v33, %v20060_v11 }
 0x34e   : > { %v17075_v30 = vpop.f32.mrf.mxu1 }
 0x34f   : > { %v20054_v38 = vadd.f32 %v3363_v4, %v19730_v23  ;;  %v3949_v30 = vand.u32 4294901760, %v20063_v52 }
 0x351   : > { %v3950_v24 = vsub.f32 %v20063_v52, %v3949_v30 }
 0x356   : > { %v3455_v61 = vpop.f32.mrf.mxu0 }
 0x358   : > { %v17094_v20 = vpop.f32.mrf.mxu0 }
 0x35e   : > { %v3558_v26 = vpop.f32.mrf.mxu1 }
 0x35f   : > { %v3559_v58 = vadd.f32 %v3558_v26, %v3455_v61  ;;  %v3951_v61 = vand.u32 4294901760, %v3950_v24 }
 0x360   : > { %v17113_v37 = vpop.f32.mrf.mxu1 }
 0x367   : > { %v3638_v47 = vpop.f32.mrf.mxu0 }
 0x368   : > { %v3639_v36 = vadd.f32 %v3638_v47, %v3559_v58 }
 0x369   : > { %v17132_v35 = vpop.f32.mrf.mxu0 }
 0x370   : > { %v3711_v17 = vpop.f32.mrf.mxu1 }
 0x371   : > { %v3712_v53 = vadd.f32 %v3711_v17, %v3639_v36  ;;  %v4343_v17 = vsel %vm22031_vm11, 1.0, %v22116_v29  ;;  %vm20106_vm11 = vcmp.eq.s32.totalorder %v18749_v10, %v20067_v18 }
 0x372   : > { %v17151_v13 = vpop.f32.mrf.mxu1 }
 0x373   : > { %v20088_v13 = vsub.f32 %v4344_v6, %v4344_v6 }
 0x379   : > { %v3798_v23 = vpop.f32.mrf.mxu0 }
 0x37a   : > { %v3799_v25 = vadd.f32 %v3798_v23, %v3712_v53  ;;  %v4342_v23 = vsel %vm22033_vm0, 1.0, %v22116_v29  ;;  %vm20132_vm0 = vcmp.eq.s32.totalorder %v18758_v15, %v20067_v18  ;;  %v22211_v15 = vmov 0 }
 0x37b   : > { %v17170_v4 = vpop.f32.mrf.mxu0  ;;  %v20112_v24 = vsub.f32 %v4342_v23, %v4342_v23  ;;  %v22212_v15 = vsel %vm20152_vm13, 4294967295, %v22211_v15  ;;  %v4338_v23 = vsel %vm20132_vm0, 1.0, %v22116_v29 }
 0x37c   : > { %v20097_v4 = vsub.f32 %v4343_v17, %v4343_v17 }
 0x381   : > { %v3869_v20 = vpop.f32.mrf.mxu1 }
 0x382   : > { %v3870_v37 = vadd.f32 %v3869_v20, %v3799_v25 }
 0x383   : > { %v17189_v35 = vpop.f32.mrf.mxu1 }
 0x384   : > { %v3879_v46 = vsel %vm22204_vm10, %v3870_v37, 0  ;;  %vm22032_vm10 = vcmp.eq.s32.totalorder %v18746_v9, %v20067_v18  ;;  %v22041_v37 = vand.u32 4294901760, %v20097_v4  ;;  %v4340_v35 = vsel %vm20106_vm11, 1.0, %v22116_v29 }
 0x385   : > { %v3912_v26 = vand.u32 4294901760, %v3879_v46  ;;  %v4341_v36 = vsel %vm22032_vm10, 1.0, %v22116_v29  ;;  %vm20118_vm10 = vcmp.eq.s32.totalorder %v18755_v14, %v20067_v18  ;;  %v9895_v14 = vld [vmem:[%s22302_s6] sm:$0xff] }
 0x386   : > { %v20122_v10 = vsub.f32 %v4341_v36, %v4341_v36  ;;  %v4339_v6 = vsel %vm20118_vm10, 1.0, %v22116_v29  ;;  %v4445_v17 = vsub.f32 %v20097_v4, %v22041_v37 }
 0x387   : > { %v3989_v47 = vsub.f32 %v3879_v46, %v3912_v26  ;;  %17191 = vmatpush3.msra.mxu0 %v3912_v26 }
 0x388   : > { %17193 = vmatmul.mubr.f32.vlgmr.msra.gmra.mxu0 %v3951_v61  ;;  %17200 = vmatprep.subr.mxu0 %v22116_v29  ;;  %v22039_v61 = vand.u32 4294901760, %v20112_v24 }
 0x389   : > { %17201 = vmatpush3.msra.mxu0 %v3989_v47  ;;  %17202 = vmatprep.mubr.msk.f32.mxu0 %vm22172_vm12, %v22116_v29  ;;  %v3990_v33 = vand.u32 4294901760, %v3989_v47 }
 0x38a   : > { %17210 = vmatprep.subr.mxu0 %v22116_v29 }
 0x38b   : > { %v3991_v58 = vsub.f32 %v3989_v47, %v3990_v33  ;;  %v20156_v47 = vsub.f32 %v4340_v35, %v4340_v35  ;;  %v4337_v35 = vsel %vm20152_vm13, 1.0, %v22116_v29 }
 0x38c   : > { %17203 = vmatmul.mubr.f32.vlgmr.msra.gmra.mxu0 %v20063_v52  ;;  %v4438_v52 = vand.u32 4294901760, %v20088_v13 }
 0x38d   : > { %17211 = vmatpush3.msra.mxu0 %v3990_v33  ;;  %v3992_v25 = vand.u32 4294901760, %v3991_v58  ;;  %17212 = vmatprep.mubr.msk.f32.mxu0 %vm22172_vm12, %v22116_v29  ;;  %v22040_v33 = vand.u32 4294901760, %v20122_v10  ;;  %v20171_v58 = vsub.f32 %v4339_v6, %v4339_v6 }
 0x38e   : > { %17220 = vmatprep.subr.mxu0 %v22116_v29  ;;  %v4439_v46 = vsub.f32 %v20088_v13, %v4438_v52 }
 0x38f   : > { %17196 = vmatpush3.msra.mxu1 %v3992_v25  ;;  %v4451_v25 = vsub.f32 %v20112_v24, %v22039_v61  ;;  %v4457_v6 = vsub.f32 %v20122_v10, %v22040_v33  ;;  %v20202_v61 = vand.u32 4294901760, %v20171_v58 }
 0x390   : > { %17198 = vmatmul.mubr.f32.vlgmr.msra.gmra.mxu1 %v20060_v11  ;;  %17205 = vmatprep.subr.mxu1 %v22116_v29  ;;  %v4440_v36 = vand.u32 4294901760, %v4439_v46  ;;  %v4446_v46 = vand.u32 4294901760, %v4445_v17 }
 0x391   : > { %17213 = vmatmul.mubr.f32.vlgmr.msra.gmra.mxu0 %v20060_v11  ;;  %17206 = vmatpush3.msra.mxu1 %v3912_v26  ;;  %22217 = vst [vmem:[#allocation67_spill] sm:$0xff] %v20202_v61  ;;  %v4452_v17 = vand.u32 4294901760, %v4451_v25 }
 0x392   : > { %17221 = vmatpush3.msk.msra.mxu0 %vm22036_vm5, %v22138_v63  ;;  %17207 = vmatprep.mubr.msk.f32.mxu1 %vm22172_vm12, %v22116_v29  ;;  %vm22213_vm5 = vcmp.eq.s32.totalorder %v18737_v7, %v20067_v18 }
 0x393   : > { %17222 = vmatprep.subr.mxu0 %v22116_v29  ;;  %17215 = vmatprep.subr.mxu1 %v22116_v29 }
 0x394   : > { %17223 = vmatpush3.msk.msra.mxu0 %vm22213_vm5, %v22138_v63  ;;  %17208 = vmatmul.mubr.f32.vlgmr.msra.gmra.mxu1 %v3949_v30  ;;  %v20187_v30 = vand.u32 4294901760, %v20156_v47  ;;  %vm22222_vm5 = vcmp.eq.s32.totalorder %v18732_v5, %v20067_v18 }
 0x395   : > { %17224 = vmatprep.subr.mxu0 %v22116_v29  ;;  %17216 = vmatpush3.msra.mxu1 %v3912_v26  ;;  %v20189_v26 = vsub.f32 %v4338_v23, %v4338_v23  ;;  %v20204_v23 = vsub.f32 %v4337_v35, %v4337_v35  ;;  %v4458_v35 = vand.u32 4294901760, %v4457_v6 }
 0x396   : > { %17225 = vmatpush3.msk.msra.mxu0 %vm22214_vm4, %v22138_v63  ;;  %17217 = vmatprep.mubr.msk.f32.mxu1 %vm22172_vm12, %v22116_v29  ;;  %22215 = vst [vmem:[#allocation66_spill] sm:$0xff] %v20187_v30  ;;  %vm22216_vm4 = vcmp.eq.s32.totalorder %v18746_v9, %v20067_v18  ;;  %v4463_v33 = vsub.f32 %v20156_v47, %v20187_v30 }
 0x397   : > { %17226 = vmatprep.subr.mxu0 %v22116_v29  ;;  %17239 = vmatprep.subr.mxu1 %v22116_v29  ;;  %22218 = vst [vmem:[#allocation68_spill] sm:$0xff] %v20204_v23  ;;  %v20224_v25 = vand.u32 4294901760, %v20204_v23 }
 0x398   : > { %17227 = vmatpush3.msk.msra.mxu0 %vm22216_vm4, %v22138_v63  ;;  %17218 = vmatmul.mubr.f32.vlgmr.msra.gmra.mxu1 %v20060_v11  ;;  %v20214_v11 = vand.u32 4294901760, %v20189_v26  ;;  %vm22223_vm4 = vcmp.eq.s32.totalorder %v18737_v7, %v20067_v18 }
 0x399   : > { %17228 = vmatprep.subr.mxu0 %v22116_v29  ;;  %17240 = vmatpush3.msra.mxu1 %v4440_v36  ;;  %v4469_v36 = vsub.f32 %v20171_v58, %v20202_v61  ;;  %22220 = vst [vmem:[#allocation70_spill] sm:$0xff] %v20224_v25  ;;  %v4481_v37 = vsub.f32 %v20204_v23, %v20224_v25 }
 0x39a   : > { %17229 = vmatpush3.msk.msra.mxu0 %vm20106_vm11, %v22138_v63  ;;  %17241 = vmatprep.subr.mxu1 %v22116_v29  ;;  %22219 = vst [vmem:[#allocation69_spill] sm:$0xff] %v20214_v11  ;;  %v4475_v6 = vsub.f32 %v20189_v26, %v20214_v11 }
 0x39b   : > { %17230 = vmatprep.subr.mxu0 %v22116_v29  ;;  %17242 = vmatpush3.msra.mxu1 %v4446_v46  ;;  %v20231_v46 = vand.u32 4294901760, %v4463_v33 }
 0x39c   : > { %17231 = vmatpush3.msk.msra.mxu0 %vm20118_vm10, %v22138_v63  ;;  %17243 = vmatprep.subr.mxu1 %v22116_v29  ;;  %v20249_v33 = vand.u32 4294901760, %v4475_v6 }
 0x39d   : > { %17232 = vmatprep.subr.mxu0 %v22116_v29  ;;  %17244 = vmatpush3.msra.mxu1 %v4452_v17  ;;  %v20241_v17 = vand.u32 4294901760, %v4469_v36 }
 0x39e   : > { %17233 = vmatpush3.msk.msra.mxu0 %vm20132_vm0, %v22138_v63  ;;  %17245 = vmatprep.subr.mxu1 %v22116_v29 }
 0x39f   : > { %17234 = vmatprep.subr.mxu0 %v22116_v29  ;;  %17246 = vmatpush3.msra.mxu1 %v4458_v35  ;;  %v20255_v35 = vand.u32 4294901760, %v4481_v37  ;;  %v22226_v37 = vand.u32 4294901760, %v20097_v4 }
 0x3a0   : > { %17235 = vmatpush3.msk.msra.mxu0 %vm20152_vm13, %v22138_v63  ;;  %17236 = vmatprep.mubr.msk.f32.mxu0 %vm22172_vm12, %v22116_v29 }
 0x3a1   : > { %17247 = vmatprep.subr.mxu1 %v22116_v29  ;;  %17258 = vmatprep.subr.mxu0 %v22116_v29  ;;  %22221 = vst [vmem:[#allocation71_spill] sm:$0xff] %v20255_v35 }
 0x3a2   : > { %17237 = vmatmul.mubr.f32.vlgmr.msra.gmra.mxu0 %v18905_v57  ;;  %17248 = vmatpush3.msra.mxu1 %v20231_v46 }
 0x3a3   : > { %17259 = vmatpush3.msra.mxu0 %v20088_v13  ;;  %17249 = vmatprep.subr.mxu1 %v22116_v29  ;;  %v22227_v13 = vand.u32 4294901760, %v20112_v24 }
 0x3a4   : > { %17260 = vmatprep.subr.mxu0 %v22116_v29  ;;  %17250 = vmatpush3.msra.mxu1 %v20241_v17 }
 0x3a5   : > { %17261 = vmatpush3.msra.mxu0 %v20097_v4  ;;  %17251 = vmatprep.subr.mxu1 %v22116_v29  ;;  %v22228_v4 = vand.u32 4294901760, %v20122_v10 }
 0x3a6   : > { %17262 = vmatprep.subr.mxu0 %v22116_v29  ;;  %17252 = vmatpush3.msra.mxu1 %v20249_v33 }
 0x3a7   : > { %17263 = vmatpush3.msra.mxu0 %v20112_v24  ;;  %17253 = vmatprep.subr.mxu1 %v22116_v29 }
 0x3a8   : > { %17264 = vmatprep.subr.mxu0 %v22116_v29  ;;  %17254 = vmatpush3.msra.mxu1 %v20255_v35 }
 0x3a9   : > { %17255 = vmatprep.mubr.msk.f32.mxu1 %vm22172_vm12, %v22116_v29  ;;  %17265 = vmatpush3.msra.mxu0 %v20122_v10 }
 0x3aa   : > { %17256 = vmatmul.mubr.f32.vlgmr.msra.gmra.mxu1 %v18760_v16  ;;  %17266 = vmatprep.subr.mxu0 %v22116_v29 }
 0x3ab   : > { %17277 = vmatprep.subr.mxu1 %v22116_v29  ;;  %17267 = vmatpush3.msra.mxu0 %v20156_v47 }
 0x3ac   : > { %17278 = vmatpush3.msk.msra.mxu1 %vm22222_vm5, %v22138_v63  ;;  %17268 = vmatprep.subr.mxu0 %v22116_v29  ;;  %vm22224_vm5 = vcmp.eq.s32.totalorder %v18740_v8, %v20067_v18 }
 0x3ad   : > { %17279 = vmatprep.subr.mxu1 %v22116_v29  ;;  %17269 = vmatpush3.msra.mxu0 %v20171_v58 }
 0x3ae   : > { %17280 = vmatpush3.msk.msra.mxu1 %vm22223_vm4, %v22138_v63  ;;  %17270 = vmatprep.subr.mxu0 %v22116_v29  ;;  %vm22225_vm4 = vcmp.eq.s32.totalorder %v18746_v9, %v20067_v18 }
 0x3af   : > { %17281 = vmatprep.subr.mxu1 %v22116_v29  ;;  %17271 = vmatpush3.msra.mxu0 %v20189_v26 }
 0x3b0   : > { %17282 = vmatpush3.msk.msra.mxu1 %vm22224_vm5, %v22138_v63  ;;  %17272 = vmatprep.subr.mxu0 %v22116_v29  ;;  %vm22229_vm5 = vcmp.eq.s32.totalorder %v18732_v5, %v20067_v18  ;;  %v469_v5 = vld [vmem:[%s22233_s2] sm:$0xf]  ;;  %s18414_s2 = scalar_lea.vmem %s15417_s0, 128 }
 0x3b1   : > { %17283 = vmatprep.subr.mxu1 %v22116_v29  ;;  %17273 = vmatpush3.msra.mxu0 %v20204_v23  ;;  %p18415_p11 = scmp.ne.s32.totalorder %s15417_s0, %s18414_s2 }
 0x3b2   : > { %17274 = vmatprep.mubr.msk.f32.mxu0 %vm22172_vm12, %v22116_v29  ;;  %17284 = vmatpush3.msk.msra.mxu1 %vm22225_vm4, %v22138_v63  ;;  %vm22230_vm4 = vcmp.eq.s32.totalorder %v18737_v7, %v20067_v18  ;;  %v18591_v7 = vmov 0  }
 0x3b3   : > { %17275 = vmatmul.mubr.f32.vlgmr.msra.gmra.mxu0 %v18826_v32  ;;  %17285 = vmatprep.subr.mxu1 %v22116_v29  ;;  %p18416_p12 = pnand %p18415_p11, %p18711_p5 }
 0x3b4   : > { %17296 = vmatprep.subr.mxu0 %v22116_v29  ;;  %17286 = vmatpush3.msk.msra.mxu1 %vm20106_vm11, %v22138_v63 }
 0x3b5   : > { %17297 = vmatpush3.msra.mxu0 %v4438_v52  ;;  %17287 = vmatprep.subr.mxu1 %v22116_v29  ;;  %p18417_p13 = pneg %p18416_p12 }
 0x3b6   : > { %17298 = vmatprep.subr.mxu0 %v22116_v29  ;;  %17288 = vmatpush3.msk.msra.mxu1 %vm20118_vm10, %v22138_v63 }
 0x3b7   : > { %17299 = vmatpush3.msra.mxu0 %v22226_v37  ;;  %17289 = vmatprep.subr.mxu1 %v22116_v29 }
 0x3b8   : > { %17300 = vmatprep.subr.mxu0 %v22116_v29  ;;  %17290 = vmatpush3.msk.msra.mxu1 %vm20132_vm0, %v22138_v63 }
 0x3b9   : > { %17301 = vmatpush3.msra.mxu0 %v22227_v13  ;;  %17291 = vmatprep.subr.mxu1 %v22116_v29 }
 0x3ba   : > { %17302 = vmatprep.subr.mxu0 %v22116_v29  ;;  %17292 = vmatpush3.msk.msra.mxu1 %vm20152_vm13, %v22138_v63 }
 0x3bb   : > { %17293 = vmatprep.mubr.msk.f32.mxu1 %vm22172_vm12, %v22116_v29  ;;  %17303 = vmatpush3.msra.mxu0 %v22228_v4 }
 0x3bc   : > { %17294 = vmatmul.mubr.f32.vlgmr.msra.gmra.mxu1 %v18856_v40  ;;  %17304 = vmatprep.subr.mxu0 %v22116_v29 }
 0x3bd   : > { %17315 = vmatprep.subr.mxu1 %v22116_v29  ;;  %17305 = vmatpush3.msra.mxu0 %v20187_v30 }
 0x3be   : > { %17316 = vmatpush3.msk.msra.mxu1 %vm22229_vm5, %v22138_v63  ;;  %17306 = vmatprep.subr.mxu0 %v22116_v29  ;;  %vm22231_vm5 = vcmp.eq.s32.totalorder %v18740_v8, %v20067_v18  ;;  %v5300_v8 = vld [vmem:[%s22234_s4] sm:$0xff] }
 0x3bf   : > { %17317 = vmatprep.subr.mxu1 %v22116_v29  ;;  %17307 = vmatpush3.msra.mxu0 %v20202_v61 }
 0x3c0   : > { %17318 = vmatpush3.msk.msra.mxu1 %vm22230_vm4, %v22138_v63  ;;  %17308 = vmatprep.subr.mxu0 %v22116_v29  ;;  %vm22232_vm4 = vcmp.eq.s32.totalorder %v18746_v9, %v20067_v18 }
 0x3c1   : > { %17319 = vmatprep.subr.mxu1 %v22116_v29  ;;  %17309 = vmatpush3.msra.mxu0 %v20214_v11 }
 0x3c2   : > { %17320 = vmatpush3.msk.msra.mxu1 %vm22231_vm5, %v22138_v63  ;;  %17310 = vmatprep.subr.mxu0 %v22116_v29  ;;  %vm22235_vm5 = vcmask 7168  }
 0x3c3   : > { %17321 = vmatprep.subr.mxu1 %v22116_v29  ;;  %17311 = vmatpush3.msra.mxu0 %v20224_v25 }
 0x3c4   : > { %17312 = vmatprep.mubr.msk.f32.mxu0 %vm22172_vm12, %v22116_v29  ;;  %17322 = vmatpush3.msk.msra.mxu1 %vm22232_vm4, %v22138_v63  ;;  %vm22236_vm4 = vcmask 1040384  }
 0x3c5   : > { %17313 = vmatmul.mubr.f32.vlgmr.msra.gmra.mxu0 %v18760_v16  ;;  %17323 = vmatprep.subr.mxu1 %v22116_v29 }
 0x3c6   : > { %17324 = vmatpush3.msk.msra.mxu1 %vm20106_vm11, %v22138_v63  ;;  %17331 = vmatprep.mubr.msk.f32.mxu1 %vm22172_vm12, %v22116_v29 }
 0x3c7   : > { %17325 = vmatprep.subr.mxu1 %v22116_v29  ;;  %17334 = vmatprep.subr.mxu0 %v22116_v29 }
 0x3c8   : > { %17326 = vmatpush3.msk.msra.mxu1 %vm20118_vm10, %v22138_v63  ;;  %17336 = vmatprep.mubr.msk.f32.mxu0 %vm22172_vm12, %v22116_v29 }
 0x3c9   : > { %17327 = vmatprep.subr.mxu1 %v22116_v29  ;;  %18412 = vset.pattern.permute.xlu0 %v18591_v7 }
 0x3ca   : > { %17328 = vmatpush3.msk.msra.mxu1 %vm20132_vm0, %v22138_v63  ;;  %18413 = vset.pattern.permute.xlu1 %v18591_v7 }
 0x3cb   : > { %17329 = vmatprep.subr.mxu1 %v22116_v29  ;;  %5291 = vperm.xlu0 %18412, %v469_v5  }
 0x3cc   : > { %17330 = vmatpush3.msk.msra.mxu1 %vm20152_vm13, %v22138_v63  ;;  %vm5301_vm13 = vcmask 261120   ;;  %14394 = vperm.xlu1 %18413, %v9895_v14  }
 0x3cd   : > { %17332 = vmatmul.mubr.f32.vlgmr.msra.gmra.mxu1 %v18760_v16  ;;  %17339 = vmatprep.subr.mxu1 %v22116_v29 }
 0x3ce   : > { %17341 = vmatprep.mubr.msk.f32.mxu1 %vm22172_vm12, %v22116_v29 }
 0x3cf   : > { %9886 = vperm.xlu0 %18412, %v5300_v8  }
 0x448   : > { %v3953_v9 = vpop.f32.mrf.mxu0 }
 0x44a   : > { %v17194_v18 = vpop.f32.mrf.mxu0 }
 0x44c   : > { %v4103_v24 = vpop.f32.mrf.mxu0 }
 0x44e   : > { %v17204_v52 = vpop.f32.mrf.mxu0 }
 0x450   : > { %v4029_v10 = vpop.f32.mrf.mxu1 }
 0x451   : > { %v4030_v36 = vadd.f32 %v4029_v10, %v3953_v9  ;;  %v4251_v6 = vpop.f32.mrf.mxu0 }
 0x452   : > { %v17199_v37 = vpop.f32.mrf.mxu1 }
 0x453   : > { %v4104_v13 = vadd.f32 %v4103_v24, %v4030_v36  ;;  %v17214_v4 = vpop.f32.mrf.mxu0  ;;  %v15755_v24 = vld [vmem:[%s22115_s1 + $0x10] sm:$0xf]  ;;  %s21792_s1 = scalar_lea.sflag [#allocation6], %s22069_s22 }
 0x454   : > { %v4177_v3 = vpop.f32.mrf.mxu1 }
 0x455   : > { %v4178_v40 = vadd.f32 %v4177_v3, %v4104_v13  ;;  %v4837_v3 = vsel %vm22235_vm5, %v15755_v24, 0  ;;  %vm5295_vm5 = vcmask 257024  }
 0x456   : > { %v17209_v32 = vpop.f32.mrf.mxu1 }
 0x457   : > { %v4252_v7 = vadd.f32 %v4251_v6, %v4178_v40  ;;  %v4908_v40 = vand.u32 4294901760, %v4837_v3 }
 0x458   : > { %v4323_v5 = vpop.f32.mrf.mxu1 }
 0x459   : > { %v4324_v16 = vadd.f32 %v4323_v5, %v4252_v7  ;;  %v4909_v36 = vsub.f32 %v4837_v3, %v4908_v40 }
 0x45a   : > { %v17219_v57 = vpop.f32.mrf.mxu1 }
 0x45b   : > { %v20394_v25 = vadd.f32 %v4324_v16, %v20054_v38  ;;  %v4910_v37 = vand.u32 4294901760, %v4909_v36 }
 0x45d   : > { %v4911_v7 = vsub.f32 %v4909_v36, %v4910_v37 }
 0x45f   : > { %v4912_v30 = vand.u32 4294901760, %v4911_v7  ;;  %v5292_v7 = vpop.permute.xlu0 %5291 }
 0x462   : > { %v4416_v8 = vpop.f32.mrf.mxu0 }
 0x464   : > { %v17238_v18 = vpop.f32.mrf.mxu0 }
 0x46a   : > { %v4519_v11 = vpop.f32.mrf.mxu1 }
 0x46b   : > { %v4520_v6 = vadd.f32 %v4519_v11, %v4416_v8 }
 0x46c   : > { %v17257_v52 = vpop.f32.mrf.mxu1 }
 0x473   : > { %v4599_v61 = vpop.f32.mrf.mxu0 }
 0x474   : > { %v4600_v38 = vadd.f32 %v4599_v61, %v4520_v6 }
 0x475   : > { %v17276_v9 = vpop.f32.mrf.mxu0 }
 0x47c   : > { %v4672_v10 = vpop.f32.mrf.mxu1 }
 0x47d   : > { %v4673_v13 = vadd.f32 %v4672_v10, %v4600_v38 }
 0x47e   : > { %v17295_v32 = vpop.f32.mrf.mxu1 }
 0x485   : > { %v4759_v57 = vpop.f32.mrf.mxu0 }
 0x486   : > { %v4760_v4 = vadd.f32 %v4759_v57, %v4673_v13 }
 0x487   : > { %v17314_v16 = vpop.f32.mrf.mxu0 }
 0x48d   : > { %v4830_v5 = vpop.f32.mrf.mxu1 }
 0x48e   : > { %v4831_v18 = vadd.f32 %v4830_v5, %v4760_v4 }
 0x48f   : > { %v17333_v52 = vpop.f32.mrf.mxu1 }
 0x490   : > { %v4840_v9 = vsel %vm22236_vm4, %v4831_v18, 0 }
 0x491   : > { %v4873_v23 = vand.u32 4294901760, %v4840_v9 }
 0x493   : > { %v4950_v35 = vsub.f32 %v4840_v9, %v4873_v23  ;;  %17335 = vmatpush3.msra.mxu0 %v4873_v23 }
 0x494   : > { %17337 = vmatmul.mubr.f32.vlgmr.msra.gmra.mxu0 %v4912_v30  ;;  %17344 = vmatprep.subr.mxu0 %v22116_v29 }
 0x495   : > { %17345 = vmatpush3.msra.mxu0 %v4950_v35  ;;  %17346 = vmatprep.mubr.msk.f32.mxu0 %vm22172_vm12, %v22116_v29  ;;  %v4951_v61 = vand.u32 4294901760, %v4950_v35 }
 0x496   : > { %17354 = vmatprep.subr.mxu0 %v22116_v29 }
 0x497   : > { %v4952_v11 = vsub.f32 %v4950_v35, %v4951_v61 }
 0x498   : > { %17347 = vmatmul.mubr.f32.vlgmr.msra.gmra.mxu0 %v4909_v36 }
 0x499   : > { %17355 = vmatpush3.msra.mxu0 %v4951_v61  ;;  %v4953_v8 = vand.u32 4294901760, %v4952_v11  ;;  %17356 = vmatprep.mubr.msk.f32.mxu0 %vm22172_vm12, %v22116_v29 }
 0x49a   : > { %17364 = vmatprep.subr.mxu0 %v22116_v29 }
 0x49b   : > { %17340 = vmatpush3.msra.mxu1 %v4953_v8 }
 0x49c   : > { %17342 = vmatmul.mubr.f32.vlgmr.msra.gmra.mxu1 %v4908_v40  ;;  %17349 = vmatprep.subr.mxu1 %v22116_v29 }
 0x49d   : > { %17350 = vmatpush3.msra.mxu1 %v4873_v23  ;;  %17351 = vmatprep.mubr.msk.f32.mxu1 %vm22172_vm12, %v22116_v29 }
 0x49e   : > { %17359 = vmatprep.subr.mxu1 %v22116_v29  ;;  %17357 = vmatmul.mubr.f32.vlgmr.msra.gmra.mxu0 %v4908_v40 }
 0x49f   : > { %17365 = vmatpush3.msk.msra.mxu0 %vm18788_vm6, %v22138_v63  ;;  %17372 = vmatprep.mubr.msk.f32.mxu0 %vm22172_vm12, %v22116_v29 }
 0x4a0   : > { %17352 = vmatmul.mubr.f32.vlgmr.msra.gmra.mxu1 %v4910_v37  ;;  %17366 = vmatprep.subr.mxu0 %v22116_v29 }
 0x4a1   : > { %17360 = vmatpush3.msra.mxu1 %v4873_v23  ;;  %17361 = vmatprep.mubr.msk.f32.mxu1 %vm22172_vm12, %v22116_v29 }
 0x4a2   : > { %17375 = vmatprep.subr.mxu1 %v22116_v29  ;;  %17367 = vmatpush3.msk.msra.mxu0 %vm18811_vm7, %v22138_v63 }
 0x4a3   : > { %17368 = vmatprep.subr.mxu0 %v22116_v29 }
 0x4a4   : > { %17362 = vmatmul.mubr.f32.vlgmr.msra.gmra.mxu1 %v4908_v40  ;;  %17369 = vmatpush3.msk.msra.mxu0 %vm18817_vm8, %v22138_v63 }
 0x4a5   : > { %17376 = vmatpush3.msra.mxu1 %v18917_v60  ;;  %17383 = vmatprep.mubr.msk.f32.mxu1 %vm22172_vm12, %v22116_v29 }
 0x4a6   : > { %17377 = vmatprep.subr.mxu1 %v22116_v29  ;;  %17370 = vmatprep.subr.mxu0 %v22116_v29 }
 0x4a7   : > { %17378 = vmatpush3.msra.mxu1 %v18924_v62  ;;  %17371 = vmatpush3.msk.msra.mxu0 %vm18851_vm9, %v22138_v63 }
 0x4a8   : > { %17379 = vmatprep.subr.mxu1 %v22116_v29  ;;  %17386 = vmatprep.subr.mxu0 %v22116_v29 }
 0x4a9   : > { %17380 = vmatpush3.msra.mxu1 %v18932_v0 }
 0x4aa   : > { %17381 = vmatprep.subr.mxu1 %v22116_v29 }
 0x4ab   : > { %17382 = vmatpush3.msra.mxu1 %v18938_v1 }
 0x4ac   : > { %17397 = vmatprep.subr.mxu1 %v22116_v29 }
 0x554   : > { %v4914_v60 = vpop.f32.mrf.mxu0 }
 0x556   : > { %v17338_v30 = vpop.f32.mrf.mxu0 }
 0x557   : > { %v22247_v30 = vld [vmem:[#allocation28_spill] sm:$0xff] }
 0x558   : > { %v5064_v62 = vpop.f32.mrf.mxu0 }
 0x55a   : > { %v17348_v23 = vpop.f32.mrf.mxu0 }
 0x55c   : > { %v4990_v35 = vpop.f32.mrf.mxu1 }
 0x55d   : > { %v4991_v24 = vadd.f32 %v4990_v35, %v4914_v60 }
 0x55e   : > { %v17343_v10 = vpop.f32.mrf.mxu1  ;;  %v5212_v3 = vpop.f32.mrf.mxu0 }
 0x55f   : > { %v5065_v32 = vadd.f32 %v5064_v62, %v4991_v24  ;;  %v22248_v62 = vld [vmem:[#allocation29_spill] sm:$0xff] }
 0x560   : > { %v5138_v40 = vpop.f32.mrf.mxu1  ;;  %v17358_v36 = vpop.f32.mrf.mxu0 }
 0x561   : > { %v5139_v57 = vadd.f32 %v5138_v40, %v5065_v32 }
 0x562   : > { %v17353_v6 = vpop.f32.mrf.mxu1 }
 0x563   : > { %v5213_v16 = vadd.f32 %v5212_v3, %v5139_v57 }
 0x564   : > { %v5284_v38 = vpop.f32.mrf.mxu1 }
 0x565   : > { %v5285_v37 = vadd.f32 %v5284_v38, %v5213_v16 }
 0x566   : > { %v17363_v13 = vpop.f32.mrf.mxu1 }
 0x567   : > { %v5288_v4 = vadd.f32 %v5285_v37, %v20394_v25 }
 0x569   : > { %v5294_v5 = vadd.f32 %v5292_v7, %v5288_v4 }
 0x56b   : > { %vm5297_vm4 = vcmp.gt.f32.partialorder %v5294_v5, 0.0  ;;  %v5298_v18 = vmul.f32 0.2, %v5294_v5  ;;  %5296 = vst.msk [vmem:[%s20448_s25] sm:$0xf] %vm5295_vm5, %v5294_v5 }
 0x56d   : > { %v5299_v52 = vsel %vm5297_vm4, %v5294_v5, %v5298_v18  ;;  %v15780_v18 = vld [vmem:[%s22249_s3 + $0x8] sm:$0xff] }
 0x56e   : > { %v5303_v9 = vsel %vm5301_vm13, %v5299_v52, 0 }
 0x56f   : > { %v20451_v61 = vand.u32 4294901760, %v5303_v9 }
 0x571   : > { %v20454_v11 = vsub.f32 %v5303_v9, %v20451_v61  ;;  %17384 = vmatmul.mubr.f32.vlgmr.msra.gmra.mxu1 %v20451_v61 }
 0x572   : > { %17398 = vmatpush3.msk.msra.mxu1 %vm18788_vm6, %v22138_v63  ;;  %17405 = vmatprep.mubr.msk.f32.mxu1 %vm22172_vm12, %v22116_v29 }
 0x573   : > { %17399 = vmatprep.subr.mxu1 %v22116_v29  ;;  %v20464_v25 = vand.u32 4294901760, %v20454_v11 }
 0x574   : > { %17400 = vmatpush3.msk.msra.mxu1 %vm18811_vm7, %v22138_v63 }
 0x575   : > { %17401 = vmatprep.subr.mxu1 %v22116_v29  ;;  %v5373_v8 = vsub.f32 %v20454_v11, %v20464_v25 }
 0x576   : > { %17402 = vmatpush3.msk.msra.mxu1 %vm18817_vm8, %v22138_v63 }
 0x577   : > { %17403 = vmatprep.subr.mxu1 %v22116_v29  ;;  %v20476_v60 = vand.u32 4294901760, %v5373_v8 }
 0x578   : > { %17404 = vmatpush3.msk.msra.mxu1 %vm18851_vm9, %v22138_v63 }
 0x579   : > { %17406 = vmatmul.mubr.f32.vlgmr.msra.gmra.mxu1 %v20464_v25  ;;  %17419 = vmatprep.subr.mxu1 %v22116_v29 }
 0x57a   : > { %17373 = vmatmul.mubr.f32.vlgmr.msra.gmra.mxu0 %v20476_v60  ;;  %17420 = vmatpush3.msk.msra.mxu1 %vm18788_vm6, %v22138_v63 }
 0x57b   : > { %17387 = vmatpush3.msra.mxu0 %v18865_v42  ;;  %17421 = vmatprep.subr.mxu1 %v22116_v29  ;;  %v22239_v42 = vld [vmem:[#allocation21_spill] sm:$0xff] }
 0x57c   : > { %17388 = vmatprep.subr.mxu0 %v22116_v29  ;;  %17422 = vmatpush3.msk.msra.mxu1 %vm18811_vm7, %v22138_v63  ;;  %vm22240_vm6 = vnez %v22239_v42  ;;  %vm22063_vm7 = vcmask 31744  }
 0x57d   : > { %17389 = vmatpush3.msra.mxu0 %v18867_v43  ;;  %17423 = vmatprep.subr.mxu1 %v22116_v29  ;;  %v22241_v43 = vld [vmem:[#allocation22_spill] sm:$0xff]  ;;  %v6232_v9 = vsel %vm22063_vm7, %v15780_v18, 0 }
 0x57e   : > { %17390 = vmatprep.subr.mxu0 %v22116_v29  ;;  %17424 = vmatpush3.msk.msra.mxu1 %vm18817_vm8, %v22138_v63  ;;  %v20623_v21 = vand.u32 4294901760, %v6232_v9 }
 0x57f   : > { %17391 = vmatpush3.msra.mxu0 %v18869_v44  ;;  %17425 = vmatprep.subr.mxu1 %v22116_v29 }
 0x580   : > { %17392 = vmatprep.subr.mxu0 %v22116_v29  ;;  %17394 = vmatprep.mubr.msk.f32.mxu0 %vm22172_vm12, %v22116_v29 }
 0x581   : > { %17393 = vmatpush3.msra.mxu0 %v18900_v55  ;;  %17426 = vmatpush3.msk.msra.mxu1 %vm18851_vm9, %v22138_v63 }
 0x582   : > { %17427 = vmatprep.mubr.msk.f32.mxu1 %vm22172_vm12, %v22116_v29  ;;  %17395 = vmatmul.mubr.f32.vlgmr.msra.gmra.mxu0 %v20454_v11 }
 0x583   : > { %17408 = vmatprep.subr.mxu0 %v22116_v29  ;;  %17428 = vmatmul.mubr.f32.vlgmr.msra.gmra.mxu1 %v20451_v61 }
 0x584   : > { %17441 = vmatprep.subr.mxu1 %v22116_v29  ;;  %17409 = vmatpush3.msra.mxu0 %v18881_v49  ;;  %v22242_v49 = vld [vmem:[#allocation23_spill] sm:$0xff] }
 0x585   : > { %17442 = vmatpush3.msra.mxu1 %v19210_v34  ;;  %17410 = vmatprep.subr.mxu0 %v22116_v29  ;;  %v22245_v34 = vld [vmem:[#allocation24_spill] sm:$0xff] }
 0x586   : > { %17443 = vmatprep.subr.mxu1 %v22116_v29  ;;  %17411 = vmatpush3.msra.mxu0 %v18884_v50  ;;  %v22243_v50 = vld [vmem:[#allocation25_spill] sm:$0xff] }
 0x587   : > { %17444 = vmatpush3.msra.mxu1 %v19218_v41  ;;  %17412 = vmatprep.subr.mxu0 %v22116_v29  ;;  %v22246_v41 = vld [vmem:[#allocation26_spill] sm:$0xff] }
 0x588   : > { %17445 = vmatprep.subr.mxu1 %v22116_v29  ;;  %17413 = vmatpush3.msra.mxu0 %v18896_v54 }
 0x589   : > { %17446 = vmatpush3.msra.mxu1 %v19226_v48  ;;  %17414 = vmatprep.subr.mxu0 %v22116_v29 }
 0x58a   : > { %17447 = vmatprep.subr.mxu1 %v22116_v29  ;;  %17415 = vmatpush3.msra.mxu0 %v18912_v59 }
 0x58b   : > { %17416 = vmatprep.mubr.msk.f32.mxu0 %vm22172_vm12, %v22116_v29  ;;  %17448 = vmatpush3.msra.mxu1 %v19232_v51 }
 0x58c   : > { %17449 = vmatprep.mubr.msk.f32.mxu1 %vm22172_vm12, %v22116_v29  ;;  %17417 = vmatmul.mubr.f32.vlgmr.msra.gmra.mxu0 %v20451_v61 }
 0x58d   : > { %17430 = vmatprep.subr.mxu0 %v22116_v29  ;;  %17450 = vmatmul.mubr.f32.vlgmr.msra.gmra.mxu1 %v20451_v61 }
 0x58e   : > { %17463 = vmatprep.subr.mxu1 %v22116_v29  ;;  %17431 = vmatpush3.msk.msra.mxu0 %vm19062_vm14, %v22138_v63 }
 0x58f   : > { %17464 = vmatpush3.msk.msra.mxu1 %vm19062_vm14, %v22138_v63  ;;  %17432 = vmatprep.subr.mxu0 %v22116_v29 }
 0x590   : > { %17465 = vmatprep.subr.mxu1 %v22116_v29  ;;  %17433 = vmatpush3.msk.msra.mxu0 %vm19083_vm15, %v22138_v63 }
 0x591   : > { %17466 = vmatpush3.msk.msra.mxu1 %vm19083_vm15, %v22138_v63  ;;  %17434 = vmatprep.subr.mxu0 %v22116_v29 }
 0x592   : > { %17467 = vmatprep.subr.mxu1 %v22116_v29  ;;  %17435 = vmatpush3.msk.msra.mxu0 %vm19104_vm1, %v22138_v63 }
 0x593   : > { %17468 = vmatpush3.msk.msra.mxu1 %vm19104_vm1, %v22138_v63  ;;  %17436 = vmatprep.subr.mxu0 %v22116_v29 }
 0x594   : > { %17469 = vmatprep.subr.mxu1 %v22116_v29  ;;  %17437 = vmatpush3.msk.msra.mxu0 %vm22240_vm6, %v22138_v63 }
 0x595   : > { %17438 = vmatprep.mubr.msk.f32.mxu0 %vm22172_vm12, %v22116_v29  ;;  %17470 = vmatpush3.msk.msra.mxu1 %vm22240_vm6, %v22138_v63 }
 0x596   : > { %17471 = vmatprep.mubr.msk.f32.mxu1 %vm22172_vm12, %v22116_v29  ;;  %17439 = vmatmul.mubr.f32.vlgmr.msra.gmra.mxu0 %v20476_v60 }
 0x597   : > { %17452 = vmatprep.subr.mxu0 %v22116_v29  ;;  %17472 = vmatmul.mubr.f32.vlgmr.msra.gmra.mxu1 %v20464_v25 }
 0x598   : > { %17485 = vmatprep.subr.mxu1 %v22116_v29  ;;  %17453 = vmatpush3.msra.mxu0 %v22241_v43 }
 0x599   : > { %17486 = vmatpush3.msk.msra.mxu1 %vm19062_vm14, %v22138_v63  ;;  %17454 = vmatprep.subr.mxu0 %v22116_v29  ;;  %vm22062_vm14 = vcmask 1043456  }
 0x59a   : > { %17487 = vmatprep.subr.mxu1 %v22116_v29  ;;  %17455 = vmatpush3.msra.mxu0 %v22242_v49 }
 0x59b   : > { %17488 = vmatpush3.msk.msra.mxu1 %vm19083_vm15, %v22138_v63  ;;  %17456 = vmatprep.subr.mxu0 %v22116_v29 }
 0x59c   : > { %17489 = vmatprep.subr.mxu1 %v22116_v29  ;;  %17457 = vmatpush3.msra.mxu0 %v22243_v50 }
 0x59d   : > { %17490 = vmatpush3.msk.msra.mxu1 %vm19104_vm1, %v22138_v63  ;;  %17458 = vmatprep.subr.mxu0 %v22116_v29 }
 0x59e   : > { %17491 = vmatprep.subr.mxu1 %v22116_v29  ;;  %17459 = vmatpush3.msra.mxu0 %v22244_v22 }
 0x59f   : > { %17460 = vmatprep.mubr.msk.f32.mxu0 %vm22172_vm12, %v22116_v29  ;;  %17492 = vmatpush3.msk.msra.mxu1 %vm22240_vm6, %v22138_v63 }
 0x5a0   : > { %17493 = vmatprep.mubr.msk.f32.mxu1 %vm22172_vm12, %v22116_v29  ;;  %17461 = vmatmul.mubr.f32.vlgmr.msra.gmra.mxu0 %v20454_v11 }
 0x5a1   : > { %17474 = vmatprep.subr.mxu0 %v22116_v29  ;;  %17494 = vmatmul.mubr.f32.vlgmr.msra.gmra.mxu1 %v20451_v61 }
 0x5a2   : > { %17475 = vmatpush3.msra.mxu0 %v22245_v34  ;;  %17482 = vmatprep.mubr.msk.f32.mxu0 %vm22172_vm12, %v22116_v29 }
 0x5a3   : > { %17476 = vmatprep.subr.mxu0 %v22116_v29  ;;  %17501 = vmatprep.subr.mxu1 %v22116_v29 }
 0x5a4   : > { %17477 = vmatpush3.msra.mxu0 %v22246_v41  ;;  %17503 = vmatprep.mubr.msk.f32.mxu1 %vm22172_vm12, %v22116_v29 }
 0x5a5   : > { %17478 = vmatprep.subr.mxu0 %v22116_v29 }
 0x5a6   : > { %17479 = vmatpush3.msra.mxu0 %v22247_v30 }
 0x5a7   : > { %17480 = vmatprep.subr.mxu0 %v22116_v29 }
 0x5a8   : > { %17481 = vmatpush3.msra.mxu0 %v22248_v62 }
 0x5a9   : > { %17483 = vmatmul.mubr.f32.vlgmr.msra.gmra.mxu0 %v20451_v61  ;;  %17496 = vmatprep.subr.mxu0 %v22116_v29 }
 0x5aa   : > { %17498 = vmatprep.mubr.msk.f32.mxu0 %vm22172_vm12, %v22116_v29 }
 0x631   : > { %v5463_v23 = vpop.f32.mrf.mxu1 }
 0x633   : > { %v17385_v35 = vpop.f32.mrf.mxu1 }
 0x639   : > { %v5612_v24 = vpop.f32.mrf.mxu1 }
 0x63a   : > { %v5376_v10 = vpop.f32.mrf.mxu0 }
 0x63b   : > { %v17407_v3 = vpop.f32.mrf.mxu1  ;;  %v5464_v8 = vadd.f32 %v5463_v23, %v5376_v10 }
 0x63c   : > { %v17374_v32 = vpop.f32.mrf.mxu0  ;;  %v6305_v3 = vsub.f32 %v6232_v9, %v20623_v21 }
 0x642   : > { %v5539_v40 = vpop.f32.mrf.mxu0 }
 0x643   : > { %v5762_v36 = vpop.f32.mrf.mxu1  ;;  %v5540_v43 = vadd.f32 %v5539_v40, %v5464_v8 }
 0x644   : > { %v17396_v57 = vpop.f32.mrf.mxu0 }
 0x645   : > { %v17429_v6 = vpop.f32.mrf.mxu1  ;;  %v5613_v57 = vadd.f32 %v5612_v24, %v5540_v43 }
 0x64c   : > { %v5691_v16 = vpop.f32.mrf.mxu0 }
 0x64d   : > { %v5925_v38 = vpop.f32.mrf.mxu1 }
 0x64e   : > { %v17418_v37 = vpop.f32.mrf.mxu0 }
 0x64f   : > { %v17451_v13 = vpop.f32.mrf.mxu1  ;;  %v5766_v37 = vld [vmem:[%s22249_s3] sm:$0xff] }
 0x650   : > { %v5692_v13 = vadd.f32 %v5691_v16, %v5613_v57  ;;  %v6685_v23 = vsel %vm22063_vm7, %v5766_v37, 0 }
 0x652   : > { %v5763_v40 = vadd.f32 %v5762_v36, %v5692_v13 }
 0x654   : > { %v6688_v24 = vsel %vm22062_vm14, %v5763_v40, 0  ;;  %v22256_v40 = vld [vmem:[#allocation37_spill] sm:$0xff] }
 0x655   : > { %vm22257_vm4 = vnez %v22256_v40 }
 0x656   : > { %v5838_v4 = vpop.f32.mrf.mxu0 }
 0x657   : > { %v6074_v7 = vpop.f32.mrf.mxu1  ;;  %v5926_v41 = vadd.f32 %v5925_v38, %v5838_v4  ;;  %v20630_v4 = vand.u32 4294901760, %v6685_v23 }
 0x658   : > { %v17440_v5 = vpop.f32.mrf.mxu0 }
 0x659   : > { %v17473_v52 = vpop.f32.mrf.mxu1  ;;  %v6306_v5 = vand.u32 4294901760, %v6305_v3  ;;  %v6757_v16 = vsub.f32 %v6685_v23, %v20630_v4 }
 0x65b   : > { %v6307_v8 = vsub.f32 %v6305_v3, %v6306_v5 }
 0x660   : > { %v6001_v49 = vpop.f32.mrf.mxu0 }
 0x661   : > { %v6224_v34 = vpop.f32.mrf.mxu1  ;;  %v6002_v6 = vadd.f32 %v6001_v49, %v5926_v41  ;;  %v6308_v49 = vand.u32 4294901760, %v6307_v8  ;;  %v22259_v8 = vld [vmem:[#allocation46_spill] sm:$0xff] }
 0x662   : > { %v17462_v35 = vpop.f32.mrf.mxu0 }
 0x663   : > { %v17495_v32 = vpop.f32.mrf.mxu1  ;;  %v6075_v18 = vadd.f32 %v6074_v7, %v6002_v6  ;;  %v6721_v7 = vand.u32 4294901760, %v6688_v24 }
 0x665   : > { %v6798_v32 = vsub.f32 %v6688_v24, %v6721_v7  ;;  %v22262_v24 = vld [vmem:[#allocation41_spill] sm:$0xff] }
 0x667   : > { %v6799_v13 = vand.u32 4294901760, %v6798_v32 }
 0x669   : > { %v6153_v10 = vpop.f32.mrf.mxu0 }
 0x66a   : > { %v6154_v52 = vadd.f32 %v6153_v10, %v6075_v18  ;;  %v22254_v10 = vld [vmem:[#allocation36_spill] sm:$0xff] }
 0x66b   : > { %v17484_v38 = vpop.f32.mrf.mxu0  ;;  %vm22255_vm5 = vnez %v22254_v10 }
 0x66c   : > { %v6225_v9 = vadd.f32 %v6224_v34, %v6154_v52  ;;  %v6758_v34 = vand.u32 4294901760, %v6757_v16  ;;  %v22258_v52 = vld [vmem:[#allocation38_spill] sm:$0xff]  ;;  %v22260_v38 = vld [vmem:[#allocation39_spill] sm:$0xff] }
 0x66e   : > { %v6236_v43 = vsel %vm22062_vm14, %v6225_v9, 0  ;;  %v6759_v37 = vsub.f32 %v6757_v16, %v6758_v34  ;;  %v22261_v9 = vld [vmem:[#allocation47_spill] sm:$0xff] }
 0x66f   : > { %v6269_v41 = vand.u32 4294901760, %v6236_v43 }
 0x670   : > { %v6760_v18 = vand.u32 4294901760, %v6759_v37 }
 0x671   : > { %v6346_v35 = vsub.f32 %v6236_v43, %v6269_v41  ;;  %17497 = vmatpush3.msra.mxu0 %v6269_v41  ;;  %v22263_v43 = vld [vmem:[#allocation48_spill] sm:$0xff] }
 0x672   : > { %17499 = vmatmul.mubr.f32.vlgmr.msra.gmra.mxu0 %v6308_v49  ;;  %17506 = vmatprep.subr.mxu0 %v22116_v29  ;;  %v22265_v49 = vld [vmem:[#allocation43_spill] sm:$0xff] }
 0x673   : > { %17507 = vmatpush3.msra.mxu0 %v6346_v35  ;;  %17508 = vmatprep.mubr.msk.f32.mxu0 %vm22172_vm12, %v22116_v29  ;;  %v6347_v36 = vand.u32 4294901760, %v6346_v35 }
 0x674   : > { %17516 = vmatprep.subr.mxu0 %v22116_v29 }
 0x675   : > { %v6348_v57 = vsub.f32 %v6346_v35, %v6347_v36  ;;  %v22269_v35 = vld [vmem:[#allocation45_spill] sm:$0xff] }
 0x676   : > { %17509 = vmatmul.mubr.f32.vlgmr.msra.gmra.mxu0 %v6305_v3  ;;  %v6800_v3 = vsub.f32 %v6798_v32, %v6799_v13 }
 0x677   : > { %17517 = vmatpush3.msra.mxu0 %v6347_v36  ;;  %v6349_v6 = vand.u32 4294901760, %v6348_v57  ;;  %17518 = vmatprep.mubr.msk.f32.mxu0 %vm22172_vm12, %v22116_v29 }
 0x678   : > { %17526 = vmatprep.subr.mxu0 %v22116_v29  ;;  %v6801_v23 = vand.u32 4294901760, %v6800_v3 }
 0x679   : > { %17502 = vmatpush3.msra.mxu1 %v6349_v6 }
 0x67a   : > { %17504 = vmatmul.mubr.f32.vlgmr.msra.gmra.mxu1 %v20623_v21  ;;  %17511 = vmatprep.subr.mxu1 %v22116_v29 }
 0x67b   : > { %17519 = vmatmul.mubr.f32.vlgmr.msra.gmra.mxu0 %v20623_v21  ;;  %17512 = vmatpush3.msra.mxu1 %v6269_v41 }
 0x67c   : > { %17527 = vmatpush3.msra.mxu0 %v6721_v7  ;;  %17513 = vmatprep.mubr.msk.f32.mxu1 %vm22172_vm12, %v22116_v29 }
 0x67d   : > { %17521 = vmatprep.subr.mxu1 %v22116_v29  ;;  %17528 = vmatprep.mubr.msk.f32.mxu0 %vm22172_vm12, %v22116_v29 }
 0x67e   : > { %17536 = vmatprep.subr.mxu0 %v22116_v29  ;;  %17514 = vmatmul.mubr.f32.vlgmr.msra.gmra.mxu1 %v6306_v5  ;;  %v22252_v5 = vld [vmem:[#allocation35_spill] sm:$0xff] }
 0x67f   : > { %17522 = vmatpush3.msra.mxu1 %v6269_v41  ;;  %17529 = vmatmul.mubr.f32.vlgmr.msra.gmra.mxu0 %v6760_v18  ;;  %vm22253_vm13 = vnez %v22252_v5  ;;  %v22266_v41 = vld [vmem:[#allocation40_spill] sm:$0xff] }
 0x680   : > { %17537 = vmatpush3.msra.mxu0 %v6798_v32  ;;  %17523 = vmatprep.mubr.msk.f32.mxu1 %vm22172_vm12, %v22116_v29 }
 0x681   : > { %17531 = vmatprep.subr.mxu1 %v22116_v29  ;;  %17538 = vmatprep.mubr.msk.f32.mxu0 %vm22172_vm12, %v22116_v29 }
 0x682   : > { %17546 = vmatprep.subr.mxu0 %v22116_v29  ;;  %17524 = vmatmul.mubr.f32.vlgmr.msra.gmra.mxu1 %v20623_v21  ;;  %v22250_v21 = vld [vmem:[#allocation34_spill] sm:$0xff] }
 0x683   : > { %17532 = vmatpush3.msra.mxu1 %v6801_v23  ;;  %17539 = vmatmul.mubr.f32.vlgmr.msra.gmra.mxu0 %v6757_v16  ;;  %vm22251_vm15 = vnez %v22250_v21  ;;  %v22267_v16 = vld [vmem:[#allocation42_spill] sm:$0xff] }
 0x684   : > { %17547 = vmatpush3.msra.mxu0 %v6799_v13  ;;  %17533 = vmatprep.mubr.msk.f32.mxu1 %vm22172_vm12, %v22116_v29 }
 0x685   : > { %17541 = vmatprep.subr.mxu1 %v22116_v29  ;;  %17548 = vmatprep.mubr.msk.f32.mxu0 %vm22172_vm12, %v22116_v29 }
 0x686   : > { %17556 = vmatprep.subr.mxu0 %v22116_v29  ;;  %17534 = vmatmul.mubr.f32.vlgmr.msra.gmra.mxu1 %v20630_v4 }
 0x687   : > { %17542 = vmatpush3.msra.mxu1 %v6721_v7  ;;  %17549 = vmatmul.mubr.f32.vlgmr.msra.gmra.mxu0 %v20630_v4 }
 0x688   : > { %17557 = vmatpush3.msk.msra.mxu0 %vm22251_vm15, %v22138_v63  ;;  %17543 = vmatprep.mubr.msk.f32.mxu1 %vm22172_vm12, %v22116_v29 }
 0x689   : > { %17558 = vmatprep.subr.mxu0 %v22116_v29  ;;  %17551 = vmatprep.subr.mxu1 %v22116_v29 }
 0x68a   : > { %17559 = vmatpush3.msk.msra.mxu0 %vm22253_vm13, %v22138_v63  ;;  %17544 = vmatmul.mubr.f32.vlgmr.msra.gmra.mxu1 %v6758_v34 }
 0x68b   : > { %17560 = vmatprep.subr.mxu0 %v22116_v29  ;;  %17552 = vmatpush3.msra.mxu1 %v6721_v7  ;;  %v22268_v7 = vld [vmem:[#allocation44_spill] sm:$0xff] }
 0x68c   : > { %17561 = vmatpush3.msk.msra.mxu0 %vm22255_vm5, %v22138_v63  ;;  %17564 = vmatprep.mubr.msk.f32.mxu0 %vm22172_vm12, %v22116_v29 }
 0x68d   : > { %17562 = vmatprep.subr.mxu0 %v22116_v29  ;;  %17553 = vmatprep.mubr.msk.f32.mxu1 %vm22172_vm12, %v22116_v29 }
 0x68e   : > { %17563 = vmatpush3.msk.msra.mxu0 %vm22257_vm4, %v22138_v63  ;;  %17567 = vmatprep.subr.mxu1 %v22116_v29 }
 0x68f   : > { %17565 = vmatmul.mubr.f32.vlgmr.msra.gmra.mxu0 %v20476_v60  ;;  %17578 = vmatprep.subr.mxu0 %v22116_v29 }
 0x690   : > { %17554 = vmatmul.mubr.f32.vlgmr.msra.gmra.mxu1 %v20630_v4  ;;  %17579 = vmatpush3.msra.mxu0 %v22258_v52  ;;  %v22264_v4 = vld [vmem:[#allocation49_spill] sm:$0xff] }
 0x691   : > { %17568 = vmatpush3.msra.mxu1 %v22259_v8  ;;  %17580 = vmatprep.subr.mxu0 %v22116_v29 }
 0x692   : > { %17569 = vmatprep.subr.mxu1 %v22116_v29  ;;  %17581 = vmatpush3.msra.mxu0 %v22260_v38 }
 0x693   : > { %17570 = vmatpush3.msra.mxu1 %v22261_v9  ;;  %17582 = vmatprep.subr.mxu0 %v22116_v29 }
 0x694   : > { %17571 = vmatprep.subr.mxu1 %v22116_v29  ;;  %17583 = vmatpush3.msra.mxu0 %v22262_v24 }
 0x695   : > { %17572 = vmatpush3.msra.mxu1 %v22263_v43  ;;  %17584 = vmatprep.subr.mxu0 %v22116_v29 }
 0x696   : > { %17573 = vmatprep.subr.mxu1 %v22116_v29  ;;  %17575 = vmatprep.mubr.msk.f32.mxu1 %vm22172_vm12, %v22116_v29 }
 0x697   : > { %17574 = vmatpush3.msra.mxu1 %v22264_v4  ;;  %17585 = vmatpush3.msra.mxu0 %v22265_v49 }
 0x698   : > { %17586 = vmatprep.mubr.msk.f32.mxu0 %vm22172_vm12, %v22116_v29  ;;  %17576 = vmatmul.mubr.f32.vlgmr.msra.gmra.mxu1 %v20451_v61 }
 0x699   : > { %17587 = vmatmul.mubr.f32.vlgmr.msra.gmra.mxu0 %v20454_v11  ;;  %17589 = vmatprep.subr.mxu1 %v22116_v29 }
 0x69a   : > { %17600 = vmatprep.subr.mxu0 %v22116_v29  ;;  %17590 = vmatpush3.msk.msra.mxu1 %vm22251_vm15, %v22138_v63 }
 0x69b   : > { %17601 = vmatpush3.msra.mxu0 %v22266_v41  ;;  %17591 = vmatprep.subr.mxu1 %v22116_v29 }
 0x69c   : > { %17602 = vmatprep.subr.mxu0 %v22116_v29  ;;  %17592 = vmatpush3.msk.msra.mxu1 %vm22253_vm13, %v22138_v63 }
 0x69d   : > { %17603 = vmatpush3.msra.mxu0 %v22267_v16  ;;  %17593 = vmatprep.subr.mxu1 %v22116_v29 }
 0x69e   : > { %17604 = vmatprep.subr.mxu0 %v22116_v29  ;;  %17594 = vmatpush3.msk.msra.mxu1 %vm22255_vm5, %v22138_v63 }
 0x69f   : > { %17605 = vmatpush3.msra.mxu0 %v22268_v7  ;;  %17595 = vmatprep.subr.mxu1 %v22116_v29 }
 0x6a0   : > { %17606 = vmatprep.subr.mxu0 %v22116_v29  ;;  %17596 = vmatpush3.msk.msra.mxu1 %vm22257_vm4, %v22138_v63 }
 0x6a1   : > { %17597 = vmatprep.mubr.msk.f32.mxu1 %vm22172_vm12, %v22116_v29  ;;  %17607 = vmatpush3.msra.mxu0 %v22269_v35 }
 0x6a2   : > { %17608 = vmatprep.mubr.msk.f32.mxu0 %vm22172_vm12, %v22116_v29  ;;  %17598 = vmatmul.mubr.f32.vlgmr.msra.gmra.mxu1 %v20464_v25 }
 0x6a3   : > { %17609 = vmatmul.mubr.f32.vlgmr.msra.gmra.mxu0 %v20451_v61  ;;  %17611 = vmatprep.subr.mxu1 %v22116_v29 }
 0x6a4   : > { %17612 = vmatpush3.msk.msra.mxu1 %vm22251_vm15, %v22138_v63  ;;  %17619 = vmatprep.mubr.msk.f32.mxu1 %vm22172_vm12, %v22116_v29 }
 0x6a5   : > { %17613 = vmatprep.subr.mxu1 %v22116_v29  ;;  %17622 = vmatprep.subr.mxu0 %v22116_v29 }
 0x6a6   : > { %17614 = vmatpush3.msk.msra.mxu1 %vm22253_vm13, %v22138_v63  ;;  %17624 = vmatprep.mubr.msk.f32.mxu0 %vm22172_vm12, %v22116_v29  ;;  %vm22282_vm13 = vcmask 31744  }
 0x6a7   : > { %17615 = vmatprep.subr.mxu1 %v22116_v29 }
 0x6a8   : > { %17616 = vmatpush3.msk.msra.mxu1 %vm22255_vm5, %v22138_v63 }
 0x6a9   : > { %17617 = vmatprep.subr.mxu1 %v22116_v29 }
 0x6aa   : > { %17618 = vmatpush3.msk.msra.mxu1 %vm22257_vm4, %v22138_v63 }
 0x6ab   : > { %17620 = vmatmul.mubr.f32.vlgmr.msra.gmra.mxu1 %v20451_v61  ;;  %17627 = vmatprep.subr.mxu1 %v22116_v29 }
 0x6ac   : > { %17629 = vmatprep.mubr.msk.f32.mxu1 %vm22172_vm12, %v22116_v29 }
 0x732   : > { %v6310_v36 = vpop.f32.mrf.mxu0 }
 0x734   : > { %v17500_v34 = vpop.f32.mrf.mxu0 }
 0x736   : > { %v6460_v32 = vpop.f32.mrf.mxu0 }
 0x738   : > { %v17510_v57 = vpop.f32.mrf.mxu0 }
 0x73a   : > { %v6386_v6 = vpop.f32.mrf.mxu1 }
 0x73b   : > { %v6387_v37 = vadd.f32 %v6386_v6, %v6310_v36  ;;  %v6608_v13 = vpop.f32.mrf.mxu0 }
 0x73c   : > { %v17505_v18 = vpop.f32.mrf.mxu1 }
 0x73d   : > { %v6461_v3 = vadd.f32 %v6460_v32, %v6387_v37  ;;  %v17520_v23 = vpop.f32.mrf.mxu0 }
 0x73e   : > { %v6534_v52 = vpop.f32.mrf.mxu1 }
 0x73f   : > { %v6535_v8 = vadd.f32 %v6534_v52, %v6461_v3  ;;  %v6762_v38 = vpop.f32.mrf.mxu0 }
 0x740   : > { %v17515_v9 = vpop.f32.mrf.mxu1 }
 0x741   : > { %v6609_v41 = vadd.f32 %v6608_v13, %v6535_v8  ;;  %v17530_v16 = vpop.f32.mrf.mxu0 }
 0x742   : > { %v6680_v5 = vpop.f32.mrf.mxu1 }
 0x743   : > { %v6681_v21 = vadd.f32 %v6680_v5, %v6609_v41  ;;  %v6912_v35 = vpop.f32.mrf.mxu0 }
 0x744   : > { %v17525_v4 = vpop.f32.mrf.mxu1 }
 0x745   : > { %v6763_v7 = vadd.f32 %v6762_v38, %v6681_v21  ;;  %v17540_v34 = vpop.f32.mrf.mxu0  ;;  %v15793_v21 = vld [vmem:[%s22249_s3 + $0x10] sm:$0xff] }
 0x746   : > { %v6838_v43 = vpop.f32.mrf.mxu1 }
 0x747   : > { %v6839_v57 = vadd.f32 %v6838_v43, %v6763_v7  ;;  %v7060_v49 = vpop.f32.mrf.mxu0 }
 0x748   : > { %v17535_v36 = vpop.f32.mrf.mxu1 }
 0x749   : > { %v6913_v6 = vadd.f32 %v6912_v35, %v6839_v57  ;;  %v17550_v18 = vpop.f32.mrf.mxu0  ;;  %v7600_v35 = vsel %vm22063_vm7, %v15793_v21, 0  ;;  %vm22271_vm7 = vnez %v22185_v31 }
 0x74a   : > { %v6986_v32 = vpop.f32.mrf.mxu1  ;;  %v7671_v38 = vand.u32 4294901760, %v7600_v35 }
 0x74b   : > { %v6987_v37 = vadd.f32 %v6986_v32, %v6913_v6 }
 0x74c   : > { %v17545_v23 = vpop.f32.mrf.mxu1 }
 0x74d   : > { %v7061_v3 = vadd.f32 %v7060_v49, %v6987_v37  ;;  %v7672_v49 = vsub.f32 %v7600_v35, %v7671_v38  ;;  %v22273_v35 = vld [vmem:[#allocation63_spill] sm:$0xff] }
 0x74f   : > { %v7207_v52 = vpop.f32.mrf.mxu0  ;;  %v7673_v37 = vand.u32 4294901760, %v7672_v49 }
 0x750   : > { %v7132_v9 = vpop.f32.mrf.mxu1 }
 0x751   : > { %v20767_v13 = vadd.f32 %v7132_v9, %v7061_v3  ;;  %v17566_v8 = vpop.f32.mrf.mxu0  ;;  %v7674_v3 = vsub.f32 %v7672_v49, %v7673_v37 }
 0x752   : > { %v17555_v5 = vpop.f32.mrf.mxu1 }
 0x758   : > { %v7294_v41 = vpop.f32.mrf.mxu1 }
 0x759   : > { %v7370_v43 = vpop.f32.mrf.mxu0  ;;  %v7295_v16 = vadd.f32 %v7294_v41, %v7207_v52 }
 0x75a   : > { %v17577_v4 = vpop.f32.mrf.mxu1 }
 0x75b   : > { %v17588_v7 = vpop.f32.mrf.mxu0  ;;  %v7371_v36 = vadd.f32 %v7370_v43, %v7295_v16  ;;  %v22274_v16 = vld [vmem:[#allocation58_spill] sm:$0xff] }
 0x75c   : > { %v7675_v7 = vand.u32 4294901760, %v7674_v3 }
 0x762   : > { %v7443_v34 = vpop.f32.mrf.mxu1 }
 0x763   : > { %v7522_v57 = vpop.f32.mrf.mxu0  ;;  %v7444_v32 = vadd.f32 %v7443_v34, %v7371_v36  ;;  %v22275_v34 = vld [vmem:[#allocation64_spill] sm:$0xff]  ;;  %v22281_v36 = vld [vmem:[#allocation62_spill] sm:$0xff] }
 0x764   : > { %v17599_v6 = vpop.f32.mrf.mxu1 }
 0x765   : > { %v17610_v18 = vpop.f32.mrf.mxu0  ;;  %v7523_v23 = vadd.f32 %v7522_v57, %v7444_v32  ;;  %v22280_v57 = vld [vmem:[#allocation61_spill] sm:$0xff] }
 0x76b   : > { %v7593_v9 = vpop.f32.mrf.mxu1 }
 0x76c   : > { %v7594_v8 = vadd.f32 %v7593_v9, %v7523_v23 }
 0x76d   : > { %v17621_v5 = vpop.f32.mrf.mxu1 }
 0x76e   : > { %v7603_v4 = vsel %vm22062_vm14, %v7594_v8, 0  ;;  %vm22270_vm14 = vnez %v22183_v2  ;;  %v18592_v2 = vmov 0.5  }
 0x76f   : > { %v7636_v24 = vand.u32 4294901760, %v7603_v4 }
 0x771   : > { %v7713_v21 = vsub.f32 %v7603_v4, %v7636_v24  ;;  %17623 = vmatpush3.msra.mxu0 %v7636_v24 }
 0x772   : > { %17625 = vmatmul.mubr.f32.vlgmr.msra.gmra.mxu0 %v7675_v7  ;;  %17632 = vmatprep.subr.mxu0 %v22116_v29 }
 0x773   : > { %17633 = vmatpush3.msra.mxu0 %v7713_v21  ;;  %17634 = vmatprep.mubr.msk.f32.mxu0 %vm22172_vm12, %v22116_v29  ;;  %v7714_v52 = vand.u32 4294901760, %v7713_v21 }
 0x774   : > { %17642 = vmatprep.subr.mxu0 %v22116_v29 }
 0x775   : > { %v7715_v41 = vsub.f32 %v7713_v21, %v7714_v52 }
 0x776   : > { %17635 = vmatmul.mubr.f32.vlgmr.msra.gmra.mxu0 %v7672_v49  ;;  %v22279_v49 = vld [vmem:[#allocation59_spill] sm:$0xff] }
 0x777   : > { %17643 = vmatpush3.msra.mxu0 %v7714_v52  ;;  %v7716_v43 = vand.u32 4294901760, %v7715_v41  ;;  %17644 = vmatprep.mubr.msk.f32.mxu0 %vm22172_vm12, %v22116_v29 }
 0x778   : > { %17652 = vmatprep.subr.mxu0 %v22116_v29 }
 0x779   : > { %17628 = vmatpush3.msra.mxu1 %v7716_v43 }
 0x77a   : > { %17630 = vmatmul.mubr.f32.vlgmr.msra.gmra.mxu1 %v7671_v38  ;;  %17637 = vmatprep.subr.mxu1 %v22116_v29 }
 0x77b   : > { %17645 = vmatmul.mubr.f32.vlgmr.msra.gmra.mxu0 %v7671_v38  ;;  %17638 = vmatpush3.msra.mxu1 %v7636_v24 }
 0x77c   : > { %17653 = vmatpush3.msk.msra.mxu0 %vm19787_vm2, %v22138_v63  ;;  %17639 = vmatprep.mubr.msk.f32.mxu1 %vm22172_vm12, %v22116_v29 }
 0x77d   : > { %17654 = vmatprep.subr.mxu0 %v22116_v29  ;;  %17647 = vmatprep.subr.mxu1 %v22116_v29 }
 0x77e   : > { %17655 = vmatpush3.msk.msra.mxu0 %vm19798_vm3, %v22138_v63  ;;  %17640 = vmatmul.mubr.f32.vlgmr.msra.gmra.mxu1 %v7673_v37 }
 0x77f   : > { %17656 = vmatprep.subr.mxu0 %v22116_v29  ;;  %17648 = vmatpush3.msra.mxu1 %v7636_v24  ;;  %v22272_v24 = vld [vmem:[#allocation56_spill] sm:$0xff] }
 0x780   : > { %17657 = vmatpush3.msk.msra.mxu0 %vm22270_vm14, %v22138_v63  ;;  %17660 = vmatprep.mubr.msk.f32.mxu0 %vm22172_vm12, %v22116_v29 }
 0x781   : > { %17658 = vmatprep.subr.mxu0 %v22116_v29  ;;  %17649 = vmatprep.mubr.msk.f32.mxu1 %vm22172_vm12, %v22116_v29 }
 0x782   : > { %17659 = vmatpush3.msk.msra.mxu0 %vm22271_vm7, %v22138_v63  ;;  %17663 = vmatprep.subr.mxu1 %v22116_v29 }
 0x783   : > { %17661 = vmatmul.mubr.f32.vlgmr.msra.gmra.mxu0 %v20476_v60  ;;  %17674 = vmatprep.subr.mxu0 %v22116_v29 }
 0x784   : > { %17650 = vmatmul.mubr.f32.vlgmr.msra.gmra.mxu1 %v7671_v38  ;;  %17675 = vmatpush3.msra.mxu0 %v19833_v45  ;;  %v22276_v45 = vld [vmem:[#allocation65_spill] sm:$0xff] }
 0x785   : > { %17664 = vmatpush3.msra.mxu1 %v19905_v12  ;;  %17676 = vmatprep.subr.mxu0 %v22116_v29  ;;  %v22277_v12 = vld [vmem:[#allocation60_spill] sm:$0xff]  ;;  %v22278_v38 = vld [vmem:[#allocation57_spill] sm:$0xff] }
 0x786   : > { %17665 = vmatprep.subr.mxu1 %v22116_v29  ;;  %17677 = vmatpush3.msra.mxu0 %v22272_v24 }
 0x787   : > { %17666 = vmatpush3.msra.mxu1 %v22273_v35  ;;  %17678 = vmatprep.subr.mxu0 %v22116_v29 }
 0x788   : > { %17667 = vmatprep.subr.mxu1 %v22116_v29  ;;  %17679 = vmatpush3.msra.mxu0 %v22274_v16 }
 0x789   : > { %17668 = vmatpush3.msra.mxu1 %v22275_v34  ;;  %17680 = vmatprep.subr.mxu0 %v22116_v29 }
 0x78a   : > { %17669 = vmatprep.subr.mxu1 %v22116_v29  ;;  %17671 = vmatprep.mubr.msk.f32.mxu1 %vm22172_vm12, %v22116_v29 }
 0x78b   : > { %17670 = vmatpush3.msra.mxu1 %v22276_v45  ;;  %17681 = vmatpush3.msra.mxu0 %v22277_v12 }
 0x78c   : > { %17682 = vmatprep.mubr.msk.f32.mxu0 %vm22172_vm12, %v22116_v29  ;;  %17672 = vmatmul.mubr.f32.vlgmr.msra.gmra.mxu1 %v20451_v61 }
 0x78d   : > { %17683 = vmatmul.mubr.f32.vlgmr.msra.gmra.mxu0 %v20454_v11  ;;  %17685 = vmatprep.subr.mxu1 %v22116_v29 }
 0x78e   : > { %17696 = vmatprep.subr.mxu0 %v22116_v29  ;;  %17686 = vmatpush3.msk.msra.mxu1 %vm19787_vm2, %v22138_v63 }
 0x78f   : > { %17697 = vmatpush3.msra.mxu0 %v22278_v38  ;;  %17687 = vmatprep.subr.mxu1 %v22116_v29 }
 0x790   : > { %17698 = vmatprep.subr.mxu0 %v22116_v29  ;;  %17688 = vmatpush3.msk.msra.mxu1 %vm19798_vm3, %v22138_v63 }
 0x791   : > { %17699 = vmatpush3.msra.mxu0 %v22279_v49  ;;  %17689 = vmatprep.subr.mxu1 %v22116_v29 }
 0x792   : > { %17700 = vmatprep.subr.mxu0 %v22116_v29  ;;  %17690 = vmatpush3.msk.msra.mxu1 %vm22270_vm14, %v22138_v63 }
 0x793   : > { %17701 = vmatpush3.msra.mxu0 %v22280_v57  ;;  %17691 = vmatprep.subr.mxu1 %v22116_v29 }
 0x794   : > { %17702 = vmatprep.subr.mxu0 %v22116_v29  ;;  %17692 = vmatpush3.msk.msra.mxu1 %vm22271_vm7, %v22138_v63 }
 0x795   : > { %17693 = vmatprep.mubr.msk.f32.mxu1 %vm22172_vm12, %v22116_v29  ;;  %17703 = vmatpush3.msra.mxu0 %v22281_v36 }
 0x796   : > { %17704 = vmatprep.mubr.msk.f32.mxu0 %vm22172_vm12, %v22116_v29  ;;  %17694 = vmatmul.mubr.f32.vlgmr.msra.gmra.mxu1 %v20464_v25 }
 0x797   : > { %17705 = vmatmul.mubr.f32.vlgmr.msra.gmra.mxu0 %v20451_v61  ;;  %17707 = vmatprep.subr.mxu1 %v22116_v29 }
 0x798   : > { %17708 = vmatpush3.msk.msra.mxu1 %vm19787_vm2, %v22138_v63  ;;  %17715 = vmatprep.mubr.msk.f32.mxu1 %vm22172_vm12, %v22116_v29 }
 0x799   : > { %17709 = vmatprep.subr.mxu1 %v22116_v29  ;;  %17718 = vmatprep.subr.mxu0 %v22116_v29 }
 0x79a   : > { %17710 = vmatpush3.msk.msra.mxu1 %vm19798_vm3, %v22138_v63  ;;  %17720 = vmatprep.mubr.msk.f32.mxu0 %vm22172_vm12, %v22116_v29  ;;  %vm22283_vm3 = vcmask 1043456  }
 0x79b   : > { %17711 = vmatprep.subr.mxu1 %v22116_v29 }
 0x79c   : > { %17712 = vmatpush3.msk.msra.mxu1 %vm22270_vm14, %v22138_v63 }
 0x79d   : > { %17713 = vmatprep.subr.mxu1 %v22116_v29 }
 0x79e   : > { %17714 = vmatpush3.msk.msra.mxu1 %vm22271_vm7, %v22138_v63 }
 0x79f   : > { %17716 = vmatmul.mubr.f32.vlgmr.msra.gmra.mxu1 %v20451_v61  ;;  %17723 = vmatprep.subr.mxu1 %v22116_v29 }
 0x7a0   : > { %17725 = vmatprep.mubr.msk.f32.mxu1 %vm22172_vm12, %v22116_v29 }
 0x832   : > { %v7677_v6 = vpop.f32.mrf.mxu0 }
 0x834   : > { %v17626_v18 = vpop.f32.mrf.mxu0 }
 0x836   : > { %v7827_v32 = vpop.f32.mrf.mxu0 }
 0x838   : > { %v17636_v37 = vpop.f32.mrf.mxu0 }
 0x83a   : > { %v7753_v23 = vpop.f32.mrf.mxu1 }
 0x83b   : > { %v7754_v3 = vadd.f32 %v7753_v23, %v7677_v6  ;;  %v7975_v9 = vpop.f32.mrf.mxu0  ;;  %v15806_v6 = vld [vmem:[%s22249_s3 + $0x18] sm:$0xff] }
 0x83c   : > { %v17631_v8 = vpop.f32.mrf.mxu1 }
 0x83d   : > { %v7828_v5 = vadd.f32 %v7827_v32, %v7754_v3  ;;  %v17646_v4 = vpop.f32.mrf.mxu0  ;;  %v8516_v3 = vsel %vm22282_vm13, %v15806_v6, 0 }
 0x83e   : > { %v7901_v7 = vpop.f32.mrf.mxu1  ;;  %v8587_v8 = vand.u32 4294901760, %v8516_v3 }
 0x83f   : > { %v7902_v21 = vadd.f32 %v7901_v7, %v7828_v5 }
 0x840   : > { %v17641_v52 = vpop.f32.mrf.mxu1  ;;  %v8588_v4 = vsub.f32 %v8516_v3, %v8587_v8 }
 0x841   : > { %v7976_v41 = vadd.f32 %v7975_v9, %v7902_v21 }
 0x843   : > { %v8123_v43 = vpop.f32.mrf.mxu0 }
 0x844   : > { %v8047_v24 = vpop.f32.mrf.mxu1 }
 0x845   : > { %v8048_v35 = vadd.f32 %v8047_v24, %v7976_v41  ;;  %v17662_v38 = vpop.f32.mrf.mxu0  ;;  %v8589_v24 = vand.u32 4294901760, %v8588_v4 }
 0x846   : > { %v17651_v49 = vpop.f32.mrf.mxu1 }
 0x847   : > { %v20883_v56 = vadd.f32 %v8048_v35, %v20767_v13  ;;  %v8590_v38 = vsub.f32 %v8588_v4, %v8589_v24 }
 0x84c   : > { %v8210_v18 = vpop.f32.mrf.mxu1 }
 0x84d   : > { %v8286_v37 = vpop.f32.mrf.mxu0  ;;  %v8211_v9 = vadd.f32 %v8210_v18, %v8123_v43 }
 0x84e   : > { %v17673_v32 = vpop.f32.mrf.mxu1 }
 0x84f   : > { %v17684_v23 = vpop.f32.mrf.mxu0  ;;  %v8287_v21 = vadd.f32 %v8286_v37, %v8211_v9 }
 0x850   : > { %v8591_v23 = vand.u32 4294901760, %v8590_v38 }
 0x856   : > { %v8359_v5 = vpop.f32.mrf.mxu1 }
 0x857   : > { %v8438_v7 = vpop.f32.mrf.mxu0  ;;  %v8360_v13 = vadd.f32 %v8359_v5, %v8287_v21 }
 0x858   : > { %v17695_v52 = vpop.f32.mrf.mxu1 }
 0x859   : > { %v17706_v41 = vpop.f32.mrf.mxu0  ;;  %v8439_v35 = vadd.f32 %v8438_v7, %v8360_v13 }
 0x85f   : > { %v8509_v49 = vpop.f32.mrf.mxu1 }
 0x860   : > { %v8510_v19 = vadd.f32 %v8509_v49, %v8439_v35 }
 0x861   : > { %v17717_v36 = vpop.f32.mrf.mxu1 }
 0x862   : > { %v8519_v32 = vsel %vm22283_vm3, %v8510_v19, 0  ;;  %vm22284_vm3 = vnez %v22212_v15  ;;  %v22285_v19 = vld [vmem:[#allocation71_spill] sm:$0xff] }
 0x863   : > { %v8552_v45 = vand.u32 4294901760, %v8519_v32 }
 0x865   : > { %v8629_v6 = vsub.f32 %v8519_v32, %v8552_v45  ;;  %17719 = vmatpush3.msra.mxu0 %v8552_v45  ;;  %v15819_v32 = vld [vmem:[%s22249_s3 + $0x20] sm:$0xff]  ;;  %s18593_s3 = smov [#allocation5]  }
 0x866   : > { %17721 = vmatmul.mubr.f32.vlgmr.msra.gmra.mxu0 %v8591_v23  ;;  %17728 = vmatprep.subr.mxu0 %v22116_v29  ;;  %s18418_s4 = sshll.u32 %s18593_s3, 4  ;;  %s18419_s4 = int_to_ptr.vmem [resolvable:$false] %s18418_s4 }
 0x867   : > { %17729 = vmatpush3.msra.mxu0 %v8629_v6  ;;  %17730 = vmatprep.mubr.msk.f32.mxu0 %vm22172_vm12, %v22116_v29  ;;  %v8630_v43 = vand.u32 4294901760, %v8629_v6  ;;  %p18421_p0 = scmp.lt.s32.totalorder %s15417_s0, %s18419_s4 }
 0x868   : > { %17738 = vmatprep.subr.mxu0 %v22116_v29 }
 0x869   : > { %v8631_v18 = vsub.f32 %v8629_v6, %v8630_v43 }
 0x86a   : > { %17731 = vmatmul.mubr.f32.vlgmr.msra.gmra.mxu0 %v8588_v4 }
 0x86b   : > { %17739 = vmatpush3.msra.mxu0 %v8630_v43  ;;  %v8632_v36 = vand.u32 4294901760, %v8631_v18  ;;  %17740 = vmatprep.mubr.msk.f32.mxu0 %vm22172_vm12, %v22116_v29 }
 0x86c   : > { %17748 = vmatprep.subr.mxu0 %v22116_v29 }
 0x86d   : > { %17724 = vmatpush3.msra.mxu1 %v8632_v36 }
 0x86e   : > { %17726 = vmatmul.mubr.f32.vlgmr.msra.gmra.mxu1 %v8587_v8  ;;  %17733 = vmatprep.subr.mxu1 %v22116_v29 }
 0x86f   : > { %17741 = vmatmul.mubr.f32.vlgmr.msra.gmra.mxu0 %v8587_v8  ;;  %17734 = vmatpush3.msra.mxu1 %v8552_v45 }
 0x870   : > { %17749 = vmatpush3.msk.msra.mxu0 %vm20106_vm11, %v22138_v63  ;;  %17735 = vmatprep.mubr.msk.f32.mxu1 %vm22172_vm12, %v22116_v29 }
 0x871   : > { %17750 = vmatprep.subr.mxu0 %v22116_v29  ;;  %17743 = vmatprep.subr.mxu1 %v22116_v29 }
 0x872   : > { %17751 = vmatpush3.msk.msra.mxu0 %vm20118_vm10, %v22138_v63  ;;  %17736 = vmatmul.mubr.f32.vlgmr.msra.gmra.mxu1 %v8589_v24 }
 0x873   : > { %17752 = vmatprep.subr.mxu0 %v22116_v29  ;;  %17744 = vmatpush3.msra.mxu1 %v8552_v45 }
 0x874   : > { %17753 = vmatpush3.msk.msra.mxu0 %vm20132_vm0, %v22138_v63  ;;  %17756 = vmatprep.mubr.msk.f32.mxu0 %vm22172_vm12, %v22116_v29 }
 0x875   : > { %17754 = vmatprep.subr.mxu0 %v22116_v29  ;;  %17745 = vmatprep.mubr.msk.f32.mxu1 %vm22172_vm12, %v22116_v29 }
 0x876   : > { %17755 = vmatpush3.msk.msra.mxu0 %vm22284_vm3, %v22138_v63  ;;  %17759 = vmatprep.subr.mxu1 %v22116_v29 }
 0x877   : > { %17757 = vmatmul.mubr.f32.vlgmr.msra.gmra.mxu0 %v20476_v60  ;;  %17770 = vmatprep.subr.mxu0 %v22116_v29 }
 0x878   : > { %17746 = vmatmul.mubr.f32.vlgmr.msra.gmra.mxu1 %v8587_v8  ;;  %17771 = vmatpush3.msra.mxu0 %v20156_v47  ;;  %v22286_v47 = vld [vmem:[#allocation68_spill] sm:$0xff] }
 0x879   : > { %17760 = vmatpush3.msra.mxu1 %v20231_v46  ;;  %17772 = vmatprep.subr.mxu0 %v22116_v29  ;;  %v22288_v46 = vld [vmem:[#allocation67_spill] sm:$0xff] }
 0x87a   : > { %17761 = vmatprep.subr.mxu1 %v22116_v29  ;;  %17773 = vmatpush3.msra.mxu0 %v20171_v58  ;;  %v22287_v58 = vld [vmem:[#allocation66_spill] sm:$0xff] }
 0x87b   : > { %17762 = vmatpush3.msra.mxu1 %v20241_v17  ;;  %17774 = vmatprep.subr.mxu0 %v22116_v29  ;;  %v22289_v17 = vld [vmem:[#allocation69_spill] sm:$0xff] }
 0x87c   : > { %17763 = vmatprep.subr.mxu1 %v22116_v29  ;;  %17775 = vmatpush3.msra.mxu0 %v20189_v26 }
 0x87d   : > { %17764 = vmatpush3.msra.mxu1 %v20249_v33  ;;  %17776 = vmatprep.subr.mxu0 %v22116_v29 }
 0x87e   : > { %17765 = vmatprep.subr.mxu1 %v22116_v29  ;;  %17767 = vmatprep.mubr.msk.f32.mxu1 %vm22172_vm12, %v22116_v29 }
 0x87f   : > { %17766 = vmatpush3.msra.mxu1 %v22285_v19  ;;  %17777 = vmatpush3.msra.mxu0 %v22286_v47 }
 0x880   : > { %17778 = vmatprep.mubr.msk.f32.mxu0 %vm22172_vm12, %v22116_v29  ;;  %17768 = vmatmul.mubr.f32.vlgmr.msra.gmra.mxu1 %v20451_v61 }
 0x881   : > { %17779 = vmatmul.mubr.f32.vlgmr.msra.gmra.mxu0 %v20454_v11  ;;  %17781 = vmatprep.subr.mxu1 %v22116_v29  ;;  %v22290_v11 = vld [vmem:[#allocation70_spill] sm:$0xff] }
 0x882   : > { %17792 = vmatprep.subr.mxu0 %v22116_v29  ;;  %17782 = vmatpush3.msk.msra.mxu1 %vm20106_vm11, %v22138_v63 }
 0x883   : > { %17793 = vmatpush3.msra.mxu0 %v22287_v58  ;;  %17783 = vmatprep.subr.mxu1 %v22116_v29 }
 0x884   : > { %17794 = vmatprep.subr.mxu0 %v22116_v29  ;;  %17784 = vmatpush3.msk.msra.mxu1 %vm20118_vm10, %v22138_v63 }
 0x885   : > { %17795 = vmatpush3.msra.mxu0 %v22288_v46  ;;  %17785 = vmatprep.subr.mxu1 %v22116_v29 }
 0x886   : > { %17796 = vmatprep.subr.mxu0 %v22116_v29  ;;  %17786 = vmatpush3.msk.msra.mxu1 %vm20132_vm0, %v22138_v63 }
 0x887   : > { %17797 = vmatpush3.msra.mxu0 %v22289_v17  ;;  %17787 = vmatprep.subr.mxu1 %v22116_v29 }
 0x888   : > { %17798 = vmatprep.subr.mxu0 %v22116_v29  ;;  %17788 = vmatpush3.msk.msra.mxu1 %vm22284_vm3, %v22138_v63 }
 0x889   : > { %17789 = vmatprep.mubr.msk.f32.mxu1 %vm22172_vm12, %v22116_v29  ;;  %17799 = vmatpush3.msra.mxu0 %v22290_v11 }
 0x88a   : > { %17800 = vmatprep.mubr.msk.f32.mxu0 %vm22172_vm12, %v22116_v29  ;;  %17790 = vmatmul.mubr.f32.vlgmr.msra.gmra.mxu1 %v20464_v25 }
 0x88b   : > { %17801 = vmatmul.mubr.f32.vlgmr.msra.gmra.mxu0 %v20451_v61  ;;  %17803 = vmatprep.subr.mxu1 %v22116_v29 }
 0x88c   : > { %17804 = vmatpush3.msk.msra.mxu1 %vm20106_vm11, %v22138_v63  ;;  %17811 = vmatprep.mubr.msk.f32.mxu1 %vm22172_vm12, %v22116_v29  ;;  %vm22291_vm11 = vmmov %vm22282_vm13  ;;  %vm9890_vm13 = vcmask 130048  }
 0x88d   : > { %17805 = vmatprep.subr.mxu1 %v22116_v29  ;;  %17814 = vmatprep.subr.mxu0 %v22116_v29  ;;  %v9432_v18 = vsel %vm22291_vm11, %v15819_v32, 0 }
 0x88e   : > { %17806 = vmatpush3.msk.msra.mxu1 %vm20118_vm10, %v22138_v63  ;;  %17816 = vmatprep.mubr.msk.f32.mxu0 %vm22172_vm12, %v22116_v29  ;;  %v9503_v36 = vand.u32 4294901760, %v9432_v18  ;;  %vm22292_vm10 = vcmask 1043456  }
 0x88f   : > { %17807 = vmatprep.subr.mxu1 %v22116_v29 }
 0x890   : > { %17808 = vmatpush3.msk.msra.mxu1 %vm20132_vm0, %v22138_v63 }
 0x891   : > { %17809 = vmatprep.subr.mxu1 %v22116_v29 }
 0x892   : > { %17810 = vmatpush3.msk.msra.mxu1 %vm22284_vm3, %v22138_v63 }
 0x893   : > { %17812 = vmatmul.mubr.f32.vlgmr.msra.gmra.mxu1 %v20451_v61  ;;  %17819 = vmatprep.subr.mxu1 %v22116_v29 }
 0x894   : > { %17821 = vmatprep.mubr.msk.f32.mxu1 %vm22172_vm12, %v22116_v29 }
 0x926   : > { %v8593_v53 = vpop.f32.mrf.mxu0 }
 0x928   : > { %v17722_v20 = vpop.f32.mrf.mxu0 }
 0x92a   : > { %v8743_v25 = vpop.f32.mrf.mxu0 }
 0x92c   : > { %v17732_v60 = vpop.f32.mrf.mxu0 }
 0x92e   : > { %v8669_v45 = vpop.f32.mrf.mxu1 }
 0x92f   : > { %v8670_v37 = vadd.f32 %v8669_v45, %v8593_v53  ;;  %v8891_v3 = vpop.f32.mrf.mxu0  ;;  %v9504_v53 = vsub.f32 %v9432_v18, %v9503_v36 }
 0x930   : > { %v17727_v8 = vpop.f32.mrf.mxu1 }
 0x931   : > { %v8744_v9 = vadd.f32 %v8743_v25, %v8670_v37  ;;  %v17742_v5 = vpop.f32.mrf.mxu0  ;;  %v9505_v37 = vand.u32 4294901760, %v9504_v53 }
 0x932   : > { %v8817_v4 = vpop.f32.mrf.mxu1 }
 0x933   : > { %v8818_v7 = vadd.f32 %v8817_v4, %v8744_v9  ;;  %v9506_v8 = vsub.f32 %v9504_v53, %v9505_v37 }
 0x934   : > { %v17737_v21 = vpop.f32.mrf.mxu1 }
 0x935   : > { %v8892_v52 = vadd.f32 %v8891_v3, %v8818_v7  ;;  %v9507_v21 = vand.u32 4294901760, %v9506_v8 }
 0x937   : > { %v9039_v61 = vpop.f32.mrf.mxu0 }
 0x938   : > { %v8963_v41 = vpop.f32.mrf.mxu1 }
 0x939   : > { %v8964_v13 = vadd.f32 %v8963_v41, %v8892_v52  ;;  %v17758_v24 = vpop.f32.mrf.mxu0 }
 0x93a   : > { %v17747_v35 = vpop.f32.mrf.mxu1 }
 0x93b   : > { %v20999_v38 = vadd.f32 %v8964_v13, %v20883_v56 }
 0x940   : > { %v9126_v49 = vpop.f32.mrf.mxu1 }
 0x941   : > { %v9202_v23 = vpop.f32.mrf.mxu0  ;;  %v9127_v58 = vadd.f32 %v9126_v49, %v9039_v61 }
 0x942   : > { %v17769_v6 = vpop.f32.mrf.mxu1 }
 0x943   : > { %v17780_v43 = vpop.f32.mrf.mxu0  ;;  %v9203_v25 = vadd.f32 %v9202_v23, %v9127_v58 }
 0x94a   : > { %v9275_v46 = vpop.f32.mrf.mxu1 }
 0x94b   : > { %v9354_v20 = vpop.f32.mrf.mxu0  ;;  %v9276_v56 = vadd.f32 %v9275_v46, %v9203_v25 }
 0x94c   : > { %v17791_v60 = vpop.f32.mrf.mxu1 }
 0x94d   : > { %v17802_v45 = vpop.f32.mrf.mxu0  ;;  %v9355_v3 = vadd.f32 %v9354_v20, %v9276_v56 }
 0x953   : > { %v9425_v9 = vpop.f32.mrf.mxu1 }
 0x954   : > { %v9426_v5 = vadd.f32 %v9425_v9, %v9355_v3 }
 0x955   : > { %v17813_v4 = vpop.f32.mrf.mxu1 }
 0x956   : > { %v9435_v7 = vsel %vm22292_vm10, %v9426_v5, 0 }
 0x957   : > { %v9468_v52 = vand.u32 4294901760, %v9435_v7 }
 0x959   : > { %v9545_v41 = vsub.f32 %v9435_v7, %v9468_v52  ;;  %17815 = vmatpush3.msra.mxu0 %v9468_v52 }
 0x95a   : > { %17817 = vmatmul.mubr.f32.vlgmr.msra.gmra.mxu0 %v9507_v21  ;;  %17824 = vmatprep.subr.mxu0 %v22116_v29 }
 0x95b   : > { %17825 = vmatpush3.msra.mxu0 %v9545_v41  ;;  %17826 = vmatprep.mubr.msk.f32.mxu0 %vm22172_vm12, %v22116_v29  ;;  %v9546_v61 = vand.u32 4294901760, %v9545_v41 }
 0x95c   : > { %17834 = vmatprep.subr.mxu0 %v22116_v29 }
 0x95d   : > { %v9547_v13 = vsub.f32 %v9545_v41, %v9546_v61 }
 0x95e   : > { %17827 = vmatmul.mubr.f32.vlgmr.msra.gmra.mxu0 %v9504_v53 }
 0x95f   : > { %17835 = vmatpush3.msra.mxu0 %v9546_v61  ;;  %v9548_v24 = vand.u32 4294901760, %v9547_v13  ;;  %17836 = vmatprep.mubr.msk.f32.mxu0 %vm22172_vm12, %v22116_v29 }
 0x960   : > { %17844 = vmatprep.subr.mxu0 %v22116_v29 }
 0x961   : > { %17820 = vmatpush3.msra.mxu1 %v9548_v24 }
 0x962   : > { %17822 = vmatmul.mubr.f32.vlgmr.msra.gmra.mxu1 %v9503_v36  ;;  %17829 = vmatprep.subr.mxu1 %v22116_v29 }
 0x963   : > { %17830 = vmatpush3.msra.mxu1 %v9468_v52  ;;  %17831 = vmatprep.mubr.msk.f32.mxu1 %vm22172_vm12, %v22116_v29 }
 0x964   : > { %17839 = vmatprep.subr.mxu1 %v22116_v29  ;;  %17837 = vmatmul.mubr.f32.vlgmr.msra.gmra.mxu0 %v9503_v36 }
 0x965   : > { %17845 = vmatpush3.msk.msra.mxu0 %vm18817_vm8, %v22138_v63  ;;  %17848 = vmatprep.mubr.msk.f32.mxu0 %vm22172_vm12, %v22116_v29 }
 0x966   : > { %17832 = vmatmul.mubr.f32.vlgmr.msra.gmra.mxu1 %v9505_v37  ;;  %17846 = vmatprep.subr.mxu0 %v22116_v29  ;;  %v9887_v37 = vpop.permute.xlu0 %9886 }
 0x967   : > { %17840 = vmatpush3.msra.mxu1 %v9468_v52  ;;  %17841 = vmatprep.mubr.msk.f32.mxu1 %vm22172_vm12, %v22116_v29 }
 0x968   : > { %17851 = vmatprep.subr.mxu1 %v22116_v29  ;;  %17847 = vmatpush3.msk.msra.mxu0 %vm18851_vm9, %v22138_v63 }
 0x969   : > { %17858 = vmatprep.subr.mxu0 %v22116_v29 }
 0x96a   : > { %17842 = vmatmul.mubr.f32.vlgmr.msra.gmra.mxu1 %v9503_v36 }
 0x96b   : > { %17852 = vmatpush3.msra.mxu1 %v18932_v0  ;;  %17855 = vmatprep.mubr.msk.f32.mxu1 %vm22172_vm12, %v22116_v29 }
 0x96c   : > { %17853 = vmatprep.subr.mxu1 %v22116_v29 }
 0x96d   : > { %17854 = vmatpush3.msra.mxu1 %v18938_v1 }
 0x96e   : > { %17865 = vmatprep.subr.mxu1 %v22116_v29 }
 0xa1a   : > { %v9509_v35 = vpop.f32.mrf.mxu0 }
 0xa1c   : > { %v17818_v49 = vpop.f32.mrf.mxu0 }
 0xa1e   : > { %v9659_v32 = vpop.f32.mrf.mxu0 }
 0xa20   : > { %v17828_v23 = vpop.f32.mrf.mxu0 }
 0xa22   : > { %v9585_v6 = vpop.f32.mrf.mxu1 }
 0xa23   : > { %v9586_v43 = vadd.f32 %v9585_v6, %v9509_v35 }
 0xa24   : > { %v17823_v18 = vpop.f32.mrf.mxu1  ;;  %v9807_v36 = vpop.f32.mrf.mxu0 }
 0xa25   : > { %v9660_v58 = vadd.f32 %v9659_v32, %v9586_v43 }
 0xa26   : > { %v9733_v0 = vpop.f32.mrf.mxu1  ;;  %v17838_v46 = vpop.f32.mrf.mxu0 }
 0xa27   : > { %v9734_v53 = vadd.f32 %v9733_v0, %v9660_v58  ;;  %v10346_v46 = vld [vmem:[%s22293_s5] sm:$0xff] }
 0xa28   : > { %v17833_v20 = vpop.f32.mrf.mxu1 }
 0xa29   : > { %v9808_v25 = vadd.f32 %v9807_v36, %v9734_v53 }
 0xa2a   : > { %v9879_v60 = vpop.f32.mrf.mxu1 }
 0xa2b   : > { %v9880_v1 = vadd.f32 %v9879_v60, %v9808_v25 }
 0xa2c   : > { %v17843_v45 = vpop.f32.mrf.mxu1 }
 0xa2d   : > { %v9883_v56 = vadd.f32 %v9880_v1, %v20999_v38 }
 0xa2f   : > { %v9889_v3 = vadd.f32 %v9887_v37, %v9883_v56 }
 0xa31   : > { %vm9892_vm11 = vcmp.gt.f32.partialorder %v9889_v3, 0.0  ;;  %v9893_v8 = vmul.f32 0.2, %v9889_v3  ;;  %9891 = vst.msk [vmem:[%s21040_s24] sm:$0xff] %vm9890_vm13, %v9889_v3 }
 0xa33   : > { %v9894_v9 = vsel %vm9892_vm11, %v9889_v3, %v9893_v8 }
 0xa34   : > { %v9897_v5 = vsel %vm9890_vm13, %v9894_v9, 0 }
 0xa35   : > { %v21043_v4 = vand.u32 4294901760, %v9897_v5 }
 0xa37   : > { %v21046_v7 = vsub.f32 %v9897_v5, %v21043_v4  ;;  %17856 = vmatmul.mubr.f32.vlgmr.msra.gmra.mxu1 %v21043_v4 }
 0xa38   : > { %17866 = vmatpush3.msk.msra.mxu1 %vm18817_vm8, %v22138_v63  ;;  %17869 = vmatprep.mubr.msk.f32.mxu1 %vm22172_vm12, %v22116_v29 }
 0xa39   : > { %17867 = vmatprep.subr.mxu1 %v22116_v29  ;;  %v21056_v38 = vand.u32 4294901760, %v21046_v7 }
 0xa3a   : > { %17868 = vmatpush3.msk.msra.mxu1 %vm18851_vm9, %v22138_v63 }
 0xa3b   : > { %17870 = vmatmul.mubr.f32.vlgmr.msra.gmra.mxu1 %v21056_v38  ;;  %17879 = vmatprep.subr.mxu1 %v22116_v29  ;;  %v9967_v21 = vsub.f32 %v21046_v7, %v21056_v38 }
 0xa3c   : > { %17880 = vmatpush3.msk.msra.mxu1 %vm18817_vm8, %v22138_v63  ;;  %17883 = vmatprep.mubr.msk.f32.mxu1 %vm22172_vm12, %v22116_v29  ;;  %vm10796_vm8 = vcmask 64512  }
 0xa3d   : > { %17881 = vmatprep.subr.mxu1 %v22116_v29  ;;  %v21071_v52 = vand.u32 4294901760, %v9967_v21  ;;  %v11247_v1 = vsel %vm10796_vm8, %v10346_v46, 0 }
 0xa3e   : > { %17882 = vmatpush3.msk.msra.mxu1 %vm18851_vm9, %v22138_v63  ;;  %v21162_v9 = vand.u32 4294901760, %v11247_v1 }
 0xa3f   : > { %17849 = vmatmul.mubr.f32.vlgmr.msra.gmra.mxu0 %v21071_v52  ;;  %17884 = vmatmul.mubr.f32.vlgmr.msra.gmra.mxu1 %v21043_v4 }
 0xa40   : > { %17893 = vmatprep.subr.mxu1 %v22116_v29  ;;  %17859 = vmatpush3.msra.mxu0 %v18869_v44 }
 0xa41   : > { %17894 = vmatpush3.msra.mxu1 %v19226_v48  ;;  %17860 = vmatprep.subr.mxu0 %v22116_v29 }
 0xa42   : > { %17895 = vmatprep.subr.mxu1 %v22116_v29  ;;  %17861 = vmatpush3.msra.mxu0 %v18900_v55 }
 0xa43   : > { %17862 = vmatprep.mubr.msk.f32.mxu0 %vm22172_vm12, %v22116_v29  ;;  %17896 = vmatpush3.msra.mxu1 %v19232_v51 }
 0xa44   : > { %17897 = vmatprep.mubr.msk.f32.mxu1 %vm22172_vm12, %v22116_v29  ;;  %17863 = vmatmul.mubr.f32.vlgmr.msra.gmra.mxu0 %v21046_v7 }
 0xa45   : > { %17872 = vmatprep.subr.mxu0 %v22116_v29  ;;  %17898 = vmatmul.mubr.f32.vlgmr.msra.gmra.mxu1 %v21043_v4 }
 0xa46   : > { %17907 = vmatprep.subr.mxu1 %v22116_v29  ;;  %17873 = vmatpush3.msra.mxu0 %v18896_v54 }
 0xa47   : > { %17908 = vmatpush3.msk.msra.mxu1 %vm19104_vm1, %v22138_v63  ;;  %17874 = vmatprep.subr.mxu0 %v22116_v29 }
 0xa48   : > { %17909 = vmatprep.subr.mxu1 %v22116_v29  ;;  %17875 = vmatpush3.msra.mxu0 %v18912_v59 }
 0xa49   : > { %17876 = vmatprep.mubr.msk.f32.mxu0 %vm22172_vm12, %v22116_v29  ;;  %17910 = vmatpush3.msk.msra.mxu1 %vm22240_vm6, %v22138_v63 }
 0xa4a   : > { %17911 = vmatprep.mubr.msk.f32.mxu1 %vm22172_vm12, %v22116_v29  ;;  %17877 = vmatmul.mubr.f32.vlgmr.msra.gmra.mxu0 %v21043_v4 }
 0xa4b   : > { %17886 = vmatprep.subr.mxu0 %v22116_v29  ;;  %17912 = vmatmul.mubr.f32.vlgmr.msra.gmra.mxu1 %v21056_v38 }
 0xa4c   : > { %17921 = vmatprep.subr.mxu1 %v22116_v29  ;;  %17887 = vmatpush3.msk.msra.mxu0 %vm19104_vm1, %v22138_v63 }
 0xa4d   : > { %17922 = vmatpush3.msk.msra.mxu1 %vm19104_vm1, %v22138_v63  ;;  %17888 = vmatprep.subr.mxu0 %v22116_v29 }
 0xa4e   : > { %17923 = vmatprep.subr.mxu1 %v22116_v29  ;;  %17889 = vmatpush3.msk.msra.mxu0 %vm22240_vm6, %v22138_v63 }
 0xa4f   : > { %17890 = vmatprep.mubr.msk.f32.mxu0 %vm22172_vm12, %v22116_v29  ;;  %17924 = vmatpush3.msk.msra.mxu1 %vm22240_vm6, %v22138_v63 }
 0xa50   : > { %17925 = vmatprep.mubr.msk.f32.mxu1 %vm22172_vm12, %v22116_v29  ;;  %17891 = vmatmul.mubr.f32.vlgmr.msra.gmra.mxu0 %v21071_v52 }
 0xa51   : > { %17900 = vmatprep.subr.mxu0 %v22116_v29  ;;  %17926 = vmatmul.mubr.f32.vlgmr.msra.gmra.mxu1 %v21043_v4 }
 0xa52   : > { %17901 = vmatpush3.msra.mxu0 %v22243_v50  ;;  %17904 = vmatprep.mubr.msk.f32.mxu0 %vm22172_vm12, %v22116_v29 }
 0xa53   : > { %17902 = vmatprep.subr.mxu0 %v22116_v29  ;;  %17933 = vmatprep.subr.mxu1 %v22116_v29 }
 0xa54   : > { %17903 = vmatpush3.msra.mxu0 %v22244_v22  ;;  %17935 = vmatprep.mubr.msk.f32.mxu1 %vm22172_vm12, %v22116_v29 }
 0xa55   : > { %17905 = vmatmul.mubr.f32.vlgmr.msra.gmra.mxu0 %v21046_v7  ;;  %17914 = vmatprep.subr.mxu0 %v22116_v29 }
 0xa56   : > { %17915 = vmatpush3.msra.mxu0 %v22247_v30  ;;  %17918 = vmatprep.mubr.msk.f32.mxu0 %vm22172_vm12, %v22116_v29  ;;  %v15832_v30 = vld [vmem:[%s22293_s5 + $0x8] sm:$0xff] }
 0xa57   : > { %17916 = vmatprep.subr.mxu0 %v22116_v29  ;;  %v10798_v41 = vsel %vm10796_vm8, %v15832_v30, 0 }
 0xa58   : > { %17917 = vmatpush3.msra.mxu0 %v22248_v62  ;;  %v21155_v35 = vand.u32 4294901760, %v10798_v41 }
 0xa59   : > { %17919 = vmatmul.mubr.f32.vlgmr.msra.gmra.mxu0 %v21043_v4  ;;  %17928 = vmatprep.subr.mxu0 %v22116_v29 }
 0xa5a   : > { %17930 = vmatprep.mubr.msk.f32.mxu0 %vm22172_vm12, %v22116_v29  ;;  %v10867_v43 = vsub.f32 %v10798_v41, %v21155_v35 }
 0xa5c   : > { %v10868_v20 = vand.u32 4294901760, %v10867_v43 }
 0xa5e   : > { %v10869_v3 = vsub.f32 %v10867_v43, %v10868_v20 }
 0xaf7   : > { %v10049_v28 = vpop.f32.mrf.mxu1 }
 0xaf9   : > { %v17857_v39 = vpop.f32.mrf.mxu1 }
 0xafa   : > { %v10870_v39 = vand.u32 4294901760, %v10869_v3 }
 0xafb   : > { %v10196_v44 = vpop.f32.mrf.mxu1 }
 0xafd   : > { %v17871_v54 = vpop.f32.mrf.mxu1 }
 0xafe   : > { %v11316_v54 = vsub.f32 %v11247_v1, %v21162_v9 }
 0xaff   : > { %v9970_v55 = vpop.f32.mrf.mxu0  ;;  %v10342_v59 = vpop.f32.mrf.mxu1 }
 0xb00   : > { %v10050_v49 = vadd.f32 %v10049_v28, %v9970_v55 }
 0xb01   : > { %v17850_v48 = vpop.f32.mrf.mxu0  ;;  %v17885_v51 = vpop.f32.mrf.mxu1 }
 0xb04   : > { %v10123_v27 = vpop.f32.mrf.mxu0 }
 0xb05   : > { %v10497_v42 = vpop.f32.mrf.mxu1  ;;  %v10124_v32 = vadd.f32 %v10123_v27, %v10050_v49  ;;  %v11317_v27 = vand.u32 4294901760, %v11316_v54  ;;  %v22297_v49 = vld [vmem:[#allocation44_spill] sm:$0xff] }
 0xb06   : > { %v17864_v50 = vpop.f32.mrf.mxu0 }
 0xb07   : > { %v17899_v22 = vpop.f32.mrf.mxu1  ;;  %v10197_v58 = vadd.f32 %v10196_v44, %v10124_v32  ;;  %v22298_v32 = vld [vmem:[#allocation49_spill] sm:$0xff] }
 0xb08   : > { %v11318_v22 = vsub.f32 %v11316_v54, %v11317_v27 }
 0xb0a   : > { %v10271_v62 = vpop.f32.mrf.mxu0 }
 0xb0b   : > { %v10644_v61 = vpop.f32.mrf.mxu1  ;;  %v10272_v45 = vadd.f32 %v10271_v62, %v10197_v58  ;;  %v11319_v62 = vand.u32 4294901760, %v11318_v22 }
 0xb0c   : > { %v17878_v13 = vpop.f32.mrf.mxu0 }
 0xb0d   : > { %v17913_v24 = vpop.f32.mrf.mxu1  ;;  %v10343_v21 = vadd.f32 %v10342_v59, %v10272_v45  ;;  %v22294_v13 = vld [vmem:[#allocation41_spill] sm:$0xff] }
 0xb0e   : > { %v22295_v24 = vld [vmem:[#allocation43_spill] sm:$0xff] }
 0xb0f   : > { %v11280_v55 = vand.u32 4294901760, %v10343_v21 }
 0xb10   : > { %v10418_v23 = vpop.f32.mrf.mxu0 }
 0xb11   : > { %v10790_v6 = vpop.f32.mrf.mxu1  ;;  %v10498_v0 = vadd.f32 %v10497_v42, %v10418_v23  ;;  %v11357_v59 = vsub.f32 %v10343_v21, %v11280_v55  ;;  %v22299_v23 = vld [vmem:[#allocation45_spill] sm:$0xff] }
 0xb12   : > { %v17892_v18 = vpop.f32.mrf.mxu0 }
 0xb13   : > { %v17927_v36 = vpop.f32.mrf.mxu1  ;;  %v11358_v30 = vand.u32 4294901760, %v11357_v59 }
 0xb15   : > { %v10571_v53 = vpop.f32.mrf.mxu0  ;;  %v11359_v41 = vsub.f32 %v11357_v59, %v11358_v30 }
 0xb16   : > { %v10572_v25 = vadd.f32 %v10571_v53, %v10498_v0 }
 0xb17   : > { %v17906_v60 = vpop.f32.mrf.mxu0 }
 0xb18   : > { %v10645_v56 = vadd.f32 %v10644_v61, %v10572_v25  ;;  %v11360_v61 = vand.u32 4294901760, %v11359_v41 }
 0xb19   : > { %v10719_v37 = vpop.f32.mrf.mxu0 }
 0xb1a   : > { %v10720_v8 = vadd.f32 %v10719_v37, %v10645_v56 }
 0xb1b   : > { %v17920_v5 = vpop.f32.mrf.mxu0 }
 0xb1c   : > { %v10791_v28 = vadd.f32 %v10790_v6, %v10720_v8 }
 0xb1e   : > { %v10831_v44 = vand.u32 4294901760, %v10791_v28 }
 0xb20   : > { %v10908_v48 = vsub.f32 %v10791_v28, %v10831_v44  ;;  %17929 = vmatpush3.msra.mxu0 %v10831_v44 }
 0xb21   : > { %17931 = vmatmul.mubr.f32.vlgmr.msra.gmra.mxu0 %v10870_v39  ;;  %17938 = vmatprep.subr.mxu0 %v22116_v29 }
 0xb22   : > { %17939 = vmatpush3.msra.mxu0 %v10908_v48  ;;  %17940 = vmatprep.mubr.msk.f32.mxu0 %vm22172_vm12, %v22116_v29  ;;  %v10909_v51 = vand.u32 4294901760, %v10908_v48 }
 0xb23   : > { %17948 = vmatprep.subr.mxu0 %v22116_v29 }
 0xb24   : > { %v10910_v42 = vsub.f32 %v10908_v48, %v10909_v51 }
 0xb25   : > { %17941 = vmatmul.mubr.f32.vlgmr.msra.gmra.mxu0 %v10867_v43 }
 0xb26   : > { %17949 = vmatpush3.msra.mxu0 %v10909_v51  ;;  %v10911_v50 = vand.u32 4294901760, %v10910_v42  ;;  %17950 = vmatprep.mubr.msk.f32.mxu0 %vm22172_vm12, %v22116_v29 }
 0xb27   : > { %17958 = vmatprep.subr.mxu0 %v22116_v29 }
 0xb28   : > { %17934 = vmatpush3.msra.mxu1 %v10911_v50 }
 0xb29   : > { %17936 = vmatmul.mubr.f32.vlgmr.msra.gmra.mxu1 %v21155_v35  ;;  %17943 = vmatprep.subr.mxu1 %v22116_v29 }
 0xb2a   : > { %17951 = vmatmul.mubr.f32.vlgmr.msra.gmra.mxu0 %v21155_v35  ;;  %17944 = vmatpush3.msra.mxu1 %v10831_v44 }
 0xb2b   : > { %17959 = vmatpush3.msra.mxu0 %v11280_v55  ;;  %17945 = vmatprep.mubr.msk.f32.mxu1 %vm22172_vm12, %v22116_v29 }
 0xb2c   : > { %17953 = vmatprep.subr.mxu1 %v22116_v29  ;;  %17960 = vmatprep.mubr.msk.f32.mxu0 %vm22172_vm12, %v22116_v29 }
 0xb2d   : > { %17968 = vmatprep.subr.mxu0 %v22116_v29  ;;  %17946 = vmatmul.mubr.f32.vlgmr.msra.gmra.mxu1 %v10868_v20 }
 0xb2e   : > { %17954 = vmatpush3.msra.mxu1 %v10831_v44  ;;  %17961 = vmatmul.mubr.f32.vlgmr.msra.gmra.mxu0 %v11319_v62 }
 0xb2f   : > { %17969 = vmatpush3.msra.mxu0 %v11357_v59  ;;  %17955 = vmatprep.mubr.msk.f32.mxu1 %vm22172_vm12, %v22116_v29  ;;  %v15839_v59 = vld [vmem:[%s22293_s5 + $0x10] sm:$0xff] }
 0xb30   : > { %17963 = vmatprep.subr.mxu1 %v22116_v29  ;;  %17970 = vmatprep.mubr.msk.f32.mxu0 %vm22172_vm12, %v22116_v29  ;;  %v12145_v41 = vsel %vm10796_vm8, %v15839_v59, 0 }
 0xb31   : > { %17978 = vmatprep.subr.mxu0 %v22116_v29  ;;  %17956 = vmatmul.mubr.f32.vlgmr.msra.gmra.mxu1 %v21155_v35  ;;  %v22296_v35 = vld [vmem:[#allocation48_spill] sm:$0xff] }
 0xb32   : > { %17964 = vmatpush3.msra.mxu1 %v11360_v61  ;;  %17971 = vmatmul.mubr.f32.vlgmr.msra.gmra.mxu0 %v11316_v54 }
 0xb33   : > { %17979 = vmatpush3.msra.mxu0 %v11358_v30  ;;  %17965 = vmatprep.mubr.msk.f32.mxu1 %vm22172_vm12, %v22116_v29 }
 0xb34   : > { %17973 = vmatprep.subr.mxu1 %v22116_v29  ;;  %17980 = vmatprep.mubr.msk.f32.mxu0 %vm22172_vm12, %v22116_v29 }
 0xb35   : > { %17966 = vmatmul.mubr.f32.vlgmr.msra.gmra.mxu1 %v21162_v9  ;;  %17988 = vmatprep.subr.mxu0 %v22116_v29 }
 0xb36   : > { %17974 = vmatpush3.msra.mxu1 %v11280_v55  ;;  %17981 = vmatmul.mubr.f32.vlgmr.msra.gmra.mxu0 %v21162_v9 }
 0xb37   : > { %17989 = vmatpush3.msk.msra.mxu0 %vm22255_vm5, %v22138_v63  ;;  %17975 = vmatprep.mubr.msk.f32.mxu1 %vm22172_vm12, %v22116_v29 }
 0xb38   : > { %17990 = vmatprep.subr.mxu0 %v22116_v29  ;;  %17983 = vmatprep.subr.mxu1 %v22116_v29 }
 0xb39   : > { %17991 = vmatpush3.msk.msra.mxu0 %vm22257_vm4, %v22138_v63  ;;  %17992 = vmatprep.mubr.msk.f32.mxu0 %vm22172_vm12, %v22116_v29 }
 0xb3a   : > { %17976 = vmatmul.mubr.f32.vlgmr.msra.gmra.mxu1 %v11317_v27  ;;  %17993 = vmatmul.mubr.f32.vlgmr.msra.gmra.mxu0 %v21071_v52 }
 0xb3b   : > { %17984 = vmatpush3.msra.mxu1 %v11280_v55  ;;  %18002 = vmatprep.subr.mxu0 %v22116_v29 }
 0xb3c   : > { %18003 = vmatpush3.msra.mxu0 %v22294_v13  ;;  %17985 = vmatprep.mubr.msk.f32.mxu1 %vm22172_vm12, %v22116_v29 }
 0xb3d   : > { %18004 = vmatprep.subr.mxu0 %v22116_v29  ;;  %18006 = vmatprep.mubr.msk.f32.mxu0 %vm22172_vm12, %v22116_v29 }
 0xb3e   : > { %18005 = vmatpush3.msra.mxu0 %v22295_v24  ;;  %17986 = vmatmul.mubr.f32.vlgmr.msra.gmra.mxu1 %v21162_v9 }
 0xb3f   : > { %17995 = vmatprep.subr.mxu1 %v22116_v29  ;;  %18007 = vmatmul.mubr.f32.vlgmr.msra.gmra.mxu0 %v21046_v7 }
 0xb40   : > { %18016 = vmatprep.subr.mxu0 %v22116_v29  ;;  %17996 = vmatpush3.msra.mxu1 %v22296_v35 }
 0xb41   : > { %18017 = vmatpush3.msra.mxu0 %v22297_v49  ;;  %17997 = vmatprep.subr.mxu1 %v22116_v29  ;;  %v12213_v49 = vand.u32 4294901760, %v12145_v41 }
 0xb42   : > { %18018 = vmatprep.subr.mxu0 %v22116_v29  ;;  %17998 = vmatpush3.msra.mxu1 %v22298_v32 }
 0xb43   : > { %17999 = vmatprep.mubr.msk.f32.mxu1 %vm22172_vm12, %v22116_v29  ;;  %18019 = vmatpush3.msra.mxu0 %v22299_v23 }
 0xb44   : > { %18020 = vmatprep.mubr.msk.f32.mxu0 %vm22172_vm12, %v22116_v29  ;;  %18000 = vmatmul.mubr.f32.vlgmr.msra.gmra.mxu1 %v21043_v4 }
 0xb45   : > { %18009 = vmatprep.subr.mxu1 %v22116_v29  ;;  %18021 = vmatmul.mubr.f32.vlgmr.msra.gmra.mxu0 %v21043_v4 }
 0xb46   : > { %18010 = vmatpush3.msk.msra.mxu1 %vm22255_vm5, %v22138_v63  ;;  %18013 = vmatprep.mubr.msk.f32.mxu1 %vm22172_vm12, %v22116_v29 }
 0xb47   : > { %18011 = vmatprep.subr.mxu1 %v22116_v29  ;;  %18030 = vmatprep.subr.mxu0 %v22116_v29 }
 0xb48   : > { %18012 = vmatpush3.msk.msra.mxu1 %vm22257_vm4, %v22138_v63  ;;  %18032 = vmatprep.mubr.msk.f32.mxu0 %vm22172_vm12, %v22116_v29 }
 0xb49   : > { %18014 = vmatmul.mubr.f32.vlgmr.msra.gmra.mxu1 %v21056_v38  ;;  %18023 = vmatprep.subr.mxu1 %v22116_v29 }
 0xb4a   : > { %18024 = vmatpush3.msk.msra.mxu1 %vm22255_vm5, %v22138_v63  ;;  %18027 = vmatprep.mubr.msk.f32.mxu1 %vm22172_vm12, %v22116_v29 }
 0xb4b   : > { %18025 = vmatprep.subr.mxu1 %v22116_v29 }
 0xb4c   : > { %18026 = vmatpush3.msk.msra.mxu1 %vm22257_vm4, %v22138_v63 }
 0xb4d   : > { %18028 = vmatmul.mubr.f32.vlgmr.msra.gmra.mxu1 %v21043_v4  ;;  %18035 = vmatprep.subr.mxu1 %v22116_v29 }
 0xb4e   : > { %18037 = vmatprep.mubr.msk.f32.mxu1 %vm22172_vm12, %v22116_v29 }
 0xbe1   : > { %v10872_v6 = vpop.f32.mrf.mxu0 }
 0xbe3   : > { %v17932_v43 = vpop.f32.mrf.mxu0 }
 0xbe5   : > { %v11022_v18 = vpop.f32.mrf.mxu0 }
 0xbe7   : > { %v17942_v36 = vpop.f32.mrf.mxu0 }
 0xbe9   : > { %v10948_v58 = vpop.f32.mrf.mxu1 }
 0xbea   : > { %v10949_v0 = vadd.f32 %v10948_v58, %v10872_v6  ;;  %v11170_v46 = vpop.f32.mrf.mxu0  ;;  %v12214_v6 = vsub.f32 %v12145_v41, %v12213_v49 }
 0xbeb   : > { %v17937_v53 = vpop.f32.mrf.mxu1 }
 0xbec   : > { %v17952_v20 = vpop.f32.mrf.mxu0  ;;  %v11023_v25 = vadd.f32 %v11022_v18, %v10949_v0  ;;  %v12215_v53 = vand.u32 4294901760, %v12214_v6 }
 0xbed   : > { %v11096_v60 = vpop.f32.mrf.mxu1 }
 0xbee   : > { %v11097_v1 = vadd.f32 %v11096_v60, %v11023_v25  ;;  %v11321_v45 = vpop.f32.mrf.mxu0 }
 0xbef   : > { %v17947_v56 = vpop.f32.mrf.mxu1 }
 0xbf0   : > { %v17962_v37 = vpop.f32.mrf.mxu0  ;;  %v11171_v3 = vadd.f32 %v11170_v46, %v11097_v1  ;;  %v12216_v1 = vsub.f32 %v12214_v6, %v12215_v53 }
 0xbf1   : > { %v11242_v8 = vpop.f32.mrf.mxu1 }
 0xbf2   : > { %v11243_v9 = vadd.f32 %v11242_v8, %v11171_v3  ;;  %v11471_v5 = vpop.f32.mrf.mxu0  ;;  %v12217_v8 = vand.u32 4294901760, %v12216_v1 }
 0xbf3   : > { %v17957_v21 = vpop.f32.mrf.mxu1 }
 0xbf4   : > { %v17972_v28 = vpop.f32.mrf.mxu0  ;;  %v11322_v39 = vadd.f32 %v11321_v45, %v11243_v9 }
 0xbf5   : > { %v11397_v44 = vpop.f32.mrf.mxu1 }
 0xbf6   : > { %v11398_v54 = vadd.f32 %v11397_v44, %v11322_v39  ;;  %v11619_v55 = vpop.f32.mrf.mxu0 }
 0xbf7   : > { %v17967_v48 = vpop.f32.mrf.mxu1 }
 0xbf8   : > { %v17982_v51 = vpop.f32.mrf.mxu0  ;;  %v11472_v27 = vadd.f32 %v11471_v5, %v11398_v54 }
 0xbfa   : > { %v11545_v42 = vpop.f32.mrf.mxu1  ;;  %v11766_v50 = vpop.f32.mrf.mxu0 }
 0xbfb   : > { %v11546_v22 = vadd.f32 %v11545_v42, %v11472_v27 }
 0xbfc   : > { %v17977_v30 = vpop.f32.mrf.mxu1  ;;  %v17994_v62 = vpop.f32.mrf.mxu0 }
 0xbfd   : > { %v11620_v61 = vadd.f32 %v11619_v55, %v11546_v22 }
 0xbfe   : > { %v11691_v13 = vpop.f32.mrf.mxu1 }
 0xbff   : > { %v21265_v24 = vadd.f32 %v11691_v13, %v11620_v61  ;;  %v11919_v35 = vpop.f32.mrf.mxu0 }
 0xc00   : > { %v17987_v32 = vpop.f32.mrf.mxu1 }
 0xc01   : > { %v18008_v23 = vpop.f32.mrf.mxu0 }
 0xc04   : > { %v11845_v43 = vpop.f32.mrf.mxu1 }
 0xc05   : > { %v11846_v18 = vadd.f32 %v11845_v43, %v11766_v50  ;;  %v12067_v36 = vpop.f32.mrf.mxu0  ;;  %v15846_v50 = vld [vmem:[%s22293_s5 + $0x18] sm:$0xff] }
 0xc06   : > { %v18001_v58 = vpop.f32.mrf.mxu1  ;;  %v13044_v13 = vsel %vm10796_vm8, %v15846_v50, 0 }
 0xc07   : > { %v18022_v0 = vpop.f32.mrf.mxu0  ;;  %v11920_v46 = vadd.f32 %v11919_v35, %v11846_v18 }
 0xc09   : > { %v11992_v20 = vpop.f32.mrf.mxu1 }
 0xc0a   : > { %v11993_v25 = vadd.f32 %v11992_v20, %v11920_v46 }
 0xc0b   : > { %v18015_v60 = vpop.f32.mrf.mxu1 }
 0xc0c   : > { %v12068_v45 = vadd.f32 %v12067_v36, %v11993_v25 }
 0xc0d   : > { %v12138_v56 = vpop.f32.mrf.mxu1 }
 0xc0e   : > { %v12139_v37 = vadd.f32 %v12138_v56, %v12068_v45 }
 0xc0f   : > { %v18029_v3 = vpop.f32.mrf.mxu1 }
 0xc10   : > { %v12178_v9 = vand.u32 4294901760, %v12139_v37 }
 0xc12   : > { %v12255_v5 = vsub.f32 %v12139_v37, %v12178_v9  ;;  %18031 = vmatpush3.msra.mxu0 %v12178_v9 }
 0xc13   : > { %18033 = vmatmul.mubr.f32.vlgmr.msra.gmra.mxu0 %v12217_v8  ;;  %18040 = vmatprep.subr.mxu0 %v22116_v29 }
 0xc14   : > { %v12256_v21 = vand.u32 4294901760, %v12255_v5  ;;  %18041 = vmatpush3.msra.mxu0 %v12255_v5  ;;  %18042 = vmatprep.mubr.msk.f32.mxu0 %vm22172_vm12, %v22116_v29 }
 0xc15   : > { %18050 = vmatprep.subr.mxu0 %v22116_v29 }
 0xc16   : > { %v12257_v28 = vsub.f32 %v12255_v5, %v12256_v21 }
 0xc17   : > { %18043 = vmatmul.mubr.f32.vlgmr.msra.gmra.mxu0 %v12214_v6  ;;  %v13112_v6 = vand.u32 4294901760, %v13044_v13 }
 0xc18   : > { %18051 = vmatpush3.msra.mxu0 %v12256_v21  ;;  %v12258_v39 = vand.u32 4294901760, %v12257_v28  ;;  %18052 = vmatprep.mubr.msk.f32.mxu0 %vm22172_vm12, %v22116_v29 }
 0xc19   : > { %18060 = vmatprep.subr.mxu0 %v22116_v29  ;;  %v13113_v58 = vsub.f32 %v13044_v13, %v13112_v6 }
 0xc1a   : > { %18036 = vmatpush3.msra.mxu1 %v12258_v39 }
 0xc1b   : > { %18038 = vmatmul.mubr.f32.vlgmr.msra.gmra.mxu1 %v12213_v49  ;;  %18045 = vmatprep.subr.mxu1 %v22116_v29  ;;  %v13114_v1 = vand.u32 4294901760, %v13113_v58 }
 0xc1c   : > { %18053 = vmatmul.mubr.f32.vlgmr.msra.gmra.mxu0 %v12213_v49  ;;  %18046 = vmatpush3.msra.mxu1 %v12178_v9 }
 0xc1d   : > { %18061 = vmatpush3.msk.msra.mxu0 %vm22270_vm14, %v22138_v63  ;;  %18047 = vmatprep.mubr.msk.f32.mxu1 %vm22172_vm12, %v22116_v29  ;;  %v13115_v3 = vsub.f32 %v13113_v58, %v13114_v1 }
 0xc1e   : > { %18062 = vmatprep.subr.mxu0 %v22116_v29  ;;  %18055 = vmatprep.subr.mxu1 %v22116_v29 }
 0xc1f   : > { %18063 = vmatpush3.msk.msra.mxu0 %vm22271_vm7, %v22138_v63  ;;  %18064 = vmatprep.mubr.msk.f32.mxu0 %vm22172_vm12, %v22116_v29  ;;  %v13116_v28 = vand.u32 4294901760, %v13115_v3 }
 0xc20   : > { %18048 = vmatmul.mubr.f32.vlgmr.msra.gmra.mxu1 %v12215_v53  ;;  %18065 = vmatmul.mubr.f32.vlgmr.msra.gmra.mxu0 %v21071_v52 }
 0xc21   : > { %18056 = vmatpush3.msra.mxu1 %v12178_v9  ;;  %18074 = vmatprep.subr.mxu0 %v22116_v29 }
 0xc22   : > { %18075 = vmatpush3.msra.mxu0 %v22274_v16  ;;  %18057 = vmatprep.mubr.msk.f32.mxu1 %vm22172_vm12, %v22116_v29  ;;  %v22300_v16 = vld [vmem:[#allocation65_spill] sm:$0xff] }
 0xc23   : > { %18076 = vmatprep.subr.mxu0 %v22116_v29  ;;  %18078 = vmatprep.mubr.msk.f32.mxu0 %vm22172_vm12, %v22116_v29 }
 0xc24   : > { %18077 = vmatpush3.msra.mxu0 %v22277_v12  ;;  %18058 = vmatmul.mubr.f32.vlgmr.msra.gmra.mxu1 %v12213_v49  ;;  %v22301_v12 = vld [vmem:[#allocation62_spill] sm:$0xff] }
 0xc25   : > { %18067 = vmatprep.subr.mxu1 %v22116_v29  ;;  %18079 = vmatmul.mubr.f32.vlgmr.msra.gmra.mxu0 %v21046_v7 }
 0xc26   : > { %18088 = vmatprep.subr.mxu0 %v22116_v29  ;;  %18068 = vmatpush3.msra.mxu1 %v22275_v34 }
 0xc27   : > { %18089 = vmatpush3.msra.mxu0 %v22280_v57  ;;  %18069 = vmatprep.subr.mxu1 %v22116_v29 }
 0xc28   : > { %18090 = vmatprep.subr.mxu0 %v22116_v29  ;;  %18070 = vmatpush3.msra.mxu1 %v22300_v16 }
 0xc29   : > { %18071 = vmatprep.mubr.msk.f32.mxu1 %vm22172_vm12, %v22116_v29  ;;  %18091 = vmatpush3.msra.mxu0 %v22301_v12 }
 0xc2a   : > { %18092 = vmatprep.mubr.msk.f32.mxu0 %vm22172_vm12, %v22116_v29  ;;  %18072 = vmatmul.mubr.f32.vlgmr.msra.gmra.mxu1 %v21043_v4 }
 0xc2b   : > { %18081 = vmatprep.subr.mxu1 %v22116_v29  ;;  %18093 = vmatmul.mubr.f32.vlgmr.msra.gmra.mxu0 %v21043_v4 }
 0xc2c   : > { %18082 = vmatpush3.msk.msra.mxu1 %vm22270_vm14, %v22138_v63  ;;  %18085 = vmatprep.mubr.msk.f32.mxu1 %vm22172_vm12, %v22116_v29 }
 0xc2d   : > { %18083 = vmatprep.subr.mxu1 %v22116_v29  ;;  %18102 = vmatprep.subr.mxu0 %v22116_v29 }
 0xc2e   : > { %18084 = vmatpush3.msk.msra.mxu1 %vm22271_vm7, %v22138_v63  ;;  %18104 = vmatprep.mubr.msk.f32.mxu0 %vm22172_vm12, %v22116_v29 }
 0xc2f   : > { %18086 = vmatmul.mubr.f32.vlgmr.msra.gmra.mxu1 %v21056_v38  ;;  %18095 = vmatprep.subr.mxu1 %v22116_v29 }
 0xc30   : > { %18096 = vmatpush3.msk.msra.mxu1 %vm22270_vm14, %v22138_v63  ;;  %18099 = vmatprep.mubr.msk.f32.mxu1 %vm22172_vm12, %v22116_v29 }
 0xc31   : > { %18097 = vmatprep.subr.mxu1 %v22116_v29 }
 0xc32   : > { %18098 = vmatpush3.msk.msra.mxu1 %vm22271_vm7, %v22138_v63 }
 0xc33   : > { %18100 = vmatmul.mubr.f32.vlgmr.msra.gmra.mxu1 %v21043_v4  ;;  %18107 = vmatprep.subr.mxu1 %v22116_v29 }
 0xc34   : > { %18109 = vmatprep.mubr.msk.f32.mxu1 %vm22172_vm12, %v22116_v29 }
 0xcd3   : > { %v12219_v34 = vpop.f32.mrf.mxu0 }
 0xcd5   : > { %v18034_v57 = vpop.f32.mrf.mxu0 }
 0xcd7   : > { %v12369_v44 = vpop.f32.mrf.mxu0 }
 0xcd9   : > { %v18044_v54 = vpop.f32.mrf.mxu0 }
 0xcdb   : > { %v12295_v55 = vpop.f32.mrf.mxu1 }
 0xcdc   : > { %v12296_v48 = vadd.f32 %v12295_v55, %v12219_v34  ;;  %v12517_v51 = vpop.f32.mrf.mxu0 }
 0xcdd   : > { %v18039_v27 = vpop.f32.mrf.mxu1 }
 0xcde   : > { %v18054_v59 = vpop.f32.mrf.mxu0  ;;  %v12370_v42 = vadd.f32 %v12369_v44, %v12296_v48 }
 0xce0   : > { %v12443_v22 = vpop.f32.mrf.mxu1  ;;  %v12665_v30 = vpop.f32.mrf.mxu0 }
 0xce1   : > { %v12444_v62 = vadd.f32 %v12443_v22, %v12370_v42 }
 0xce2   : > { %v18049_v41 = vpop.f32.mrf.mxu1  ;;  %v18066_v61 = vpop.f32.mrf.mxu0 }
 0xce3   : > { %v12518_v35 = vadd.f32 %v12517_v51, %v12444_v62 }
 0xce4   : > { %v12589_v49 = vpop.f32.mrf.mxu1 }
 0xce5   : > { %v12590_v32 = vadd.f32 %v12589_v49, %v12518_v35  ;;  %v12818_v23 = vpop.f32.mrf.mxu0 }
 0xce6   : > { %v18059_v43 = vpop.f32.mrf.mxu1 }
 0xce7   : > { %v21344_v18 = vadd.f32 %v12590_v32, %v21265_v24  ;;  %v18080_v36 = vpop.f32.mrf.mxu0 }
 0xcea   : > { %v12744_v0 = vpop.f32.mrf.mxu1 }
 0xceb   : > { %v12745_v46 = vadd.f32 %v12744_v0, %v12665_v30  ;;  %v12966_v53 = vpop.f32.mrf.mxu0 }
 0xcec   : > { %v18073_v20 = vpop.f32.mrf.mxu1 }
 0xced   : > { %v18094_v25 = vpop.f32.mrf.mxu0  ;;  %v12819_v60 = vadd.f32 %v12818_v23, %v12745_v46 }
 0xcef   : > { %v12891_v45 = vpop.f32.mrf.mxu1 }
 0xcf0   : > { %v12892_v56 = vadd.f32 %v12891_v45, %v12819_v60 }
 0xcf1   : > { %v18087_v37 = vpop.f32.mrf.mxu1 }
 0xcf2   : > { %v12967_v8 = vadd.f32 %v12966_v53, %v12892_v56 }
 0xcf3   : > { %v13037_v9 = vpop.f32.mrf.mxu1 }
 0xcf4   : > { %v13038_v5 = vadd.f32 %v13037_v9, %v12967_v8 }
 0xcf5   : > { %v18101_v21 = vpop.f32.mrf.mxu1 }
 0xcf6   : > { %v13077_v24 = vand.u32 4294901760, %v13038_v5 }
 0xcf8   : > { %v13154_v39 = vsub.f32 %v13038_v5, %v13077_v24  ;;  %18103 = vmatpush3.msra.mxu0 %v13077_v24  ;;  %v14403_v5 = vld [vmem:[%s22303_s7] sm:$0x1] }
 0xcf9   : > { %18105 = vmatmul.mubr.f32.vlgmr.msra.gmra.mxu0 %v13116_v28  ;;  %18112 = vmatprep.subr.mxu0 %v22116_v29 }
 0xcfa   : > { %v13155_v16 = vand.u32 4294901760, %v13154_v39  ;;  %18113 = vmatpush3.msra.mxu0 %v13154_v39  ;;  %18114 = vmatprep.mubr.msk.f32.mxu0 %vm22172_vm12, %v22116_v29 }
 0xcfb   : > { %18122 = vmatprep.subr.mxu0 %v22116_v29 }
 0xcfc   : > { %v13156_v12 = vsub.f32 %v13154_v39, %v13155_v16 }
 0xcfd   : > { %18115 = vmatmul.mubr.f32.vlgmr.msra.gmra.mxu0 %v13113_v58 }
 0xcfe   : > { %18123 = vmatpush3.msra.mxu0 %v13155_v16  ;;  %v13157_v34 = vand.u32 4294901760, %v13156_v12  ;;  %18124 = vmatprep.mubr.msk.f32.mxu0 %vm22172_vm12, %v22116_v29 }
 0xcff   : > { %18132 = vmatprep.subr.mxu0 %v22116_v29 }
 0xd00   : > { %18108 = vmatpush3.msra.mxu1 %v13157_v34 }
 0xd01   : > { %18110 = vmatmul.mubr.f32.vlgmr.msra.gmra.mxu1 %v13112_v6  ;;  %18117 = vmatprep.subr.mxu1 %v22116_v29 }
 0xd02   : > { %18125 = vmatmul.mubr.f32.vlgmr.msra.gmra.mxu0 %v13112_v6  ;;  %18118 = vmatpush3.msra.mxu1 %v13077_v24 }
 0xd03   : > { %18133 = vmatpush3.msk.msra.mxu0 %vm20132_vm0, %v22138_v63  ;;  %18119 = vmatprep.mubr.msk.f32.mxu1 %vm22172_vm12, %v22116_v29 }
 0xd04   : > { %18134 = vmatprep.subr.mxu0 %v22116_v29  ;;  %18127 = vmatprep.subr.mxu1 %v22116_v29 }
 0xd05   : > { %18135 = vmatpush3.msk.msra.mxu0 %vm22284_vm3, %v22138_v63  ;;  %18136 = vmatprep.mubr.msk.f32.mxu0 %vm22172_vm12, %v22116_v29 }
 0xd06   : > { %18120 = vmatmul.mubr.f32.vlgmr.msra.gmra.mxu1 %v13114_v1  ;;  %18137 = vmatmul.mubr.f32.vlgmr.msra.gmra.mxu0 %v21071_v52  ;;  %v15853_v52 = vld [vmem:[%s22293_s5 + $0x20] sm:$0xff]  ;;  %s18420_s5 = scalar_lea.vmem %s18419_s4, 256 }
 0xd07   : > { %18128 = vmatpush3.msra.mxu1 %v13077_v24  ;;  %18146 = vmatprep.subr.mxu0 %v22116_v29  ;;  %v13943_v51 = vsel %vm10796_vm8, %v15853_v52, 0  ;;  %v14414_v24 = vsel %vm10796_vm8, %v14403_v5, 0  ;;  %p18422_p1 = scmp.lt.s32.totalorder %s18420_s5, %s18414_s2 }
 0xd08   : > { %18147 = vmatpush3.msra.mxu0 %v20189_v26  ;;  %18129 = vmatprep.mubr.msk.f32.mxu1 %vm22172_vm12, %v22116_v29  ;;  %v14402_v26 = vld [vmem:[#allocation2] sm:$0x1]  ;;  %v14011_v22 = vand.u32 4294901760, %v13943_v51  ;;  %v21450_v12 = vand.u32 4294901760, %v14414_v24 }
 0xd09   : > { %18148 = vmatprep.subr.mxu0 %v22116_v29  ;;  %18150 = vmatprep.mubr.msk.f32.mxu0 %vm22172_vm12, %v22116_v29  ;;  %p18423_p2 = por %p18422_p1, %p18421_p0 }
 0xd0a   : > { %18149 = vmatpush3.msra.mxu0 %v22286_v47  ;;  %18130 = vmatmul.mubr.f32.vlgmr.msra.gmra.mxu1 %v13112_v6  ;;  %v14012_v61 = vsub.f32 %v13943_v51, %v14011_v22  ;;  %v22306_v51 = vld [vmem:[#allocation30_spill] sm:$0xff] }
 0xd0b   : > { %18139 = vmatprep.subr.mxu1 %v22116_v29  ;;  %18151 = vmatmul.mubr.f32.vlgmr.msra.gmra.mxu0 %v21046_v7  ;;  %p18424_p3 = pnand %p18423_p2, %p18417_p13 }
 0xd0c   : > { %18160 = vmatprep.subr.mxu0 %v22116_v29  ;;  %18140 = vmatpush3.msra.mxu1 %v20249_v33  ;;  %v14013_v43 = vand.u32 4294901760, %v14012_v61 }
 0xd0d   : > { %18161 = vmatpush3.msra.mxu0 %v22289_v17  ;;  %18141 = vmatprep.subr.mxu1 %v22116_v29 }
 0xd0e   : > { %18162 = vmatprep.subr.mxu0 %v22116_v29  ;;  %18142 = vmatpush3.msra.mxu1 %v22285_v19  ;;  %v14014_v46 = vsub.f32 %v14012_v61, %v14013_v43 }
 0xd0f   : > { %18143 = vmatprep.mubr.msk.f32.mxu1 %vm22172_vm12, %v22116_v29  ;;  %18163 = vmatpush3.msra.mxu0 %v22290_v11 }
 0xd10   : > { %18164 = vmatprep.mubr.msk.f32.mxu0 %vm22172_vm12, %v22116_v29  ;;  %18144 = vmatmul.mubr.f32.vlgmr.msra.gmra.mxu1 %v21043_v4  ;;  %v14015_v1 = vand.u32 4294901760, %v14014_v46 }
 0xd11   : > { %18153 = vmatprep.subr.mxu1 %v22116_v29  ;;  %18165 = vmatmul.mubr.f32.vlgmr.msra.gmra.mxu0 %v21043_v4 }
 0xd12   : > { %18154 = vmatpush3.msk.msra.mxu1 %vm20132_vm0, %v22138_v63  ;;  %18157 = vmatprep.mubr.msk.f32.mxu1 %vm22172_vm12, %v22116_v29 }
 0xd13   : > { %18155 = vmatprep.subr.mxu1 %v22116_v29  ;;  %18174 = vmatprep.subr.mxu0 %v22116_v29 }
 0xd14   : > { %18156 = vmatpush3.msk.msra.mxu1 %vm22284_vm3, %v22138_v63  ;;  %18176 = vmatprep.mubr.msk.f32.mxu0 %vm22172_vm12, %v22116_v29 }
 0xd15   : > { %18158 = vmatmul.mubr.f32.vlgmr.msra.gmra.mxu1 %v21056_v38  ;;  %18167 = vmatprep.subr.mxu1 %v22116_v29 }
 0xd16   : > { %18168 = vmatpush3.msk.msra.mxu1 %vm20132_vm0, %v22138_v63  ;;  %18171 = vmatprep.mubr.msk.f32.mxu1 %vm22172_vm12, %v22116_v29  ;;  %vm22307_vm0 = vnez %v22306_v51 }
 0xd17   : > { %18169 = vmatprep.subr.mxu1 %v22116_v29  ;;  %14406 = vperm.xlu1 %18413, %v14402_v26  }
 0xd18   : > { %18170 = vmatpush3.msk.msra.mxu1 %vm22284_vm3, %v22138_v63 }
 0xd19   : > { %18172 = vmatmul.mubr.f32.vlgmr.msra.gmra.mxu1 %v21043_v4  ;;  %18179 = vmatprep.subr.mxu1 %v22116_v29 }
 0xd1a   : > { %18181 = vmatprep.mubr.msk.f32.mxu1 %vm22172_vm12, %v22116_v29 }
 0xdb9   : > { %v13118_v33 = vpop.f32.mrf.mxu0 }
 0xdbb   : > { %v18106_v19 = vpop.f32.mrf.mxu0 }
 0xdbd   : > { %v13268_v47 = vpop.f32.mrf.mxu0 }
 0xdbf   : > { %v18116_v17 = vpop.f32.mrf.mxu0 }
 0xdc0   : > { %v21453_v17 = vsub.f32 %v14414_v24, %v21450_v12 }
 0xdc1   : > { %v13194_v15 = vpop.f32.mrf.mxu1 }
 0xdc2   : > { %v13195_v63 = vadd.f32 %v13194_v15, %v13118_v33  ;;  %v13416_v11 = vpop.f32.mrf.mxu0 }
 0xdc3   : > { %v18111_v4 = vpop.f32.mrf.mxu1 }
 0xdc4   : > { %v18126_v7 = vpop.f32.mrf.mxu0  ;;  %v13269_v38 = vadd.f32 %v13268_v47, %v13195_v63 }
 0xdc5   : > { %v14484_v7 = vand.u32 4294901760, %v21453_v17 }
 0xdc6   : > { %v13342_v57 = vpop.f32.mrf.mxu1  ;;  %v13564_v44 = vpop.f32.mrf.mxu0 }
 0xdc7   : > { %v13343_v54 = vadd.f32 %v13342_v57, %v13269_v38  ;;  %v14395_v57 = vpop.permute.xlu1 %14394 }
 0xdc8   : > { %v18121_v55 = vpop.f32.mrf.mxu1  ;;  %v18138_v48 = vpop.f32.mrf.mxu0 }
 0xdc9   : > { %v13417_v27 = vadd.f32 %v13416_v11, %v13343_v54  ;;  %v14485_v54 = vsub.f32 %v21453_v17, %v14484_v7  ;;  %v22304_v48 = vld [vmem:[#allocation50_spill] sm:$0xff] }
 0xdca   : > { %v13488_v59 = vpop.f32.mrf.mxu1  ;;  %vm22305_vm1 = vnez %v22304_v48 }
 0xdcb   : > { %v13489_v42 = vadd.f32 %v13488_v59, %v13417_v27  ;;  %v13717_v50 = vpop.f32.mrf.mxu0  ;;  %vm21470_vm6 = vmor %vm22307_vm0, %vm22305_vm1 }
 0xdcc   : > { %v18131_v30 = vpop.f32.mrf.mxu1 }
 0xdcd   : > { %v21426_v62 = vadd.f32 %v13489_v42, %v21344_v18  ;;  %v18152_v41 = vpop.f32.mrf.mxu0  ;;  %v14486_v42 = vand.u32 4294901760, %v14485_v54  ;;  %v22312_v30 = vld [vmem:[#allocation31_spill] sm:$0xff] }
 0xdce   : > { %vm22313_vm10 = vnez %v22312_v30  ;;  %v14879_v41 = vsel %vm21470_vm6, 0.5, %v22116_v29  ;;  %v22343_v30 = vld [vmem:[#allocation15_spill] sm:$0xff] }
 0xdd0   : > { %v13643_v13 = vpop.f32.mrf.mxu1 }
 0xdd1   : > { %v13644_v35 = vadd.f32 %v13643_v13, %v13564_v44  ;;  %v13865_v49 = vpop.f32.mrf.mxu0  ;;  %v22316_v13 = vld [vmem:[#allocation52_spill] sm:$0xff] }
 0xdd2   : > { %v18145_v32 = vpop.f32.mrf.mxu1  ;;  %vm22317_vm11 = vnez %v22316_v13 }
 0xdd3   : > { %v18166_v23 = vpop.f32.mrf.mxu0  ;;  %v13718_v6 = vadd.f32 %v13717_v50, %v13644_v35  ;;  %v22318_v35 = vld [vmem:[#allocation32_spill] sm:$0xff] }
 0xdd5   : > { %v13790_v36 = vpop.f32.mrf.mxu1 }
 0xdd6   : > { %v13791_v58 = vadd.f32 %v13790_v36, %v13718_v6  ;;  %v21499_v6 = vsub.f32 %v14879_v41, %v14879_v41  ;;  %v22324_v36 = vld [vmem:[#allocation33_spill] sm:$0xff]  ;;  %v22344_v41 = vld [vmem:[#allocation16_spill] sm:$0xff] }
 0xdd7   : > { %v18159_v0 = vpop.f32.mrf.mxu1  ;;  %vm22325_vm0 = vnez %v22324_v36 }
 0xdd8   : > { %v13866_v53 = vadd.f32 %v13865_v49, %v13791_v58 }
 0xdd9   : > { %v13936_v20 = vpop.f32.mrf.mxu1 }
 0xdda   : > { %v13937_v25 = vadd.f32 %v13936_v20, %v13866_v53 }
 0xddb   : > { %v18173_v60 = vpop.f32.mrf.mxu1 }
 0xddc   : > { %v13976_v18 = vand.u32 4294901760, %v13937_v25 }
 0xdde   : > { %v14053_v45 = vsub.f32 %v13937_v25, %v13976_v18  ;;  %18175 = vmatpush3.msra.mxu0 %v13976_v18 }
 0xddf   : > { %18177 = vmatmul.mubr.f32.vlgmr.msra.gmra.mxu0 %v14015_v1  ;;  %18184 = vmatprep.subr.mxu0 %v22116_v29 }
 0xde0   : > { %v14054_v56 = vand.u32 4294901760, %v14053_v45  ;;  %18185 = vmatpush3.msra.mxu0 %v14053_v45  ;;  %18186 = vmatprep.mubr.msk.f32.mxu0 %vm22172_vm12, %v22116_v29 }
 0xde1   : > { %18194 = vmatprep.subr.mxu0 %v22116_v29 }
 0xde2   : > { %v14055_v37 = vsub.f32 %v14053_v45, %v14054_v56 }
 0xde3   : > { %18187 = vmatmul.mubr.f32.vlgmr.msra.gmra.mxu0 %v14012_v61 }
 0xde4   : > { %18195 = vmatpush3.msra.mxu0 %v14054_v56  ;;  %v14056_v3 = vand.u32 4294901760, %v14055_v37  ;;  %18196 = vmatprep.mubr.msk.f32.mxu0 %vm22172_vm12, %v22116_v29  ;;  %v14973_v56 = vand.u32 4294901760, %v21499_v6  ;;  %v22332_v37 = vld [vmem:[#allocation55_spill] sm:$0xff] }
 0xde5   : > { %18204 = vmatprep.subr.mxu0 %v22116_v29 }
 0xde6   : > { %18180 = vmatpush3.msra.mxu1 %v14056_v3  ;;  %v22334_v3 = vld [vmem:[#allocation35_spill] sm:$0xff]  ;;  %v14974_v24 = vsub.f32 %v21499_v6, %v14973_v56 }
 0xde7   : > { %18182 = vmatmul.mubr.f32.vlgmr.msra.gmra.mxu1 %v14011_v22  ;;  %18189 = vmatprep.subr.mxu1 %v22116_v29 }
 0xde8   : > { %18190 = vmatpush3.msra.mxu1 %v13976_v18  ;;  %18191 = vmatprep.mubr.msk.f32.mxu1 %vm22172_vm12, %v22116_v29 }
 0xde9   : > { %18199 = vmatprep.subr.mxu1 %v22116_v29  ;;  %18197 = vmatmul.mubr.f32.vlgmr.msra.gmra.mxu0 %v14011_v22 }
 0xdea   : > { %18206 = vmatprep.mubr.msk.f32.mxu0 %vm22172_vm12, %v22116_v29 }
 0xdeb   : > { %18192 = vmatmul.mubr.f32.vlgmr.msra.gmra.mxu1 %v14013_v43  ;;  %v22322_v43 = vld [vmem:[#allocation53_spill] sm:$0xff] }
 0xdec   : > { %18200 = vmatpush3.msra.mxu1 %v13976_v18  ;;  %18201 = vmatprep.mubr.msk.f32.mxu1 %vm22172_vm12, %v22116_v29  ;;  %vm22323_vm1 = vnez %v22322_v43 }
 0xded   : > { %18209 = vmatprep.subr.mxu1 %v22116_v29 }
 0xdef   : > { %18202 = vmatmul.mubr.f32.vlgmr.msra.gmra.mxu1 %v14011_v22  ;;  %v22310_v22 = vld [vmem:[#allocation51_spill] sm:$0xff] }
 0xdf0   : > { %18211 = vmatprep.mubr.msk.f32.mxu1 %vm22172_vm12, %v22116_v29  ;;  %vm22311_vm3 = vnez %v22310_v22 }
 0xdf1   : > { %vm21478_vm13 = vmor %vm22313_vm10, %vm22311_vm3 }
 0xdf2   : > { %v14878_v32 = vsel %vm21478_vm13, 0.5, %v22116_v29  ;;  %vm21505_vm3 = vmor %vm22325_vm0, %vm22323_vm1 }
 0xdf3   : > { %v21513_v53 = vsub.f32 %v14878_v32, %v14878_v32  ;;  %v14876_v20 = vsel %vm21505_vm3, 0.5, %v22116_v29  ;;  %vm21523_vm10 = vmor %vm22251_vm15, %vm19787_vm2 }
 0xdf4   : > { %v14875_v5 = vsel %vm21523_vm10, 0.5, %v22116_v29  ;;  %vm21553_vm2 = vmor %vm22255_vm5, %vm22270_vm14 }
 0xdf5   : > { %v21570_v10 = vsub.f32 %v14875_v5, %v14875_v5  ;;  %vm21576_vm14 = vmor %vm22257_vm4, %vm22271_vm7 }
 0xe9f   : > { %v14017_v8 = vpop.f32.mrf.mxu0 }
 0xea1   : > { %v18178_v9 = vpop.f32.mrf.mxu0 }
 0xea2   : > { %v21541_v9 = vsub.f32 %v14876_v20, %v14876_v20 }
 0xea3   : > { %v14167_v21 = vpop.f32.mrf.mxu0 }
 0xea4   : > { %v14991_v31 = vand.u32 4294901760, %v21541_v9 }
 0xea5   : > { %v18188_v28 = vpop.f32.mrf.mxu0 }
 0xea7   : > { %v14093_v39 = vpop.f32.mrf.mxu1 }
 0xea8   : > { %v14094_v16 = vadd.f32 %v14093_v39, %v14017_v8 }
 0xea9   : > { %v18183_v34 = vpop.f32.mrf.mxu1  ;;  %v14315_v14 = vpop.f32.mrf.mxu0 }
 0xeaa   : > { %v14168_v26 = vadd.f32 %v14167_v21, %v14094_v16  ;;  %v14979_v21 = vand.u32 4294901760, %v21513_v53 }
 0xeab   : > { %v14241_v33 = vpop.f32.mrf.mxu1  ;;  %v18198_v19 = vpop.f32.mrf.mxu0 }
 0xeac   : > { %v14242_v47 = vadd.f32 %v14241_v33, %v14168_v26  ;;  %v14873_v26 = vsel %vm21553_vm2, 0.5, %v22116_v29  ;;  %v14975_v33 = vand.u32 4294901760, %v14974_v24 }
 0xead   : > { %v18193_v15 = vpop.f32.mrf.mxu1 }
 0xeae   : > { %v14316_v63 = vadd.f32 %v14315_v14, %v14242_v47  ;;  %v14980_v14 = vsub.f32 %v21513_v53, %v14979_v21  ;;  %v14872_v47 = vsel %vm21576_vm14, 0.5, %v22116_v29  ;;  %v14997_v15 = vand.u32 4294901760, %v21570_v10 }
 0xeaf   : > { %v14387_v11 = vpop.f32.mrf.mxu1 }
 0xeb0   : > { %v14388_v4 = vadd.f32 %v14387_v11, %v14316_v63  ;;  %v14981_v63 = vand.u32 4294901760, %v14980_v14  ;;  %v14992_v11 = vsub.f32 %v21541_v9, %v14991_v31 }
 0xeb1   : > { %v18203_v38 = vpop.f32.mrf.mxu1 }
 0xeb2   : > { %v14391_v52 = vadd.f32 %v14388_v4, %v21426_v62  ;;  %v21620_v4 = vsub.f32 %v14872_v47, %v14872_v47 }
 0xeb4   : > { %v14397_v44 = vadd.f32 %v14395_v57, %v14391_v52  ;;  %v14998_v52 = vsub.f32 %v21570_v10, %v14997_v15  ;;  %v14993_v57 = vand.u32 4294901760, %v14992_v11  ;;  %v15015_v54 = vand.u32 4294901760, %v21620_v4 }
 0xeb6   : > { %v14400_v55 = vmul.f32 0.2, %v14397_v44  ;;  %vm14399_vm9 = vcmp.gt.f32.partialorder %v14397_v44, 0.0  ;;  %14398 = vst.msk [vmem:[%s21462_s17] sm:$0xff] %vm10796_vm8, %v14397_v44  ;;  %vm22319_vm8 = vnez %v22318_v35 }
 0xeb8   : > { %v14401_v59 = vsel %vm14399_vm9, %v14397_v44, %v14400_v55  ;;  %vm21489_vm9 = vmor %vm22319_vm8, %vm22317_vm11  ;;  %vm22333_vm11 = vnez %v22332_v37  ;;  %vm22335_vm8 = vnez %v22334_v3  ;;  %v14999_v55 = vand.u32 4294901760, %v14998_v52 }
 0xeb9   : > { %v14447_v50 = vand.u32 4294901760, %v14401_v59  ;;  %v14877_v0 = vsel %vm21489_vm9, 0.5, %v22116_v29  ;;  %vm21537_vm1 = vmor %vm22335_vm8, %vm22333_vm11 }
 0xeba   : > { %v21529_v45 = vsub.f32 %v14877_v0, %v14877_v0  ;;  %v14874_v39 = vsel %vm21537_vm1, 0.5, %v22116_v29 }
 0xebb   : > { %18205 = vmatpush3.msra.mxu0 %v14447_v50  ;;  %v14524_v61 = vsub.f32 %v14401_v59, %v14447_v50  ;;  %v21594_v40 = vsub.f32 %v14874_v39, %v14874_v39  ;;  %v15016_v59 = vsub.f32 %v21620_v4, %v15015_v54 }
 0xebc   : > { %18207 = vmatmul.mubr.f32.vlgmr.msra.gmra.mxu0 %v14486_v42  ;;  %18214 = vmatprep.subr.mxu0 %v22116_v29  ;;  %v14985_v16 = vand.u32 4294901760, %v21529_v45  ;;  %v22342_v42 = vld [vmem:[#allocation18_spill] sm:$0xff] }
 0xebd   : > { %18215 = vmatpush3.msra.mxu0 %v14524_v61  ;;  %18216 = vmatprep.mubr.msk.f32.mxu0 %vm22172_vm12, %v22116_v29  ;;  %v14525_v23 = vand.u32 4294901760, %v14524_v61  ;;  %v15017_v22 = vand.u32 4294901760, %v15016_v59 }
 0xebe   : > { %18224 = vmatprep.subr.mxu0 %v22116_v29  ;;  %v14986_v19 = vsub.f32 %v21529_v45, %v14985_v16 }
 0xebf   : > { %v14526_v46 = vsub.f32 %v14524_v61, %v14525_v23  ;;  %v22345_v61 = vld [vmem:[#allocation17_spill] sm:$0xff] }
 0xec0   : > { %18217 = vmatmul.mubr.f32.vlgmr.msra.gmra.mxu0 %v21453_v17  ;;  %v21608_v17 = vsub.f32 %v14873_v26, %v14873_v26  ;;  %v14987_v38 = vand.u32 4294901760, %v14986_v19 }
 0xec1   : > { %18225 = vmatpush3.msra.mxu0 %v14525_v23  ;;  %v14527_v18 = vand.u32 4294901760, %v14526_v46  ;;  %18226 = vmatprep.mubr.msk.f32.mxu0 %vm22172_vm12, %v22116_v29 }
 0xec2   : > { %18234 = vmatprep.subr.mxu0 %v22116_v29 }
 0xec3   : > { %18210 = vmatpush3.msra.mxu1 %v14527_v18 }
 0xec4   : > { %18212 = vmatmul.mubr.f32.vlgmr.msra.gmra.mxu1 %v21450_v12  ;;  %18219 = vmatprep.subr.mxu1 %v22116_v29 }
 0xec5   : > { %18227 = vmatmul.mubr.f32.vlgmr.msra.gmra.mxu0 %v21450_v12  ;;  %18220 = vmatpush3.msra.mxu1 %v14447_v50 }
 0xec6   : > { %18235 = vmatpush3.msk.msra.mxu0 %vm21470_vm6, %v18592_v2  ;;  %18221 = vmatprep.mubr.msk.f32.mxu1 %vm22172_vm12, %v22116_v29 }
 0xec7   : > { %18236 = vmatprep.subr.mxu0 %v22116_v29  ;;  %18229 = vmatprep.subr.mxu1 %v22116_v29 }
 0xec8   : > { %18237 = vmatpush3.msk.msra.mxu0 %vm21478_vm13, %v18592_v2  ;;  %18222 = vmatmul.mubr.f32.vlgmr.msra.gmra.mxu1 %v14484_v7  ;;  %v15003_v7 = vand.u32 4294901760, %v21594_v40 }
 0xec9   : > { %18238 = vmatprep.subr.mxu0 %v22116_v29  ;;  %18230 = vmatpush3.msra.mxu1 %v14447_v50 }
 0xeca   : > { %18239 = vmatpush3.msk.msra.mxu0 %vm21489_vm9, %v18592_v2  ;;  %18231 = vmatprep.mubr.msk.f32.mxu1 %vm22172_vm12, %v22116_v29  ;;  %v15004_v44 = vsub.f32 %v21594_v40, %v15003_v7 }
 0xecb   : > { %18240 = vmatprep.subr.mxu0 %v22116_v29  ;;  %18253 = vmatprep.subr.mxu1 %v22116_v29 }
 0xecc   : > { %18241 = vmatpush3.msk.msra.mxu0 %vm21505_vm3, %v18592_v2  ;;  %18232 = vmatmul.mubr.f32.vlgmr.msra.gmra.mxu1 %v21450_v12  ;;  %v15009_v12 = vand.u32 4294901760, %v21608_v17  ;;  %v15005_v51 = vand.u32 4294901760, %v15004_v44 }
 0xecd   : > { %18242 = vmatprep.subr.mxu0 %v22116_v29  ;;  %18254 = vmatpush3.msra.mxu1 %v14975_v33 }
 0xece   : > { %18243 = vmatpush3.msk.msra.mxu0 %vm21523_vm10, %v18592_v2  ;;  %18255 = vmatprep.subr.mxu1 %v22116_v29  ;;  %v15010_v48 = vsub.f32 %v21608_v17, %v15009_v12 }
 0xecf   : > { %18244 = vmatprep.subr.mxu0 %v22116_v29  ;;  %18256 = vmatpush3.msra.mxu1 %v14981_v63 }
 0xed0   : > { %18245 = vmatpush3.msk.msra.mxu0 %vm21537_vm1, %v18592_v2  ;;  %18257 = vmatprep.subr.mxu1 %v22116_v29  ;;  %v15011_v50 = vand.u32 4294901760, %v15010_v48 }
 0xed1   : > { %18246 = vmatprep.subr.mxu0 %v22116_v29  ;;  %18258 = vmatpush3.msra.mxu1 %v14987_v38 }
 0xed2   : > { %18247 = vmatpush3.msk.msra.mxu0 %vm21553_vm2, %v18592_v2  ;;  %18259 = vmatprep.subr.mxu1 %v22116_v29 }
 0xed3   : > { %18248 = vmatprep.subr.mxu0 %v22116_v29  ;;  %18260 = vmatpush3.msra.mxu1 %v14993_v57 }
 0xed4   : > { %18249 = vmatpush3.msk.msra.mxu0 %vm21576_vm14, %v18592_v2  ;;  %18250 = vmatprep.mubr.msk.f32.mxu0 %vm22172_vm12, %v22116_v29 }
 0xed5   : > { %18261 = vmatprep.subr.mxu1 %v22116_v29  ;;  %18272 = vmatprep.subr.mxu0 %v22116_v29 }
 0xed6   : > { %18251 = vmatmul.mubr.f32.vlgmr.msra.gmra.mxu0 %v22342_v42  ;;  %18262 = vmatpush3.msra.mxu1 %v14999_v55 }
 0xed7   : > { %18273 = vmatpush3.msra.mxu0 %v21499_v6  ;;  %18263 = vmatprep.subr.mxu1 %v22116_v29 }
 0xed8   : > { %18274 = vmatprep.subr.mxu0 %v22116_v29  ;;  %18264 = vmatpush3.msra.mxu1 %v15005_v51 }
 0xed9   : > { %18275 = vmatpush3.msra.mxu0 %v21513_v53  ;;  %18265 = vmatprep.subr.mxu1 %v22116_v29 }
 0xeda   : > { %18276 = vmatprep.subr.mxu0 %v22116_v29  ;;  %18266 = vmatpush3.msra.mxu1 %v15011_v50 }
 0xedb   : > { %18277 = vmatpush3.msra.mxu0 %v21529_v45  ;;  %18267 = vmatprep.subr.mxu1 %v22116_v29 }
 0xedc   : > { %18278 = vmatprep.subr.mxu0 %v22116_v29  ;;  %18268 = vmatpush3.msra.mxu1 %v15017_v22 }
 0xedd   : > { %18279 = vmatpush3.msra.mxu0 %v21541_v9  ;;  %18269 = vmatprep.mubr.msk.f32.mxu1 %vm22172_vm12, %v22116_v29 }
 0xede   : > { %18280 = vmatprep.subr.mxu0 %v22116_v29  ;;  %18291 = vmatprep.subr.mxu1 %v22116_v29 }
 0xedf   : > { %18270 = vmatmul.mubr.f32.vlgmr.msra.gmra.mxu1 %v22343_v30  ;;  %18281 = vmatpush3.msra.mxu0 %v21570_v10 }
 0xee0   : > { %18292 = vmatpush3.msk.msra.mxu1 %vm21470_vm6, %v18592_v2  ;;  %18282 = vmatprep.subr.mxu0 %v22116_v29 }
 0xee1   : > { %18293 = vmatprep.subr.mxu1 %v22116_v29  ;;  %18283 = vmatpush3.msra.mxu0 %v21594_v40 }
 0xee2   : > { %18294 = vmatpush3.msk.msra.mxu1 %vm21478_vm13, %v18592_v2  ;;  %18284 = vmatprep.subr.mxu0 %v22116_v29 }
 0xee3   : > { %18295 = vmatprep.subr.mxu1 %v22116_v29  ;;  %18285 = vmatpush3.msra.mxu0 %v21608_v17 }
 0xee4   : > { %18296 = vmatpush3.msk.msra.mxu1 %vm21489_vm9, %v18592_v2  ;;  %18286 = vmatprep.subr.mxu0 %v22116_v29 }
 0xee5   : > { %18297 = vmatprep.subr.mxu1 %v22116_v29  ;;  %18287 = vmatpush3.msra.mxu0 %v21620_v4 }
 0xee6   : > { %18288 = vmatprep.mubr.msk.f32.mxu0 %vm22172_vm12, %v22116_v29  ;;  %18298 = vmatpush3.msk.msra.mxu1 %vm21505_vm3, %v18592_v2 }
 0xee7   : > { %18289 = vmatmul.mubr.f32.vlgmr.msra.gmra.mxu0 %v22344_v41  ;;  %18299 = vmatprep.subr.mxu1 %v22116_v29 }
 0xee8   : > { %18310 = vmatprep.subr.mxu0 %v22116_v29  ;;  %18300 = vmatpush3.msk.msra.mxu1 %vm21523_vm10, %v18592_v2 }
 0xee9   : > { %18311 = vmatpush3.msra.mxu0 %v14973_v56  ;;  %18301 = vmatprep.subr.mxu1 %v22116_v29 }
 0xeea   : > { %18312 = vmatprep.subr.mxu0 %v22116_v29  ;;  %18302 = vmatpush3.msk.msra.mxu1 %vm21537_vm1, %v18592_v2 }
 0xeeb   : > { %18313 = vmatpush3.msra.mxu0 %v14979_v21  ;;  %18303 = vmatprep.subr.mxu1 %v22116_v29 }
 0xeec   : > { %18314 = vmatprep.subr.mxu0 %v22116_v29  ;;  %18304 = vmatpush3.msk.msra.mxu1 %vm21553_vm2, %v18592_v2 }
 0xeed   : > { %18315 = vmatpush3.msra.mxu0 %v14985_v16  ;;  %18305 = vmatprep.subr.mxu1 %v22116_v29 }
 0xeee   : > { %18316 = vmatprep.subr.mxu0 %v22116_v29  ;;  %18306 = vmatpush3.msk.msra.mxu1 %vm21576_vm14, %v18592_v2 }
 0xeef   : > { %18307 = vmatprep.mubr.msk.f32.mxu1 %vm22172_vm12, %v22116_v29  ;;  %18317 = vmatpush3.msra.mxu0 %v14991_v31 }
 0xef0   : > { %18308 = vmatmul.mubr.f32.vlgmr.msra.gmra.mxu1 %v22345_v61  ;;  %18318 = vmatprep.subr.mxu0 %v22116_v29 }
 0xef1   : > { %18329 = vmatprep.subr.mxu1 %v22116_v29  ;;  %18319 = vmatpush3.msra.mxu0 %v14997_v15 }
 0xef2   : > { %18330 = vmatpush3.msk.msra.mxu1 %vm21470_vm6, %v18592_v2  ;;  %18320 = vmatprep.subr.mxu0 %v22116_v29 }
 0xef3   : > { %18331 = vmatprep.subr.mxu1 %v22116_v29  ;;  %18321 = vmatpush3.msra.mxu0 %v15003_v7 }
 0xef4   : > { %18332 = vmatpush3.msk.msra.mxu1 %vm21478_vm13, %v18592_v2  ;;  %18322 = vmatprep.subr.mxu0 %v22116_v29 }
 0xef5   : > { %18333 = vmatprep.subr.mxu1 %v22116_v29  ;;  %18323 = vmatpush3.msra.mxu0 %v15009_v12 }
 0xef6   : > { %18334 = vmatpush3.msk.msra.mxu1 %vm21489_vm9, %v18592_v2  ;;  %18324 = vmatprep.subr.mxu0 %v22116_v29 }
 0xef7   : > { %18335 = vmatprep.subr.mxu1 %v22116_v29  ;;  %18325 = vmatpush3.msra.mxu0 %v15015_v54 }
 0xef8   : > { %18326 = vmatprep.mubr.msk.f32.mxu0 %vm22172_vm12, %v22116_v29  ;;  %18336 = vmatpush3.msk.msra.mxu1 %vm21505_vm3, %v18592_v2 }
 0xef9   : > { %18327 = vmatmul.mubr.f32.vlgmr.msra.gmra.mxu0 %v22343_v30  ;;  %18337 = vmatprep.subr.mxu1 %v22116_v29 }
 0xefa   : > { %18338 = vmatpush3.msk.msra.mxu1 %vm21523_vm10, %v18592_v2  ;;  %18345 = vmatprep.mubr.msk.f32.mxu1 %vm22172_vm12, %v22116_v29 }
 0xefb   : > { %18339 = vmatprep.subr.mxu1 %v22116_v29 }
 0xefc   : > { %18340 = vmatpush3.msk.msra.mxu1 %vm21537_vm1, %v18592_v2 }
 0xefd   : > { %18341 = vmatprep.subr.mxu1 %v22116_v29 }
 0xefe   : > { %18342 = vmatpush3.msk.msra.mxu1 %vm21553_vm2, %v18592_v2 }
 0xeff   : > { %18343 = vmatprep.subr.mxu1 %v22116_v29 }
 0xf00   : > { %18344 = vmatpush3.msk.msra.mxu1 %vm21576_vm14, %v18592_v2 }
 0xf01   : > { %18346 = vmatmul.mubr.f32.vlgmr.msra.gmra.mxu1 %v22343_v30 }
 0xf02   : > { %18427 = shalt.err (!%p18424_p3)
}
 0xf03   : > { %s18428_s26 = scalar_lea.hbm %s15414_s14, 128  ;;  %s18432_s22 = scalar_lea.hbm %s22346_s10, 256 }
 0xf04   : > { %p18429_p4 = scmp.ne.s32.totalorder %s15414_s14, %s18428_s26  ;;  %p18433_p9 = scmp.lt.s32.totalorder %s15414_s14, %s22346_s10 }
 0xf05   : > { %p18434_p10 = scmp.lt.s32.totalorder %s18432_s22, %s18428_s26 }
 0xf06   : > { %p18430_p7 = pnand %p18429_p4, %p18711_p5 }
 0xf07   : > { %p18435_p11 = por %p18434_p10, %p18433_p9 }
 0xf08   : > { %p18431_p8 = pneg %p18430_p7 }
 0xf0a   : > { %p18436_p12 = pnand %p18435_p11, %p18431_p8 }
 0xf0c   : > { %18439 = shalt.err (!%p18436_p12)
}
 0xf0d   : > { %18349 = dma.vmem_to_hbm [thread:$0]  (%p18711_p5), %s15417_s0, 128, %s15414_s14, %s21792_s1  }
 0xf0e   : > { %s22347_s2 = sshll.u32 %s18692_s8, 7  ;;  %s15881_s6 = sshll.u32 %s18692_s8, 6 }
 0xf0f   : > { %s21812_s5 = scalar_lea.hbm %s21930_s11, %s22347_s2  ;;  %s15403_s22 = sshll.u32 %s20448_s25, 4  ;;  %s15404_s22 = int_to_ptr.vmem [resolvable:$true] %s15403_s22 }
 0xf10   : > { %s15401_s24 = scalar_lea.hbm %s21928_s9, %s15881_s6  ;;  %s15372_s16 = scalar_lea.sflag [#allocation4], %s20444_s23 }
 0xf11   : > { %s18440_s7 = scalar_lea.vmem %s15404_s22, 64  ;;  %s18594_s0 = smov [#allocation3]  }
 0xf12   : > { %p18441_p13 = scmp.ne.s32.totalorder %s15404_s22, %s18440_s7  ;;  %s18444_s14 = sshll.u32 %s18594_s0, 4  ;;  %s18445_s14 = int_to_ptr.vmem [resolvable:$false] %s18444_s14 }
 0xf13   : > { %s18446_s10 = scalar_lea.vmem %s18445_s14, 128  ;;  %p18447_p2 = scmp.lt.s32.totalorder %s15404_s22, %s18445_s14 }
 0xf14   : > { %p18442_p0 = pnand %p18441_p13, %p18711_p5  ;;  %p18448_p3 = scmp.lt.s32.totalorder %s18446_s10, %s18440_s7 }
 0xf16   : > { %p18443_p1 = pneg %p18442_p0  ;;  %p18449_p4 = por %p18448_p3, %p18447_p2 }
 0xf18   : > { %p18450_p7 = pnand %p18449_p4, %p18443_p1 }
 0xf1a   : > { %18453 = shalt.err (!%p18450_p7)
}
 0xf1b   : > { %s18454_s25 = scalar_lea.hbm %s15401_s24, 64  ;;  %s18458_s4 = scalar_lea.hbm %s21928_s9, 128 }
 0xf1c   : > { %p18455_p8 = scmp.ne.s32.totalorder %s15401_s24, %s18454_s25  ;;  %p18459_p11 = scmp.lt.s32.totalorder %s15401_s24, %s21928_s9 }
 0xf1d   : > { %p18460_p12 = scmp.lt.s32.totalorder %s18458_s4, %s18454_s25 }
 0xf1e   : > { %p18456_p9 = pnand %p18455_p8, %p18711_p5 }
 0xf1f   : > { %p18461_p13 = por %p18460_p12, %p18459_p11 }
 0xf20   : > { %p18457_p10 = pneg %p18456_p9 }
 0xf22   : > { %p18462_p0 = pnand %p18461_p13, %p18457_p10 }
 0xf24   : > { %18465 = shalt.err (!%p18462_p0)
}
 0xf25   : > { %18348 = dma.vmem_to_hbm [thread:$0]  (%p18711_p5), %s15404_s22, 64, %s15401_s24, %s15372_s16  }
 0xf26   : > { %s15429_s7 = sshll.u32 %s21462_s17, 4  ;;  %s18595_s26 = smov [#allocation7]   ;;  %s15430_s7 = int_to_ptr.vmem [resolvable:$true] %s15429_s7 }
 0xf27   : > { %s18466_s10 = scalar_lea.vmem %s15430_s7, 128  ;;  %s18470_s0 = sshll.u32 %s18595_s26, 4  ;;  %s18471_s0 = int_to_ptr.vmem [resolvable:$false] %s18470_s0 }
 0xf28   : > { %p18467_p1 = scmp.ne.s32.totalorder %s15430_s7, %s18466_s10  ;;  %s18472_s14 = scalar_lea.vmem %s18471_s0, 256 }
 0xf29   : > { %p18473_p4 = scmp.lt.s32.totalorder %s15430_s7, %s18471_s0  ;;  %p18474_p7 = scmp.lt.s32.totalorder %s18472_s14, %s18466_s10 }
 0xf2a   : > { %p18468_p2 = pnand %p18467_p1, %p18711_p5 }
 0xf2b   : > { %p18475_p8 = por %p18474_p7, %p18473_p4 }
 0xf2c   : > { %p18469_p3 = pneg %p18468_p2 }
 0xf2e   : > { %p18476_p9 = pnand %p18475_p8, %p18469_p3 }
 0xf30   : > { %18479 = shalt.err (!%p18476_p9)
}
 0xf31   : > { %s18480_s17 = scalar_lea.hbm %s21812_s5, 128  ;;  %s18484_s16 = scalar_lea.hbm %s21930_s11, 256 }
 0xf32   : > { %p18481_p10 = scmp.ne.s32.totalorder %s21812_s5, %s18480_s17  ;;  %p18485_p13 = scmp.lt.s32.totalorder %s21812_s5, %s21930_s11 }
 0xf33   : > { %p18486_p0 = scmp.lt.s32.totalorder %s18484_s16, %s18480_s17 }
 0xf34   : > { %p18482_p11 = pnand %p18481_p10, %p18711_p5 }
 0xf35   : > { %p18487_p1 = por %p18486_p0, %p18485_p13 }
 0xf36   : > { %p18483_p12 = pneg %p18482_p11 }
 0xf38   : > { %p18488_p2 = pnand %p18487_p1, %p18483_p12 }
 0xf3a   : > { %18491 = shalt.err (!%p18488_p2)
}
 0xf3b   : > { %18350 = dma.vmem_to_hbm [thread:$0]  (%p18711_p5), %s15430_s7, 128, %s21812_s5, %s21792_s1   ;;  %v22348_v27 = vld [vmem:[#allocation14_spill] sm:$0xff]  ;;  %v14407_v13 = vpop.permute.xlu1 %14406  ;;  %vm14862_vm12 = vcmask 57344  }
 0xf3c   : > { %v14411_v62 = vsub.s32 0, %v22348_v27  ;;  %s15884_s1 = sshll.u32 %s18692_s8, 4  ;;  %s458_s5 = scalar_lea.vmem [#allocation8], %s20444_s23 }
 0xf3d   : > { %s15442_s3 = sshll.u32 %s458_s5, 4  ;;  %s21858_s21 = scalar_lea.hbm %s21931_s12, %s15884_s1  ;;  %s15443_s3 = int_to_ptr.vmem [resolvable:$true] %s15442_s3 }
 0xf3e   : > { %v14412_v32 = vrot.slane %v14407_v13, %v14411_v62  ;;  %s22349_s7 = sand.u32 1, %s18692_s8   ;;  %s18492_s26 = scalar_lea.vmem %s15443_s3, 16 }
 0xf3f   : > { %s21862_s10 = scalar_lea.sflag [#allocation9], %s22349_s7  ;;  %p18493_p3 = scmp.ne.s32.totalorder %s15443_s3, %s18492_s26 }
 0xf40   : > { %s18596_s0 = smov [#allocation8]  }
 0xf41   : > { %p18494_p4 = pnand %p18493_p3, %p18711_p5  ;;  %s18496_s14 = sshll.u32 %s18596_s0, 4  ;;  %s18497_s14 = int_to_ptr.vmem [resolvable:$false] %s18496_s14 }
 0xf42   : > { %s18498_s17 = scalar_lea.vmem %s18497_s14, 32  ;;  %p18499_p8 = scmp.lt.s32.totalorder %s15443_s3, %s18497_s14 }
 0xf43   : > { %p18495_p7 = pneg %p18494_p4  ;;  %p18500_p9 = scmp.lt.s32.totalorder %s18498_s17, %s18492_s26 }
 0xf45   : > { %p18501_p10 = por %p18500_p9, %p18499_p8 }
 0xf47   : > { %p18502_p11 = pnand %p18501_p10, %p18495_p7 }
 0xf7c   : > { %v14488_v29 = vpop.f32.mrf.mxu0 }
 0xf7d   : > { %v14489_v6 = vadd.f32 %v14488_v29, %v14412_v32 }
 0xf7e   : > { %v18208_v35 = vpop.f32.mrf.mxu0 }
 0xf80   : > { %v14638_v49 = vpop.f32.mrf.mxu0 }
 0xf82   : > { %v18218_v23 = vpop.f32.mrf.mxu0 }
 0xf84   : > { %v14564_v43 = vpop.f32.mrf.mxu1 }
 0xf85   : > { %v14565_v36 = vadd.f32 %v14564_v43, %v14489_v6  ;;  %v14786_v58 = vpop.f32.mrf.mxu0 }
 0xf86   : > { %v18213_v0 = vpop.f32.mrf.mxu1 }
 0xf87   : > { %v14639_v46 = vadd.f32 %v14638_v49, %v14565_v36  ;;  %v18228_v53 = vpop.f32.mrf.mxu0 }
 0xf88   : > { %v14712_v20 = vpop.f32.mrf.mxu1 }
 0xf89   : > { %v14713_v25 = vadd.f32 %v14712_v20, %v14639_v46 }
 0xf8a   : > { %v18223_v60 = vpop.f32.mrf.mxu1 }
 0xf8b   : > { %v14787_v1 = vadd.f32 %v14786_v58, %v14713_v25 }
 0xf8c   : > { %v14858_v18 = vpop.f32.mrf.mxu1 }
 0xf8d   : > { %v14859_v45 = vadd.f32 %v14858_v18, %v14787_v1 }
 0xf8e   : > { %v18233_v56 = vpop.f32.mrf.mxu1 }
 0xf8f   : > { %14863 = vst.msk [vmem:[%s458_s5] sm:$0x1] %vm14862_vm12, %v14859_v45 }
 0xf90   : > { %18505 = shalt.err (!%p18502_p11)
}
 0xf91   : > { %s18506_s22 = scalar_lea.hbm %s21858_s21, 16  ;;  %s18510_s25 = scalar_lea.hbm %s21931_s12, 32 }
 0xf92   : > { %p18507_p12 = scmp.ne.s32.totalorder %s21858_s21, %s18506_s22  ;;  %p18511_p1 = scmp.lt.s32.totalorder %s21858_s21, %s21931_s12 }
 0xf93   : > { %p18512_p2 = scmp.lt.s32.totalorder %s18510_s25, %s18506_s22 }
 0xf94   : > { %p18508_p13 = pnand %p18507_p12, %p18711_p5 }
 0xf95   : > { %p18513_p3 = por %p18512_p2, %p18511_p1 }
 0xf96   : > { %p18509_p0 = pneg %p18508_p13 }
 0xf98   : > { %p18514_p4 = pnand %p18513_p3, %p18509_p0 }
 0xf9a   : > { %18517 = shalt.err (!%p18514_p4)
}
 0xf9b   : > { %18351 = dma.vmem_to_hbm [thread:$0]  (%p18711_p5), %s15443_s3, 16, %s21858_s21, %s21862_s10   ;;  %v14951_v37 = vpop.f32.mrf.mxu0  ;;  %vm15369_vm7 = vcmask 253952  }
 0xf9c   : > { %s464_s4 = scalar_lea.vmem [#allocation10], %s20444_s23  ;;  %s15453_s7 = scalar_lea.hbm %s21932_s13, %s15884_s1 }
 0xf9d   : > { %v18252_v3 = vpop.f32.mrf.mxu0  ;;  %s15455_s6 = sshll.u32 %s464_s4, 4  ;;  %s18597_s0 = smov [#allocation10]   ;;  %s15456_s6 = int_to_ptr.vmem [resolvable:$true] %s15455_s6 }
 0xf9e   : > { %s18518_s26 = scalar_lea.vmem %s15456_s6, 16  ;;  %s18522_s23 = sshll.u32 %s18597_s0, 4  ;;  %s18523_s23 = int_to_ptr.vmem [resolvable:$false] %s18522_s23 }
 0xf9f   : > { %v15054_v8 = vpop.f32.mrf.mxu1  ;;  %p18519_p7 = scmp.ne.s32.totalorder %s15456_s6, %s18518_s26  ;;  %s18524_s14 = scalar_lea.vmem %s18523_s23, 32 }
 0xfa0   : > { %v15055_v16 = vadd.f32 %v15054_v8, %v14951_v37  ;;  %p18525_p10 = scmp.lt.s32.totalorder %s15456_s6, %s18523_s23  ;;  %p18526_p11 = scmp.lt.s32.totalorder %s18524_s14, %s18518_s26 }
 0xfa1   : > { %v18271_v9 = vpop.f32.mrf.mxu1  ;;  %p18520_p8 = pnand %p18519_p7, %p18711_p5 }
 0xfa2   : > { %p18527_p12 = por %p18526_p11, %p18525_p10 }
 0xfa3   : > { %p18521_p9 = pneg %p18520_p8 }
 0xfa5   : > { %p18528_p13 = pnand %p18527_p12, %p18521_p9 }
 0xfa7   : > { %v15134_v5 = vpop.f32.mrf.mxu0 }
 0xfa8   : > { %v15135_v10 = vadd.f32 %v15134_v5, %v15055_v16 }
 0xfa9   : > { %v18290_v21 = vpop.f32.mrf.mxu0 }
 0xfb0   : > { %v15207_v28 = vpop.f32.mrf.mxu1 }
 0xfb1   : > { %v15208_v34 = vadd.f32 %v15207_v28, %v15135_v10 }
 0xfb2   : > { %v18309_v24 = vpop.f32.mrf.mxu1 }
 0xfb9   : > { %v15294_v39 = vpop.f32.mrf.mxu0 }
 0xfba   : > { %v15295_v14 = vadd.f32 %v15294_v39, %v15208_v34 }
 0xfbb   : > { %v18328_v2 = vpop.f32.mrf.mxu0 }
 0xfc1   : > { %v15365_v26 = vpop.f32.mrf.mxu1 }
 0xfc2   : > { %v15366_v31 = vadd.f32 %v15365_v26, %v15295_v14 }
 0xfc3   : > { %v18347_v40 = vpop.f32.mrf.mxu1 }
 0xfc4   : > { %15370 = vst.msk [vmem:[%s464_s4] sm:$0x1] %vm15369_vm7, %v15366_v31 }
 0xfc5   : > { %18531 = shalt.err (!%p18528_p13)
}
 0xfc6   : > { %s18532_s8 = scalar_lea.hbm %s15453_s7, 16  ;;  %s18536_s22 = scalar_lea.hbm %s21932_s13, 32 }
 0xfc7   : > { %p18533_p0 = scmp.ne.s32.totalorder %s15453_s7, %s18532_s8  ;;  %p18537_p3 = scmp.lt.s32.totalorder %s15453_s7, %s21932_s13 }
 0xfc8   : > { %p18538_p4 = scmp.lt.s32.totalorder %s18536_s22, %s18532_s8 }
 0xfc9   : > { %p18534_p1 = pnand %p18533_p0, %p18711_p5 }
 0xfca   : > { %p18539_p7 = por %p18538_p4, %p18537_p3 }
 0xfcb   : > { %p18535_p2 = pneg %p18534_p1 }
 0xfcd   : > { %p18540_p8 = pnand %p18539_p7, %p18535_p2 }
 0xfcf   : > { %18543 = shalt.err (!%p18540_p8)
}
 0xfd0   : > { %18352 = dma.vmem_to_hbm [thread:$0]  (%p18711_p5), %s15456_s6, 16, %s15453_s7, %s21862_s10  }
 0xfd1 PF: > { %p18374_p9 = scmp.ge.s32.totalorder %s18586_s30, 2  ;;  %s15467_s25 = sand.u32 1, %s18574_s27  }
 0xfd2   : > { %s15468_s2 = scalar_lea.sflag [#allocation4], %s15467_s25 }
 0xfd3   : > { %p18359_p10 = pnand %p18374_p9, %p18715_p6 }
 0xfd5   : > { %p18360_p11 = pneg %p18359_p10 }
 0xfd7   : > { %18561 = dma.done.wait (%p18360_p11), %s15468_s2, 64  }
 0xfd8   : > { %18563 = vsyncadd (%p18360_p11), %s15468_s2, 4294967232  ;;  %s22350_s5 = sadd.s32 4294967294, %s18586_s30  }
 0xfd9   : > { %s15476_s4 = sand.u32 1, %s22350_s5  }
 0xfda   : > { %s15477_s3 = scalar_lea.sflag [#allocation6], %s15476_s4 }
 0xfdb   : > { %18565 = dma.done.wait (%p18360_p11), %s15477_s3, 256  }
 0xfdc   : > { %18567 = vsyncadd (%p18360_p11), %s15477_s3, 4294967040  ;;  %s15495_s19 = scalar_lea.sflag [#allocation9], %s15476_s4 }
 0xfdd   : > { %18569 = dma.done.wait (%p18360_p11), %s15495_s19, 32  }
 0xfde   : > { %18571 = vsyncadd (%p18360_p11), %s15495_s19, 4294967264  ;;  %p32_p5 = scmp.ge.s32.totalorder %s18696_s15, 4   ;;  %s22351_s27 = smov %s18578_s28 }
 0xfdf   : > { %s22352_s28 = smov %s18582_s29  ;;  %s22353_s29 = smov %s18709_s18 }
 0xfe0   : > { %s22354_s30 = smov %s18696_s15  ;;  %34 = sbr.rel (!%p32_p5) target bundleno = 17 (0x11), region = 167 }
 0xfe5   :  { %15507 = vsyncpa [#allocation4], 1 }
 0xfe6   :  { %15509 = vsyncpa [#allocation4 + $0x1], 1 }
 0xfe7   :  { %15510 = vsyncpa [#allocation6], 1 }
 0xfe8   :  { %15512 = vsyncpa [#allocation6 + $0x1], 1 }
 0xfe9   :  { %15513 = vsyncpa [#allocation9], 1 }
 0xfea   :  { %15515 = vsyncpa [#allocation9 + $0x1], 1 }

</bundles_post_ra>
